<compile_context>
chip_gen: v6e
topology: v6e:2x2x1
jax: 0.10.0
libtpu: 0.0.40
codegen_flags: <defaults>
</compile_context>

<pallas_src>
import jax
import jax.numpy as jnp
from jax import lax
from jax.experimental import pallas as pl
from jax.experimental.pallas import tpu as pltpu

# make the pure-JAX reference use full-precision matmuls so it matches the kernel
jax.config.update("jax_default_matmul_precision", "highest")

# ----------------- small demo configuration (consistent with the module) -----
VOCAB = 50        # vocab_size
EMB = 16          # embedding_dim
HID = 32          # hidden_dim per direction (power of two -> cheap lane masks)
N_LAYERS = 1      # TODO(synk): n_layers > 1 would need an extra per-layer LSTM kernel taking (T,B,2H) input.
LIN_OUT = 64      # linear_output
NUM_CLASSES = 5   # num_classes
B = 4             # batch
T = 8             # sequence length
LINE_FEATS = 51   # fc_line_num / fc_total_line input dim (fixed in the module)
OUT_PAD = 128     # lane-dense padded logits width (sliced to NUM_CLASSES outside)


# ----------------------------- the fused Pallas kernel -----------------------
def skimlit_fused_kernel(tok_ref, seq_ref, emb_ref, wih_ref, whh_ref, bg_ref,
                         lines_ref, wt_ref, bt_ref, w23_ref, b23_ref,
                         wf1_ref, wf23_ref, bf_ref, out_ref):
    f32 = jnp.float32
    TB = tok_ref.shape[0]            # T*B, time-major flat (row = t*B + b)
    B_ = seq_ref.shape[0]
    T_ = TB // B_
    H = whh_ref.shape[0] // 2        # per-direction hidden size

    # ---- fused embedding lookup: one-hot matmul keeps x in VMEM end-to-end ----
    vocab = emb_ref.shape[0]
    onehot = (lax.broadcasted_iota(jnp.int32, (TB, vocab), 1)
              == tok_ref[...]).astype(f32)                                   # (T*B, V)
    x = jnp.dot(onehot, emb_ref[...], preferred_element_type=f32)            # (T*B, E)

    # ---- hoisted input projection for BOTH directions (bias folded in) -------
    gx = jnp.dot(x, wih_ref[...], preferred_element_type=f32) + bg_ref[...]  # (T*B, 8H)

    # static masks, hoisted out of the recurrence (broadcast_in_dim is not CSE'd)
    lane8h = lax.broadcasted_iota(jnp.int32, (B_, 8 * H), 1)
    fw_cols = (lane8h & H) == 0            # even 32-lane gate blocks = fw (H is a power of 2)
    lane2h = lax.broadcasted_iota(jnp.int32, (B_, 2 * H), 1)
    fw_half = lane2h < H                   # [h_fw | h_bw] layout
    last_fw = seq_ref[...] - 1             # (B,1) fw step producing the last relevant hidden
    last_bw = T_ - seq_ref[...]            # (B,1) bw step producing it

    h = jnp.zeros((B_, 2 * H), f32)        # [h_fw | h_bw]
    c = jnp.zeros((B_, 2 * H), f32)
    x1 = jnp.zeros((B_, 2 * H), f32)       # gathered last relevant hidden

    # fully-unrolled recurrence: the only serial dependency left is h @ W_hh
    for s in range(T_):
        rec = jnp.dot(h, whh_ref[...], preferred_element_type=f32)          # (B, 8H)
        gx_f = gx[s * B_:(s + 1) * B_]                                       # fw consumes x_t, t = s
        gx_b = gx[(T_ - 1 - s) * B_:(T_ - s) * B_]                           # bw consumes x_t, t = T-1-s
        gates = rec + jnp.where(fw_cols, gx_f, gx_b)                         # (B, 8H), gate-major
        i_cat = jax.nn.sigmoid(gates[:, 0:2 * H])
        f_cat = jax.nn.sigmoid(gates[:, 2 * H:4 * H])
        o_cat = jax.nn.sigmoid(gates[:, 4 * H:6 * H])
        g_cat = jnp.tanh(gates[:, 6 * H:8 * H])
        c = f_cat * c + i_cat * g_cat
        h = o_cat * jnp.tanh(c)
        # gather_last_relevant_hidden folded into the loop:
        #   fw half wanted when s == seq_len-1, bw half when s == T - seq_len.
        sel = jnp.where(fw_half, (last_fw == s).astype(f32),
                        (last_bw == s).astype(f32))                          # (B, 2H)
        x1 = x1 + sel * h

    # ---- fused heads + final classifier --------------------------------------
    # Dropout(p=0.3): eval-mode identity.
    # TODO(synk): training-mode stochastic dropout (pltpu.prng_*) not implemented.
    h1 = jnp.maximum(
        jnp.dot(x1, wt_ref[...], preferred_element_type=f32) + bt_ref[...], 0.0)
    h23 = jnp.maximum(
        jnp.dot(lines_ref[...], w23_ref[...], preferred_element_type=f32)
        + b23_ref[...], 0.0)
    out_ref[...] = (jnp.dot(h1, wf1_ref[...], preferred_element_type=f32)
                    + jnp.dot(h23, wf23_ref[...], preferred_element_type=f32)
                    + bf_ref[...])                                           # (B, 128) lane-dense


# ----------------------------- Pallas wrapper ---------------------------------
def _full(shape):
    """Full-array VMEM block (grid=(1,))."""
    zeros = (0,) * len(shape)
    return pl.BlockSpec(shape, lambda i, _z=zeros: _z)


def skimlit_pallas(fused, tok_tm, seq, lines):
    args = (tok_tm, seq, fused["emb"], fused["wih"], fused["whh"], fused["bg"],
            lines, fused["wt"], fused["bt"], fused["w23"], fused["b23"],
            fused["wf1"], fused["wf23"], fused["bf"])
    out = pl.pallas_call(
        skimlit_fused_kernel,
        out_shape=jax.ShapeDtypeStruct((B, OUT_PAD), jnp.float32),
        grid=(1,),
        in_specs=[_full(a.shape) for a in args],
        out_specs=_full((B, OUT_PAD)),
        compiler_params=pltpu.CompilerParams(dimension_semantics=("arbitrary",)),
    )(*args)
    return out[:, :NUM_CLASSES]


# ----------------------------- parameters -------------------------------------
def init_params(key):
    ks = list(jax.random.split(key, 64))
    kit = iter(ks)

    def linear(k, fan_in, fan_out):
        bound = 1.0 / float(fan_in) ** 0.5
        kw, kb = jax.random.split(k)
        W = jax.random.uniform(kw, (fan_in, fan_out), jnp.float32, -bound, bound)
        b = jax.random.uniform(kb, (1, fan_out), jnp.float32, -bound, bound)
        return W, b

    params = {"emb": jax.random.normal(next(kit), (VOCAB, EMB), jnp.float32) * 0.1}

    lstm_layers = []
    in_dim = EMB
    for _ in range(N_LAYERS):
        layer = {}
        for direction in ("fw", "bw"):
            bound = 1.0 / float(HID) ** 0.5
            w_ih = jax.random.uniform(next(kit), (in_dim, 4 * HID), jnp.float32, -bound, bound)
            w_hh = jax.random.uniform(next(kit), (HID, 4 * HID), jnp.float32, -bound, bound)
            bias = jax.random.uniform(next(kit), (1, 4 * HID), jnp.float32, -bound, bound)
            layer[direction] = (w_ih, w_hh, bias)
        lstm_layers.append(layer)
        in_dim = 2 * HID
    params["lstm"] = lstm_layers

    params["fc_text"] = linear(next(kit), 2 * HID, LIN_OUT)
    params["fc_line"] = linear(next(kit), LINE_FEATS, 32)
    params["fc_total"] = linear(next(kit), LINE_FEATS, 32)
    params["fc_final"] = linear(next(kit), LIN_OUT + 32 + 32, NUM_CLASSES)
    return params


def prepare_fused_params(params):
    """Pack / reorder weights once (outside the hot path) for the fused kernel."""
    assert N_LAYERS == 1, "fused kernel implements the configured single bi-LSTM layer"
    H = HID

    def reorder(W):          # gate columns [i|f|g|o] -> [i|f|o|g]
        return jnp.concatenate(
            [W[:, :H], W[:, H:2 * H], W[:, 3 * H:4 * H], W[:, 2 * H:3 * H]], axis=1)

    def interleave(Wf, Wb):  # -> gate-major [i_fw i_bw f_fw f_bw o_fw o_bw g_fw g_bw]
        blocks = []
        for k in range(4):
            blocks.append(Wf[:, k * H:(k + 1) * H])
            blocks.append(Wb[:, k * H:(k + 1) * H])
        return jnp.concatenate(blocks, axis=1)

    wih_f, whh_f, b_f = params["lstm"][0]["fw"]
    wih_b, whh_b, b_b = params["lstm"][0]["bw"]
    zhh = jnp.zeros_like(whh_f)
    fused = {
        "emb": params["emb"],
        "wih": interleave(reorder(wih_f), reorder(wih_b)),                  # (E, 8H)
        "whh": jnp.concatenate([interleave(reorder(whh_f), zhh),
                                interleave(zhh, reorder(whh_b))], axis=0),  # (2H, 8H) block-structured
        "bg": interleave(reorder(b_f), reorder(b_b)),                       # (1, 8H)
    }

    Wt, bt = params["fc_text"]
    Wl, bl = params["fc_line"]
    Wtl, btl = params["fc_total"]
    Wf, bf = params["fc_final"]
    # merge fc_line_num / fc_total_line into one block-diagonal (102, 64) matmul
    w23 = jnp.zeros((2 * LINE_FEATS, 64), jnp.float32)
    w23 = w23.at[:LINE_FEATS, :32].set(Wl).at[LINE_FEATS:, 32:].set(Wtl)
    fused.update({
        "wt": Wt, "bt": bt,
        "w23": w23, "b23": jnp.concatenate([bl, btl], axis=1),
        # fc_final split over the implicit concat + zero-padded to 128 lanes
        "wf1": jnp.zeros((LIN_OUT, OUT_PAD), jnp.float32).at[:, :NUM_CLASSES].set(Wf[:LIN_OUT]),
        "wf23": jnp.zeros((64, OUT_PAD), jnp.float32).at[:, :NUM_CLASSES].set(Wf[LIN_OUT:]),
        "bf": jnp.zeros((1, OUT_PAD), jnp.float32).at[:, :NUM_CLASSES].set(bf),
    })
    return fused


# ----------------------------- forward (Pallas) --------------------------------
def skimlit_forward(fused, tokens, seq_lens, line_nums, total_lines):
    tok_tm = jnp.transpose(tokens).reshape(T * B, 1).astype(jnp.int32)   # time-major flat
    seq = seq_lens.reshape(B, 1).astype(jnp.int32)
    lines = jnp.concatenate([line_nums, total_lines], axis=1)            # (B, 102)
    return skimlit_pallas(fused, tok_tm, seq, lines)


# ----------------------------- pure-JAX reference ------------------------------
def _lstm_layer_ref(x_tbe, w_ih, w_hh, b):
    H = w_hh.shape[0]
    B_ = x_tbe.shape[1]

    def step(carry, x_t):
        h, c = carry
        gates = x_t @ w_ih + h @ w_hh + b
        i = jax.nn.sigmoid(gates[:, :H])
        f = jax.nn.sigmoid(gates[:, H:2 * H])
        g = jnp.tanh(gates[:, 2 * H:3 * H])
        o = jax.nn.sigmoid(gates[:, 3 * H:])
        c = f * c + i * g
        h = o * jnp.tanh(c)
        return (h, c), h

    init = (jnp.zeros((B_, H), jnp.float32), jnp.zeros((B_, H), jnp.float32))
    _, hs = lax.scan(step, init, x_tbe)
    return hs


def skimlit_forward_ref(params, tokens, seq_lens, line_nums, total_lines):
    emb = jnp.take(params["emb"], tokens, axis=0)
    x = jnp.transpose(emb, (1, 0, 2))
    for layer in params["lstm"]:
        out_fw = _lstm_layer_ref(x, *layer["fw"])
        out_bw = _lstm_layer_ref(x[::-1], *layer["bw"])[::-1]
        x = jnp.concatenate([out_fw, out_bw], axis=-1)
    hiddens = jnp.transpose(x, (1, 0, 2))
    idx = (seq_lens - 1).astype(jnp.int32)
    x1 = jnp.take_along_axis(hiddens, idx[:, None, None], axis=1)[:, 0, :]
    Wt, bt = params["fc_text"]
    Wl, bl = params["fc_line"]
    Wtl, btl = params["fc_total"]
    Wf, bf = params["fc_final"]
    h1 = jax.nn.relu(x1 @ Wt + bt)
    h2 = jax.nn.relu(line_nums @ Wl + bl)
    h3 = jax.nn.relu(total_lines @ Wtl + btl)
    cat = jnp.concatenate([h1, h2, h3], axis=1)
    return cat @ Wf + bf


# ----------------------------- main --------------------------------------------
if __name__ == "__main__":
    key = jax.random.PRNGKey(0)
    k_params, k_tok, k_len, k_ln, k_tl = jax.random.split(key, 5)

    params = init_params(k_params)
    fused = prepare_fused_params(params)

    tokens = jax.random.randint(k_tok, (B, T), 1, VOCAB, dtype=jnp.int32)
    seq_lens = jax.random.randint(k_len, (B,), 1, T + 1, dtype=jnp.int32)
    line_nums = jax.random.normal(k_ln, (B, LINE_FEATS), jnp.float32)
    total_lines = jax.random.normal(k_tl, (B, LINE_FEATS), jnp.float32)

    out = skimlit_forward(fused, tokens, seq_lens, line_nums, total_lines)
    out = jax.block_until_ready(out)

    ref = jax.block_until_ready(
        skimlit_forward_ref(params, tokens, seq_lens, line_nums, total_lines))

    assert out.shape == (B, NUM_CLASSES), out.shape
    err = float(jnp.max(jnp.abs(out - ref)))
    assert jnp.allclose(out, ref, atol=1e-2, rtol=1e-2), err

    print("KERNEL_OK")
</pallas_src>

<mosaic_0001>
module attributes {stable_mosaic.version = 11 : i64} {
  func.func @skimlit_fused_kernel(%arg0: i32, %arg1: memref<32x1xi32, #tpu.memory_space<vmem>>, %arg2: memref<4x1xi32, #tpu.memory_space<vmem>>, %arg3: memref<50x16xf32, #tpu.memory_space<vmem>>, %arg4: memref<16x256xf32, #tpu.memory_space<vmem>>, %arg5: memref<64x256xf32, #tpu.memory_space<vmem>>, %arg6: memref<1x256xf32, #tpu.memory_space<vmem>>, %arg7: memref<4x102xf32, #tpu.memory_space<vmem>>, %arg8: memref<64x64xf32, #tpu.memory_space<vmem>>, %arg9: memref<1x64xf32, #tpu.memory_space<vmem>>, %arg10: memref<102x64xf32, #tpu.memory_space<vmem>>, %arg11: memref<1x64xf32, #tpu.memory_space<vmem>>, %arg12: memref<64x128xf32, #tpu.memory_space<vmem>>, %arg13: memref<64x128xf32, #tpu.memory_space<vmem>>, %arg14: memref<1x128xf32, #tpu.memory_space<vmem>>, %arg15: memref<4x128xf32, #tpu.memory_space<vmem>>) attributes {dimension_semantics = [#tpu.dimension_semantics<arbitrary>], iteration_bounds = array<i64: 1>, scalar_prefetch = 0 : i64, scratch_operands = 0 : i64, tpu.core_type = #tpu.core_type<tc>, window_params = [{pipeline_mode = #tpu.pipeline_mode<synchronous>, transform_indices = @transform_0, window_bounds = array<i64: 32, 1>}, {pipeline_mode = #tpu.pipeline_mode<synchronous>, transform_indices = @transform_1, window_bounds = array<i64: 4, 1>}, {pipeline_mode = #tpu.pipeline_mode<synchronous>, transform_indices = @transform_2, window_bounds = array<i64: 50, 16>}, {pipeline_mode = #tpu.pipeline_mode<synchronous>, transform_indices = @transform_3, window_bounds = array<i64: 16, 256>}, {pipeline_mode = #tpu.pipeline_mode<synchronous>, transform_indices = @transform_4, window_bounds = array<i64: 64, 256>}, {pipeline_mode = #tpu.pipeline_mode<synchronous>, transform_indices = @transform_5, window_bounds = array<i64: 1, 256>}, {pipeline_mode = #tpu.pipeline_mode<synchronous>, transform_indices = @transform_6, window_bounds = array<i64: 4, 102>}, {pipeline_mode = #tpu.pipeline_mode<synchronous>, transform_indices = @transform_7, window_bounds = array<i64: 64, 64>}, {pipeline_mode = #tpu.pipeline_mode<synchronous>, transform_indices = @transform_8, window_bounds = array<i64: 1, 64>}, {pipeline_mode = #tpu.pipeline_mode<synchronous>, transform_indices = @transform_9, window_bounds = array<i64: 102, 64>}, {pipeline_mode = #tpu.pipeline_mode<synchronous>, transform_indices = @transform_10, window_bounds = array<i64: 1, 64>}, {pipeline_mode = #tpu.pipeline_mode<synchronous>, transform_indices = @transform_11, window_bounds = array<i64: 64, 128>}, {pipeline_mode = #tpu.pipeline_mode<synchronous>, transform_indices = @transform_12, window_bounds = array<i64: 64, 128>}, {pipeline_mode = #tpu.pipeline_mode<synchronous>, transform_indices = @transform_13, window_bounds = array<i64: 1, 128>}, {pipeline_mode = #tpu.pipeline_mode<synchronous>, transform_indices = @transform_14, window_bounds = array<i64: 4, 128>}]} {
    %0 = tpu.iota {dimensions = array<i32: 1>} : vector<32x50xi32>
    %c0 = arith.constant 0 : index
    %c0_0 = arith.constant 0 : index
    %1 = vector.load %arg1[%c0, %c0_0] : memref<32x1xi32, #tpu.memory_space<vmem>>, vector<32x1xi32>
    %2 = vector.broadcast %1 : vector<32x1xi32> to vector<32x50xi32>
    %3 = arith.cmpi eq, %0, %2 : vector<32x50xi32>
    %4 = arith.extui %3 : vector<32x50xi1> to vector<32x50xi32>
    %5 = arith.sitofp %4 : vector<32x50xi32> to vector<32x50xf32>
    %c0_1 = arith.constant 0 : index
    %c0_2 = arith.constant 0 : index
    %6 = vector.load %arg3[%c0_1, %c0_2] : memref<50x16xf32, #tpu.memory_space<vmem>>, vector<50x16xf32>
    %cst = arith.constant dense<0.000000e+00> : vector<32x16xf32>
    %7 = tpu.matmul %5, %6, %cst {dimension_numbers = #tpu.dot_dimension_numbers<[1], [0], [0], [1], [0, 0, 1, 1], [], []>, precision = #tpu.contract_precision<fp32>} : vector<32x50xf32>, vector<50x16xf32>, vector<32x16xf32> -> vector<32x16xf32>
    %c0_3 = arith.constant 0 : index
    %c0_4 = arith.constant 0 : index
    %8 = vector.load %arg4[%c0_3, %c0_4] : memref<16x256xf32, #tpu.memory_space<vmem>>, vector<16x256xf32>
    %cst_5 = arith.constant dense<0.000000e+00> : vector<32x256xf32>
    %9 = tpu.matmul %7, %8, %cst_5 {dimension_numbers = #tpu.dot_dimension_numbers<[1], [0], [0], [1], [0, 0, 1, 1], [], []>, precision = #tpu.contract_precision<fp32>} : vector<32x16xf32>, vector<16x256xf32>, vector<32x256xf32> -> vector<32x256xf32>
    %c0_6 = arith.constant 0 : index
    %c0_7 = arith.constant 0 : index
    %10 = vector.load %arg6[%c0_6, %c0_7] : memref<1x256xf32, #tpu.memory_space<vmem>>, vector<1x256xf32>
    %11 = vector.broadcast %10 : vector<1x256xf32> to vector<32x256xf32>
    %12 = arith.addf %9, %11 : vector<32x256xf32>
    %13 = tpu.iota {dimensions = array<i32: 1>} : vector<4x256xi32>
    %c32_i32 = arith.constant 32 : i32
    %14 = vector.broadcast %c32_i32 : i32 to vector<4x256xi32>
    %15 = arith.andi %13, %14 : vector<4x256xi32>
    %c0_i32 = arith.constant 0 : i32
    %16 = vector.broadcast %c0_i32 : i32 to vector<4x256xi32>
    %17 = arith.cmpi eq, %15, %16 : vector<4x256xi32>
    %18 = tpu.iota {dimensions = array<i32: 1>} : vector<4x64xi32>
    %c32_i32_8 = arith.constant 32 : i32
    %19 = vector.broadcast %c32_i32_8 : i32 to vector<4x64xi32>
    %20 = arith.cmpi slt, %18, %19 : vector<4x64xi32>
    %c0_9 = arith.constant 0 : index
    %c0_10 = arith.constant 0 : index
    %21 = vector.load %arg2[%c0_9, %c0_10] : memref<4x1xi32, #tpu.memory_space<vmem>>, vector<4x1xi32>
    %c1_i32 = arith.constant 1 : i32
    %22 = vector.broadcast %c1_i32 : i32 to vector<4x1xi32>
    %23 = arith.subi %21, %22 : vector<4x1xi32>
    %c0_11 = arith.constant 0 : index
    %c0_12 = arith.constant 0 : index
    %24 = vector.load %arg2[%c0_11, %c0_12] : memref<4x1xi32, #tpu.memory_space<vmem>>, vector<4x1xi32>
    %c8_i32 = arith.constant 8 : i32
    %25 = vector.broadcast %c8_i32 : i32 to vector<4x1xi32>
    %26 = arith.subi %25, %24 : vector<4x1xi32>
    %cst_13 = arith.constant 0.000000e+00 : f32
    %27 = vector.broadcast %cst_13 : f32 to vector<4x64xf32>
    %cst_14 = arith.constant 0.000000e+00 : f32
    %28 = vector.broadcast %cst_14 : f32 to vector<4x64xf32>
    %cst_15 = arith.constant 0.000000e+00 : f32
    %29 = vector.broadcast %cst_15 : f32 to vector<4x64xf32>
    %c0_16 = arith.constant 0 : index
    %c0_17 = arith.constant 0 : index
    %30 = vector.load %arg5[%c0_16, %c0_17] : memref<64x256xf32, #tpu.memory_space<vmem>>, vector<64x256xf32>
    %cst_18 = arith.constant dense<0.000000e+00> : vector<4x256xf32>
    %31 = tpu.matmul %27, %30, %cst_18 {dimension_numbers = #tpu.dot_dimension_numbers<[1], [0], [0], [1], [0, 0, 1, 1], [], []>, precision = #tpu.contract_precision<fp32>} : vector<4x64xf32>, vector<64x256xf32>, vector<4x256xf32> -> vector<4x256xf32>
    %32 = vector.extract_strided_slice %12 {offsets = [0, 0], sizes = [4, 256], strides = [1, 1]} : vector<32x256xf32> to vector<4x256xf32>
    %33 = vector.extract_strided_slice %12 {offsets = [28, 0], sizes = [4, 256], strides = [1, 1]} : vector<32x256xf32> to vector<4x256xf32>
    %34 = arith.select %17, %32, %33 : vector<4x256xi1>, vector<4x256xf32>
    %35 = arith.addf %31, %34 : vector<4x256xf32>
    %36 = vector.extract_strided_slice %35 {offsets = [0, 0], sizes = [4, 64], strides = [1, 1]} : vector<4x256xf32> to vector<4x64xf32>
    %37 = arith.negf %36 : vector<4x64xf32>
    %38 = math.exp %37 : vector<4x64xf32>
    %cst_19 = arith.constant 1.000000e+00 : f32
    %39 = vector.broadcast %cst_19 : f32 to vector<4x64xf32>
    %40 = arith.addf %39, %38 : vector<4x64xf32>
    %41 = arith.divf %39, %40 : vector<4x64xf32>
    %42 = vector.extract_strided_slice %35 {offsets = [0, 64], sizes = [4, 64], strides = [1, 1]} : vector<4x256xf32> to vector<4x64xf32>
    %43 = arith.negf %42 : vector<4x64xf32>
    %44 = math.exp %43 : vector<4x64xf32>
    %cst_20 = arith.constant 1.000000e+00 : f32
    %45 = vector.broadcast %cst_20 : f32 to vector<4x64xf32>
    %46 = arith.addf %45, %44 : vector<4x64xf32>
    %47 = arith.divf %45, %46 : vector<4x64xf32>
    %48 = vector.extract_strided_slice %35 {offsets = [0, 128], sizes = [4, 64], strides = [1, 1]} : vector<4x256xf32> to vector<4x64xf32>
    %49 = arith.negf %48 : vector<4x64xf32>
    %50 = math.exp %49 : vector<4x64xf32>
    %cst_21 = arith.constant 1.000000e+00 : f32
    %51 = vector.broadcast %cst_21 : f32 to vector<4x64xf32>
    %52 = arith.addf %51, %50 : vector<4x64xf32>
    %53 = arith.divf %51, %52 : vector<4x64xf32>
    %54 = vector.extract_strided_slice %35 {offsets = [0, 192], sizes = [4, 64], strides = [1, 1]} : vector<4x256xf32> to vector<4x64xf32>
    %55 = math.tanh %54 : vector<4x64xf32>
    %56 = arith.mulf %47, %28 : vector<4x64xf32>
    %57 = arith.mulf %41, %55 : vector<4x64xf32>
    %58 = arith.addf %56, %57 : vector<4x64xf32>
    %59 = math.tanh %58 : vector<4x64xf32>
    %60 = arith.mulf %53, %59 : vector<4x64xf32>
    %c0_i32_22 = arith.constant 0 : i32
    %61 = vector.broadcast %c0_i32_22 : i32 to vector<4x1xi32>
    %62 = arith.cmpi eq, %23, %61 : vector<4x1xi32>
    %63 = arith.extui %62 : vector<4x1xi1> to vector<4x1xi32>
    %64 = arith.sitofp %63 : vector<4x1xi32> to vector<4x1xf32>
    %c0_i32_23 = arith.constant 0 : i32
    %65 = vector.broadcast %c0_i32_23 : i32 to vector<4x1xi32>
    %66 = arith.cmpi eq, %26, %65 : vector<4x1xi32>
    %67 = arith.extui %66 : vector<4x1xi1> to vector<4x1xi32>
    %68 = arith.sitofp %67 : vector<4x1xi32> to vector<4x1xf32>
    %69 = vector.shape_cast %64 : vector<4x1xf32> to vector<4x1xf32>
    %70 = vector.broadcast %69 : vector<4x1xf32> to vector<4x64xf32>
    %71 = vector.shape_cast %68 : vector<4x1xf32> to vector<4x1xf32>
    %72 = vector.broadcast %71 : vector<4x1xf32> to vector<4x64xf32>
    %73 = arith.select %20, %70, %72 : vector<4x64xi1>, vector<4x64xf32>
    %74 = arith.mulf %73, %60 : vector<4x64xf32>
    %75 = arith.addf %29, %74 : vector<4x64xf32>
    %c0_24 = arith.constant 0 : index
    %c0_25 = arith.constant 0 : index
    %76 = vector.load %arg5[%c0_24, %c0_25] : memref<64x256xf32, #tpu.memory_space<vmem>>, vector<64x256xf32>
    %cst_26 = arith.constant dense<0.000000e+00> : vector<4x256xf32>
    %77 = tpu.matmul %60, %76, %cst_26 {dimension_numbers = #tpu.dot_dimension_numbers<[1], [0], [0], [1], [0, 0, 1, 1], [], []>, precision = #tpu.contract_precision<fp32>} : vector<4x64xf32>, vector<64x256xf32>, vector<4x256xf32> -> vector<4x256xf32>
    %78 = vector.extract_strided_slice %12 {offsets = [4, 0], sizes = [4, 256], strides = [1, 1]} : vector<32x256xf32> to vector<4x256xf32>
    %79 = vector.extract_strided_slice %12 {offsets = [24, 0], sizes = [4, 256], strides = [1, 1]} : vector<32x256xf32> to vector<4x256xf32>
    %80 = arith.select %17, %78, %79 : vector<4x256xi1>, vector<4x256xf32>
    %81 = arith.addf %77, %80 : vector<4x256xf32>
    %82 = vector.extract_strided_slice %81 {offsets = [0, 0], sizes = [4, 64], strides = [1, 1]} : vector<4x256xf32> to vector<4x64xf32>
    %83 = arith.negf %82 : vector<4x64xf32>
    %84 = math.exp %83 : vector<4x64xf32>
    %cst_27 = arith.constant 1.000000e+00 : f32
    %85 = vector.broadcast %cst_27 : f32 to vector<4x64xf32>
    %86 = arith.addf %85, %84 : vector<4x64xf32>
    %87 = arith.divf %85, %86 : vector<4x64xf32>
    %88 = vector.extract_strided_slice %81 {offsets = [0, 64], sizes = [4, 64], strides = [1, 1]} : vector<4x256xf32> to vector<4x64xf32>
    %89 = arith.negf %88 : vector<4x64xf32>
    %90 = math.exp %89 : vector<4x64xf32>
    %cst_28 = arith.constant 1.000000e+00 : f32
    %91 = vector.broadcast %cst_28 : f32 to vector<4x64xf32>
    %92 = arith.addf %91, %90 : vector<4x64xf32>
    %93 = arith.divf %91, %92 : vector<4x64xf32>
    %94 = vector.extract_strided_slice %81 {offsets = [0, 128], sizes = [4, 64], strides = [1, 1]} : vector<4x256xf32> to vector<4x64xf32>
    %95 = arith.negf %94 : vector<4x64xf32>
    %96 = math.exp %95 : vector<4x64xf32>
    %cst_29 = arith.constant 1.000000e+00 : f32
    %97 = vector.broadcast %cst_29 : f32 to vector<4x64xf32>
    %98 = arith.addf %97, %96 : vector<4x64xf32>
    %99 = arith.divf %97, %98 : vector<4x64xf32>
    %100 = vector.extract_strided_slice %81 {offsets = [0, 192], sizes = [4, 64], strides = [1, 1]} : vector<4x256xf32> to vector<4x64xf32>
    %101 = math.tanh %100 : vector<4x64xf32>
    %102 = arith.mulf %93, %58 : vector<4x64xf32>
    %103 = arith.mulf %87, %101 : vector<4x64xf32>
    %104 = arith.addf %102, %103 : vector<4x64xf32>
    %105 = math.tanh %104 : vector<4x64xf32>
    %106 = arith.mulf %99, %105 : vector<4x64xf32>
    %c1_i32_30 = arith.constant 1 : i32
    %107 = vector.broadcast %c1_i32_30 : i32 to vector<4x1xi32>
    %108 = arith.cmpi eq, %23, %107 : vector<4x1xi32>
    %109 = arith.extui %108 : vector<4x1xi1> to vector<4x1xi32>
    %110 = arith.sitofp %109 : vector<4x1xi32> to vector<4x1xf32>
    %c1_i32_31 = arith.constant 1 : i32
    %111 = vector.broadcast %c1_i32_31 : i32 to vector<4x1xi32>
    %112 = arith.cmpi eq, %26, %111 : vector<4x1xi32>
    %113 = arith.extui %112 : vector<4x1xi1> to vector<4x1xi32>
    %114 = arith.sitofp %113 : vector<4x1xi32> to vector<4x1xf32>
    %115 = vector.shape_cast %110 : vector<4x1xf32> to vector<4x1xf32>
    %116 = vector.broadcast %115 : vector<4x1xf32> to vector<4x64xf32>
    %117 = vector.shape_cast %114 : vector<4x1xf32> to vector<4x1xf32>
    %118 = vector.broadcast %117 : vector<4x1xf32> to vector<4x64xf32>
    %119 = arith.select %20, %116, %118 : vector<4x64xi1>, vector<4x64xf32>
    %120 = arith.mulf %119, %106 : vector<4x64xf32>
    %121 = arith.addf %75, %120 : vector<4x64xf32>
    %c0_32 = arith.constant 0 : index
    %c0_33 = arith.constant 0 : index
    %122 = vector.load %arg5[%c0_32, %c0_33] : memref<64x256xf32, #tpu.memory_space<vmem>>, vector<64x256xf32>
    %cst_34 = arith.constant dense<0.000000e+00> : vector<4x256xf32>
    %123 = tpu.matmul %106, %122, %cst_34 {dimension_numbers = #tpu.dot_dimension_numbers<[1], [0], [0], [1], [0, 0, 1, 1], [], []>, precision = #tpu.contract_precision<fp32>} : vector<4x64xf32>, vector<64x256xf32>, vector<4x256xf32> -> vector<4x256xf32>
    %124 = vector.extract_strided_slice %12 {offsets = [8, 0], sizes = [4, 256], strides = [1, 1]} : vector<32x256xf32> to vector<4x256xf32>
    %125 = vector.extract_strided_slice %12 {offsets = [20, 0], sizes = [4, 256], strides = [1, 1]} : vector<32x256xf32> to vector<4x256xf32>
    %126 = arith.select %17, %124, %125 : vector<4x256xi1>, vector<4x256xf32>
    %127 = arith.addf %123, %126 : vector<4x256xf32>
    %128 = vector.extract_strided_slice %127 {offsets = [0, 0], sizes = [4, 64], strides = [1, 1]} : vector<4x256xf32> to vector<4x64xf32>
    %129 = arith.negf %128 : vector<4x64xf32>
    %130 = math.exp %129 : vector<4x64xf32>
    %cst_35 = arith.constant 1.000000e+00 : f32
    %131 = vector.broadcast %cst_35 : f32 to vector<4x64xf32>
    %132 = arith.addf %131, %130 : vector<4x64xf32>
    %133 = arith.divf %131, %132 : vector<4x64xf32>
    %134 = vector.extract_strided_slice %127 {offsets = [0, 64], sizes = [4, 64], strides = [1, 1]} : vector<4x256xf32> to vector<4x64xf32>
    %135 = arith.negf %134 : vector<4x64xf32>
    %136 = math.exp %135 : vector<4x64xf32>
    %cst_36 = arith.constant 1.000000e+00 : f32
    %137 = vector.broadcast %cst_36 : f32 to vector<4x64xf32>
    %138 = arith.addf %137, %136 : vector<4x64xf32>
    %139 = arith.divf %137, %138 : vector<4x64xf32>
    %140 = vector.extract_strided_slice %127 {offsets = [0, 128], sizes = [4, 64], strides = [1, 1]} : vector<4x256xf32> to vector<4x64xf32>
    %141 = arith.negf %140 : vector<4x64xf32>
    %142 = math.exp %141 : vector<4x64xf32>
    %cst_37 = arith.constant 1.000000e+00 : f32
    %143 = vector.broadcast %cst_37 : f32 to vector<4x64xf32>
    %144 = arith.addf %143, %142 : vector<4x64xf32>
    %145 = arith.divf %143, %144 : vector<4x64xf32>
    %146 = vector.extract_strided_slice %127 {offsets = [0, 192], sizes = [4, 64], strides = [1, 1]} : vector<4x256xf32> to vector<4x64xf32>
    %147 = math.tanh %146 : vector<4x64xf32>
    %148 = arith.mulf %139, %104 : vector<4x64xf32>
    %149 = arith.mulf %133, %147 : vector<4x64xf32>
    %150 = arith.addf %148, %149 : vector<4x64xf32>
    %151 = math.tanh %150 : vector<4x64xf32>
    %152 = arith.mulf %145, %151 : vector<4x64xf32>
    %c2_i32 = arith.constant 2 : i32
    %153 = vector.broadcast %c2_i32 : i32 to vector<4x1xi32>
    %154 = arith.cmpi eq, %23, %153 : vector<4x1xi32>
    %155 = arith.extui %154 : vector<4x1xi1> to vector<4x1xi32>
    %156 = arith.sitofp %155 : vector<4x1xi32> to vector<4x1xf32>
    %c2_i32_38 = arith.constant 2 : i32
    %157 = vector.broadcast %c2_i32_38 : i32 to vector<4x1xi32>
    %158 = arith.cmpi eq, %26, %157 : vector<4x1xi32>
    %159 = arith.extui %158 : vector<4x1xi1> to vector<4x1xi32>
    %160 = arith.sitofp %159 : vector<4x1xi32> to vector<4x1xf32>
    %161 = vector.shape_cast %156 : vector<4x1xf32> to vector<4x1xf32>
    %162 = vector.broadcast %161 : vector<4x1xf32> to vector<4x64xf32>
    %163 = vector.shape_cast %160 : vector<4x1xf32> to vector<4x1xf32>
    %164 = vector.broadcast %163 : vector<4x1xf32> to vector<4x64xf32>
    %165 = arith.select %20, %162, %164 : vector<4x64xi1>, vector<4x64xf32>
    %166 = arith.mulf %165, %152 : vector<4x64xf32>
    %167 = arith.addf %121, %166 : vector<4x64xf32>
    %c0_39 = arith.constant 0 : index
    %c0_40 = arith.constant 0 : index
    %168 = vector.load %arg5[%c0_39, %c0_40] : memref<64x256xf32, #tpu.memory_space<vmem>>, vector<64x256xf32>
    %cst_41 = arith.constant dense<0.000000e+00> : vector<4x256xf32>
    %169 = tpu.matmul %152, %168, %cst_41 {dimension_numbers = #tpu.dot_dimension_numbers<[1], [0], [0], [1], [0, 0, 1, 1], [], []>, precision = #tpu.contract_precision<fp32>} : vector<4x64xf32>, vector<64x256xf32>, vector<4x256xf32> -> vector<4x256xf32>
    %170 = vector.extract_strided_slice %12 {offsets = [12, 0], sizes = [4, 256], strides = [1, 1]} : vector<32x256xf32> to vector<4x256xf32>
    %171 = vector.extract_strided_slice %12 {offsets = [16, 0], sizes = [4, 256], strides = [1, 1]} : vector<32x256xf32> to vector<4x256xf32>
    %172 = arith.select %17, %170, %171 : vector<4x256xi1>, vector<4x256xf32>
    %173 = arith.addf %169, %172 : vector<4x256xf32>
    %174 = vector.extract_strided_slice %173 {offsets = [0, 0], sizes = [4, 64], strides = [1, 1]} : vector<4x256xf32> to vector<4x64xf32>
    %175 = arith.negf %174 : vector<4x64xf32>
    %176 = math.exp %175 : vector<4x64xf32>
    %cst_42 = arith.constant 1.000000e+00 : f32
    %177 = vector.broadcast %cst_42 : f32 to vector<4x64xf32>
    %178 = arith.addf %177, %176 : vector<4x64xf32>
    %179 = arith.divf %177, %178 : vector<4x64xf32>
    %180 = vector.extract_strided_slice %173 {offsets = [0, 64], sizes = [4, 64], strides = [1, 1]} : vector<4x256xf32> to vector<4x64xf32>
    %181 = arith.negf %180 : vector<4x64xf32>
    %182 = math.exp %181 : vector<4x64xf32>
    %cst_43 = arith.constant 1.000000e+00 : f32
    %183 = vector.broadcast %cst_43 : f32 to vector<4x64xf32>
    %184 = arith.addf %183, %182 : vector<4x64xf32>
    %185 = arith.divf %183, %184 : vector<4x64xf32>
    %186 = vector.extract_strided_slice %173 {offsets = [0, 128], sizes = [4, 64], strides = [1, 1]} : vector<4x256xf32> to vector<4x64xf32>
    %187 = arith.negf %186 : vector<4x64xf32>
    %188 = math.exp %187 : vector<4x64xf32>
    %cst_44 = arith.constant 1.000000e+00 : f32
    %189 = vector.broadcast %cst_44 : f32 to vector<4x64xf32>
    %190 = arith.addf %189, %188 : vector<4x64xf32>
    %191 = arith.divf %189, %190 : vector<4x64xf32>
    %192 = vector.extract_strided_slice %173 {offsets = [0, 192], sizes = [4, 64], strides = [1, 1]} : vector<4x256xf32> to vector<4x64xf32>
    %193 = math.tanh %192 : vector<4x64xf32>
    %194 = arith.mulf %185, %150 : vector<4x64xf32>
    %195 = arith.mulf %179, %193 : vector<4x64xf32>
    %196 = arith.addf %194, %195 : vector<4x64xf32>
    %197 = math.tanh %196 : vector<4x64xf32>
    %198 = arith.mulf %191, %197 : vector<4x64xf32>
    %c3_i32 = arith.constant 3 : i32
    %199 = vector.broadcast %c3_i32 : i32 to vector<4x1xi32>
    %200 = arith.cmpi eq, %23, %199 : vector<4x1xi32>
    %201 = arith.extui %200 : vector<4x1xi1> to vector<4x1xi32>
    %202 = arith.sitofp %201 : vector<4x1xi32> to vector<4x1xf32>
    %c3_i32_45 = arith.constant 3 : i32
    %203 = vector.broadcast %c3_i32_45 : i32 to vector<4x1xi32>
    %204 = arith.cmpi eq, %26, %203 : vector<4x1xi32>
    %205 = arith.extui %204 : vector<4x1xi1> to vector<4x1xi32>
    %206 = arith.sitofp %205 : vector<4x1xi32> to vector<4x1xf32>
    %207 = vector.shape_cast %202 : vector<4x1xf32> to vector<4x1xf32>
    %208 = vector.broadcast %207 : vector<4x1xf32> to vector<4x64xf32>
    %209 = vector.shape_cast %206 : vector<4x1xf32> to vector<4x1xf32>
    %210 = vector.broadcast %209 : vector<4x1xf32> to vector<4x64xf32>
    %211 = arith.select %20, %208, %210 : vector<4x64xi1>, vector<4x64xf32>
    %212 = arith.mulf %211, %198 : vector<4x64xf32>
    %213 = arith.addf %167, %212 : vector<4x64xf32>
    %c0_46 = arith.constant 0 : index
    %c0_47 = arith.constant 0 : index
    %214 = vector.load %arg5[%c0_46, %c0_47] : memref<64x256xf32, #tpu.memory_space<vmem>>, vector<64x256xf32>
    %cst_48 = arith.constant dense<0.000000e+00> : vector<4x256xf32>
    %215 = tpu.matmul %198, %214, %cst_48 {dimension_numbers = #tpu.dot_dimension_numbers<[1], [0], [0], [1], [0, 0, 1, 1], [], []>, precision = #tpu.contract_precision<fp32>} : vector<4x64xf32>, vector<64x256xf32>, vector<4x256xf32> -> vector<4x256xf32>
    %216 = vector.extract_strided_slice %12 {offsets = [16, 0], sizes = [4, 256], strides = [1, 1]} : vector<32x256xf32> to vector<4x256xf32>
    %217 = vector.extract_strided_slice %12 {offsets = [12, 0], sizes = [4, 256], strides = [1, 1]} : vector<32x256xf32> to vector<4x256xf32>
    %218 = arith.select %17, %216, %217 : vector<4x256xi1>, vector<4x256xf32>
    %219 = arith.addf %215, %218 : vector<4x256xf32>
    %220 = vector.extract_strided_slice %219 {offsets = [0, 0], sizes = [4, 64], strides = [1, 1]} : vector<4x256xf32> to vector<4x64xf32>
    %221 = arith.negf %220 : vector<4x64xf32>
    %222 = math.exp %221 : vector<4x64xf32>
    %cst_49 = arith.constant 1.000000e+00 : f32
    %223 = vector.broadcast %cst_49 : f32 to vector<4x64xf32>
    %224 = arith.addf %223, %222 : vector<4x64xf32>
    %225 = arith.divf %223, %224 : vector<4x64xf32>
    %226 = vector.extract_strided_slice %219 {offsets = [0, 64], sizes = [4, 64], strides = [1, 1]} : vector<4x256xf32> to vector<4x64xf32>
    %227 = arith.negf %226 : vector<4x64xf32>
    %228 = math.exp %227 : vector<4x64xf32>
    %cst_50 = arith.constant 1.000000e+00 : f32
    %229 = vector.broadcast %cst_50 : f32 to vector<4x64xf32>
    %230 = arith.addf %229, %228 : vector<4x64xf32>
    %231 = arith.divf %229, %230 : vector<4x64xf32>
    %232 = vector.extract_strided_slice %219 {offsets = [0, 128], sizes = [4, 64], strides = [1, 1]} : vector<4x256xf32> to vector<4x64xf32>
    %233 = arith.negf %232 : vector<4x64xf32>
    %234 = math.exp %233 : vector<4x64xf32>
    %cst_51 = arith.constant 1.000000e+00 : f32
    %235 = vector.broadcast %cst_51 : f32 to vector<4x64xf32>
    %236 = arith.addf %235, %234 : vector<4x64xf32>
    %237 = arith.divf %235, %236 : vector<4x64xf32>
    %238 = vector.extract_strided_slice %219 {offsets = [0, 192], sizes = [4, 64], strides = [1, 1]} : vector<4x256xf32> to vector<4x64xf32>
    %239 = math.tanh %238 : vector<4x64xf32>
    %240 = arith.mulf %231, %196 : vector<4x64xf32>
    %241 = arith.mulf %225, %239 : vector<4x64xf32>
    %242 = arith.addf %240, %241 : vector<4x64xf32>
    %243 = math.tanh %242 : vector<4x64xf32>
    %244 = arith.mulf %237, %243 : vector<4x64xf32>
    %c4_i32 = arith.constant 4 : i32
    %245 = vector.broadcast %c4_i32 : i32 to vector<4x1xi32>
    %246 = arith.cmpi eq, %23, %245 : vector<4x1xi32>
    %247 = arith.extui %246 : vector<4x1xi1> to vector<4x1xi32>
    %248 = arith.sitofp %247 : vector<4x1xi32> to vector<4x1xf32>
    %c4_i32_52 = arith.constant 4 : i32
    %249 = vector.broadcast %c4_i32_52 : i32 to vector<4x1xi32>
    %250 = arith.cmpi eq, %26, %249 : vector<4x1xi32>
    %251 = arith.extui %250 : vector<4x1xi1> to vector<4x1xi32>
    %252 = arith.sitofp %251 : vector<4x1xi32> to vector<4x1xf32>
    %253 = vector.shape_cast %248 : vector<4x1xf32> to vector<4x1xf32>
    %254 = vector.broadcast %253 : vector<4x1xf32> to vector<4x64xf32>
    %255 = vector.shape_cast %252 : vector<4x1xf32> to vector<4x1xf32>
    %256 = vector.broadcast %255 : vector<4x1xf32> to vector<4x64xf32>
    %257 = arith.select %20, %254, %256 : vector<4x64xi1>, vector<4x64xf32>
    %258 = arith.mulf %257, %244 : vector<4x64xf32>
    %259 = arith.addf %213, %258 : vector<4x64xf32>
    %c0_53 = arith.constant 0 : index
    %c0_54 = arith.constant 0 : index
    %260 = vector.load %arg5[%c0_53, %c0_54] : memref<64x256xf32, #tpu.memory_space<vmem>>, vector<64x256xf32>
    %cst_55 = arith.constant dense<0.000000e+00> : vector<4x256xf32>
    %261 = tpu.matmul %244, %260, %cst_55 {dimension_numbers = #tpu.dot_dimension_numbers<[1], [0], [0], [1], [0, 0, 1, 1], [], []>, precision = #tpu.contract_precision<fp32>} : vector<4x64xf32>, vector<64x256xf32>, vector<4x256xf32> -> vector<4x256xf32>
    %262 = vector.extract_strided_slice %12 {offsets = [20, 0], sizes = [4, 256], strides = [1, 1]} : vector<32x256xf32> to vector<4x256xf32>
    %263 = vector.extract_strided_slice %12 {offsets = [8, 0], sizes = [4, 256], strides = [1, 1]} : vector<32x256xf32> to vector<4x256xf32>
    %264 = arith.select %17, %262, %263 : vector<4x256xi1>, vector<4x256xf32>
    %265 = arith.addf %261, %264 : vector<4x256xf32>
    %266 = vector.extract_strided_slice %265 {offsets = [0, 0], sizes = [4, 64], strides = [1, 1]} : vector<4x256xf32> to vector<4x64xf32>
    %267 = arith.negf %266 : vector<4x64xf32>
    %268 = math.exp %267 : vector<4x64xf32>
    %cst_56 = arith.constant 1.000000e+00 : f32
    %269 = vector.broadcast %cst_56 : f32 to vector<4x64xf32>
    %270 = arith.addf %269, %268 : vector<4x64xf32>
    %271 = arith.divf %269, %270 : vector<4x64xf32>
    %272 = vector.extract_strided_slice %265 {offsets = [0, 64], sizes = [4, 64], strides = [1, 1]} : vector<4x256xf32> to vector<4x64xf32>
    %273 = arith.negf %272 : vector<4x64xf32>
    %274 = math.exp %273 : vector<4x64xf32>
    %cst_57 = arith.constant 1.000000e+00 : f32
    %275 = vector.broadcast %cst_57 : f32 to vector<4x64xf32>
    %276 = arith.addf %275, %274 : vector<4x64xf32>
    %277 = arith.divf %275, %276 : vector<4x64xf32>
    %278 = vector.extract_strided_slice %265 {offsets = [0, 128], sizes = [4, 64], strides = [1, 1]} : vector<4x256xf32> to vector<4x64xf32>
    %279 = arith.negf %278 : vector<4x64xf32>
    %280 = math.exp %279 : vector<4x64xf32>
    %cst_58 = arith.constant 1.000000e+00 : f32
    %281 = vector.broadcast %cst_58 : f32 to vector<4x64xf32>
    %282 = arith.addf %281, %280 : vector<4x64xf32>
    %283 = arith.divf %281, %282 : vector<4x64xf32>
    %284 = vector.extract_strided_slice %265 {offsets = [0, 192], sizes = [4, 64], strides = [1, 1]} : vector<4x256xf32> to vector<4x64xf32>
    %285 = math.tanh %284 : vector<4x64xf32>
    %286 = arith.mulf %277, %242 : vector<4x64xf32>
    %287 = arith.mulf %271, %285 : vector<4x64xf32>
    %288 = arith.addf %286, %287 : vector<4x64xf32>
    %289 = math.tanh %288 : vector<4x64xf32>
    %290 = arith.mulf %283, %289 : vector<4x64xf32>
    %c5_i32 = arith.constant 5 : i32
    %291 = vector.broadcast %c5_i32 : i32 to vector<4x1xi32>
    %292 = arith.cmpi eq, %23, %291 : vector<4x1xi32>
    %293 = arith.extui %292 : vector<4x1xi1> to vector<4x1xi32>
    %294 = arith.sitofp %293 : vector<4x1xi32> to vector<4x1xf32>
    %c5_i32_59 = arith.constant 5 : i32
    %295 = vector.broadcast %c5_i32_59 : i32 to vector<4x1xi32>
    %296 = arith.cmpi eq, %26, %295 : vector<4x1xi32>
    %297 = arith.extui %296 : vector<4x1xi1> to vector<4x1xi32>
    %298 = arith.sitofp %297 : vector<4x1xi32> to vector<4x1xf32>
    %299 = vector.shape_cast %294 : vector<4x1xf32> to vector<4x1xf32>
    %300 = vector.broadcast %299 : vector<4x1xf32> to vector<4x64xf32>
    %301 = vector.shape_cast %298 : vector<4x1xf32> to vector<4x1xf32>
    %302 = vector.broadcast %301 : vector<4x1xf32> to vector<4x64xf32>
    %303 = arith.select %20, %300, %302 : vector<4x64xi1>, vector<4x64xf32>
    %304 = arith.mulf %303, %290 : vector<4x64xf32>
    %305 = arith.addf %259, %304 : vector<4x64xf32>
    %c0_60 = arith.constant 0 : index
    %c0_61 = arith.constant 0 : index
    %306 = vector.load %arg5[%c0_60, %c0_61] : memref<64x256xf32, #tpu.memory_space<vmem>>, vector<64x256xf32>
    %cst_62 = arith.constant dense<0.000000e+00> : vector<4x256xf32>
    %307 = tpu.matmul %290, %306, %cst_62 {dimension_numbers = #tpu.dot_dimension_numbers<[1], [0], [0], [1], [0, 0, 1, 1], [], []>, precision = #tpu.contract_precision<fp32>} : vector<4x64xf32>, vector<64x256xf32>, vector<4x256xf32> -> vector<4x256xf32>
    %308 = vector.extract_strided_slice %12 {offsets = [24, 0], sizes = [4, 256], strides = [1, 1]} : vector<32x256xf32> to vector<4x256xf32>
    %309 = vector.extract_strided_slice %12 {offsets = [4, 0], sizes = [4, 256], strides = [1, 1]} : vector<32x256xf32> to vector<4x256xf32>
    %310 = arith.select %17, %308, %309 : vector<4x256xi1>, vector<4x256xf32>
    %311 = arith.addf %307, %310 : vector<4x256xf32>
    %312 = vector.extract_strided_slice %311 {offsets = [0, 0], sizes = [4, 64], strides = [1, 1]} : vector<4x256xf32> to vector<4x64xf32>
    %313 = arith.negf %312 : vector<4x64xf32>
    %314 = math.exp %313 : vector<4x64xf32>
    %cst_63 = arith.constant 1.000000e+00 : f32
    %315 = vector.broadcast %cst_63 : f32 to vector<4x64xf32>
    %316 = arith.addf %315, %314 : vector<4x64xf32>
    %317 = arith.divf %315, %316 : vector<4x64xf32>
    %318 = vector.extract_strided_slice %311 {offsets = [0, 64], sizes = [4, 64], strides = [1, 1]} : vector<4x256xf32> to vector<4x64xf32>
    %319 = arith.negf %318 : vector<4x64xf32>
    %320 = math.exp %319 : vector<4x64xf32>
    %cst_64 = arith.constant 1.000000e+00 : f32
    %321 = vector.broadcast %cst_64 : f32 to vector<4x64xf32>
    %322 = arith.addf %321, %320 : vector<4x64xf32>
    %323 = arith.divf %321, %322 : vector<4x64xf32>
    %324 = vector.extract_strided_slice %311 {offsets = [0, 128], sizes = [4, 64], strides = [1, 1]} : vector<4x256xf32> to vector<4x64xf32>
    %325 = arith.negf %324 : vector<4x64xf32>
    %326 = math.exp %325 : vector<4x64xf32>
    %cst_65 = arith.constant 1.000000e+00 : f32
    %327 = vector.broadcast %cst_65 : f32 to vector<4x64xf32>
    %328 = arith.addf %327, %326 : vector<4x64xf32>
    %329 = arith.divf %327, %328 : vector<4x64xf32>
    %330 = vector.extract_strided_slice %311 {offsets = [0, 192], sizes = [4, 64], strides = [1, 1]} : vector<4x256xf32> to vector<4x64xf32>
    %331 = math.tanh %330 : vector<4x64xf32>
    %332 = arith.mulf %323, %288 : vector<4x64xf32>
    %333 = arith.mulf %317, %331 : vector<4x64xf32>
    %334 = arith.addf %332, %333 : vector<4x64xf32>
    %335 = math.tanh %334 : vector<4x64xf32>
    %336 = arith.mulf %329, %335 : vector<4x64xf32>
    %c6_i32 = arith.constant 6 : i32
    %337 = vector.broadcast %c6_i32 : i32 to vector<4x1xi32>
    %338 = arith.cmpi eq, %23, %337 : vector<4x1xi32>
    %339 = arith.extui %338 : vector<4x1xi1> to vector<4x1xi32>
    %340 = arith.sitofp %339 : vector<4x1xi32> to vector<4x1xf32>
    %c6_i32_66 = arith.constant 6 : i32
    %341 = vector.broadcast %c6_i32_66 : i32 to vector<4x1xi32>
    %342 = arith.cmpi eq, %26, %341 : vector<4x1xi32>
    %343 = arith.extui %342 : vector<4x1xi1> to vector<4x1xi32>
    %344 = arith.sitofp %343 : vector<4x1xi32> to vector<4x1xf32>
    %345 = vector.shape_cast %340 : vector<4x1xf32> to vector<4x1xf32>
    %346 = vector.broadcast %345 : vector<4x1xf32> to vector<4x64xf32>
    %347 = vector.shape_cast %344 : vector<4x1xf32> to vector<4x1xf32>
    %348 = vector.broadcast %347 : vector<4x1xf32> to vector<4x64xf32>
    %349 = arith.select %20, %346, %348 : vector<4x64xi1>, vector<4x64xf32>
    %350 = arith.mulf %349, %336 : vector<4x64xf32>
    %351 = arith.addf %305, %350 : vector<4x64xf32>
    %c0_67 = arith.constant 0 : index
    %c0_68 = arith.constant 0 : index
    %352 = vector.load %arg5[%c0_67, %c0_68] : memref<64x256xf32, #tpu.memory_space<vmem>>, vector<64x256xf32>
    %cst_69 = arith.constant dense<0.000000e+00> : vector<4x256xf32>
    %353 = tpu.matmul %336, %352, %cst_69 {dimension_numbers = #tpu.dot_dimension_numbers<[1], [0], [0], [1], [0, 0, 1, 1], [], []>, precision = #tpu.contract_precision<fp32>} : vector<4x64xf32>, vector<64x256xf32>, vector<4x256xf32> -> vector<4x256xf32>
    %354 = vector.extract_strided_slice %12 {offsets = [28, 0], sizes = [4, 256], strides = [1, 1]} : vector<32x256xf32> to vector<4x256xf32>
    %355 = vector.extract_strided_slice %12 {offsets = [0, 0], sizes = [4, 256], strides = [1, 1]} : vector<32x256xf32> to vector<4x256xf32>
    %356 = arith.select %17, %354, %355 : vector<4x256xi1>, vector<4x256xf32>
    %357 = arith.addf %353, %356 : vector<4x256xf32>
    %358 = vector.extract_strided_slice %357 {offsets = [0, 0], sizes = [4, 64], strides = [1, 1]} : vector<4x256xf32> to vector<4x64xf32>
    %359 = arith.negf %358 : vector<4x64xf32>
    %360 = math.exp %359 : vector<4x64xf32>
    %cst_70 = arith.constant 1.000000e+00 : f32
    %361 = vector.broadcast %cst_70 : f32 to vector<4x64xf32>
    %362 = arith.addf %361, %360 : vector<4x64xf32>
    %363 = arith.divf %361, %362 : vector<4x64xf32>
    %364 = vector.extract_strided_slice %357 {offsets = [0, 64], sizes = [4, 64], strides = [1, 1]} : vector<4x256xf32> to vector<4x64xf32>
    %365 = arith.negf %364 : vector<4x64xf32>
    %366 = math.exp %365 : vector<4x64xf32>
    %cst_71 = arith.constant 1.000000e+00 : f32
    %367 = vector.broadcast %cst_71 : f32 to vector<4x64xf32>
    %368 = arith.addf %367, %366 : vector<4x64xf32>
    %369 = arith.divf %367, %368 : vector<4x64xf32>
    %370 = vector.extract_strided_slice %357 {offsets = [0, 128], sizes = [4, 64], strides = [1, 1]} : vector<4x256xf32> to vector<4x64xf32>
    %371 = arith.negf %370 : vector<4x64xf32>
    %372 = math.exp %371 : vector<4x64xf32>
    %cst_72 = arith.constant 1.000000e+00 : f32
    %373 = vector.broadcast %cst_72 : f32 to vector<4x64xf32>
    %374 = arith.addf %373, %372 : vector<4x64xf32>
    %375 = arith.divf %373, %374 : vector<4x64xf32>
    %376 = vector.extract_strided_slice %357 {offsets = [0, 192], sizes = [4, 64], strides = [1, 1]} : vector<4x256xf32> to vector<4x64xf32>
    %377 = math.tanh %376 : vector<4x64xf32>
    %378 = arith.mulf %369, %334 : vector<4x64xf32>
    %379 = arith.mulf %363, %377 : vector<4x64xf32>
    %380 = arith.addf %378, %379 : vector<4x64xf32>
    %381 = math.tanh %380 : vector<4x64xf32>
    %382 = arith.mulf %375, %381 : vector<4x64xf32>
    %c7_i32 = arith.constant 7 : i32
    %383 = vector.broadcast %c7_i32 : i32 to vector<4x1xi32>
    %384 = arith.cmpi eq, %23, %383 : vector<4x1xi32>
    %385 = arith.extui %384 : vector<4x1xi1> to vector<4x1xi32>
    %386 = arith.sitofp %385 : vector<4x1xi32> to vector<4x1xf32>
    %c7_i32_73 = arith.constant 7 : i32
    %387 = vector.broadcast %c7_i32_73 : i32 to vector<4x1xi32>
    %388 = arith.cmpi eq, %26, %387 : vector<4x1xi32>
    %389 = arith.extui %388 : vector<4x1xi1> to vector<4x1xi32>
    %390 = arith.sitofp %389 : vector<4x1xi32> to vector<4x1xf32>
    %391 = vector.shape_cast %386 : vector<4x1xf32> to vector<4x1xf32>
    %392 = vector.broadcast %391 : vector<4x1xf32> to vector<4x64xf32>
    %393 = vector.shape_cast %390 : vector<4x1xf32> to vector<4x1xf32>
    %394 = vector.broadcast %393 : vector<4x1xf32> to vector<4x64xf32>
    %395 = arith.select %20, %392, %394 : vector<4x64xi1>, vector<4x64xf32>
    %396 = arith.mulf %395, %382 : vector<4x64xf32>
    %397 = arith.addf %351, %396 : vector<4x64xf32>
    %c0_74 = arith.constant 0 : index
    %c0_75 = arith.constant 0 : index
    %398 = vector.load %arg8[%c0_74, %c0_75] : memref<64x64xf32, #tpu.memory_space<vmem>>, vector<64x64xf32>
    %cst_76 = arith.constant dense<0.000000e+00> : vector<4x64xf32>
    %399 = tpu.matmul %397, %398, %cst_76 {dimension_numbers = #tpu.dot_dimension_numbers<[1], [0], [0], [1], [0, 0, 1, 1], [], []>, precision = #tpu.contract_precision<fp32>} : vector<4x64xf32>, vector<64x64xf32>, vector<4x64xf32> -> vector<4x64xf32>
    %c0_77 = arith.constant 0 : index
    %c0_78 = arith.constant 0 : index
    %400 = vector.load %arg9[%c0_77, %c0_78] : memref<1x64xf32, #tpu.memory_space<vmem>>, vector<1x64xf32>
    %401 = vector.broadcast %400 : vector<1x64xf32> to vector<4x64xf32>
    %402 = arith.addf %399, %401 : vector<4x64xf32>
    %cst_79 = arith.constant 0.000000e+00 : f32
    %403 = vector.broadcast %cst_79 : f32 to vector<4x64xf32>
    %404 = arith.maximumf %402, %403 : vector<4x64xf32>
    %c0_80 = arith.constant 0 : index
    %c0_81 = arith.constant 0 : index
    %405 = vector.load %arg7[%c0_80, %c0_81] : memref<4x102xf32, #tpu.memory_space<vmem>>, vector<4x102xf32>
    %c0_82 = arith.constant 0 : index
    %c0_83 = arith.constant 0 : index
    %406 = vector.load %arg10[%c0_82, %c0_83] : memref<102x64xf32, #tpu.memory_space<vmem>>, vector<102x64xf32>
    %cst_84 = arith.constant dense<0.000000e+00> : vector<4x64xf32>
    %407 = tpu.matmul %405, %406, %cst_84 {dimension_numbers = #tpu.dot_dimension_numbers<[1], [0], [0], [1], [0, 0, 1, 1], [], []>, precision = #tpu.contract_precision<fp32>} : vector<4x102xf32>, vector<102x64xf32>, vector<4x64xf32> -> vector<4x64xf32>
    %c0_85 = arith.constant 0 : index
    %c0_86 = arith.constant 0 : index
    %408 = vector.load %arg11[%c0_85, %c0_86] : memref<1x64xf32, #tpu.memory_space<vmem>>, vector<1x64xf32>
    %409 = vector.broadcast %408 : vector<1x64xf32> to vector<4x64xf32>
    %410 = arith.addf %407, %409 : vector<4x64xf32>
    %cst_87 = arith.constant 0.000000e+00 : f32
    %411 = vector.broadcast %cst_87 : f32 to vector<4x64xf32>
    %412 = arith.maximumf %410, %411 : vector<4x64xf32>
    %c0_88 = arith.constant 0 : index
    %c0_89 = arith.constant 0 : index
    %413 = vector.load %arg12[%c0_88, %c0_89] : memref<64x128xf32, #tpu.memory_space<vmem>>, vector<64x128xf32>
    %cst_90 = arith.constant dense<0.000000e+00> : vector<4x128xf32>
    %414 = tpu.matmul %404, %413, %cst_90 {dimension_numbers = #tpu.dot_dimension_numbers<[1], [0], [0], [1], [0, 0, 1, 1], [], []>, precision = #tpu.contract_precision<fp32>} : vector<4x64xf32>, vector<64x128xf32>, vector<4x128xf32> -> vector<4x128xf32>
    %c0_91 = arith.constant 0 : index
    %c0_92 = arith.constant 0 : index
    %415 = vector.load %arg13[%c0_91, %c0_92] : memref<64x128xf32, #tpu.memory_space<vmem>>, vector<64x128xf32>
    %cst_93 = arith.constant dense<0.000000e+00> : vector<4x128xf32>
    %416 = tpu.matmul %412, %415, %cst_93 {dimension_numbers = #tpu.dot_dimension_numbers<[1], [0], [0], [1], [0, 0, 1, 1], [], []>, precision = #tpu.contract_precision<fp32>} : vector<4x64xf32>, vector<64x128xf32>, vector<4x128xf32> -> vector<4x128xf32>
    %417 = arith.addf %414, %416 : vector<4x128xf32>
    %c0_94 = arith.constant 0 : index
    %c0_95 = arith.constant 0 : index
    %418 = vector.load %arg14[%c0_94, %c0_95] : memref<1x128xf32, #tpu.memory_space<vmem>>, vector<1x128xf32>
    %419 = vector.broadcast %418 : vector<1x128xf32> to vector<4x128xf32>
    %420 = arith.addf %417, %419 : vector<4x128xf32>
    %c0_96 = arith.constant 0 : index
    %c0_97 = arith.constant 0 : index
    %421 = vector.load %arg15[%c0_96, %c0_97] : memref<4x128xf32, #tpu.memory_space<vmem>>, vector<4x128xf32>
    tpu.vector_store %arg15[%c0_96, %c0_97], %420 {strides = array<i32>} : memref<4x128xf32, #tpu.memory_space<vmem>>, vector<4x128xf32>,
    return
  }
  func.func @transform_0(%arg0: i32) -> (i32, i32) {
    %c0_i32 = arith.constant 0 : i32
    %c0_i32_0 = arith.constant 0 : i32
    %c0_i32_1 = arith.constant 0 : i32
    return %c0_i32, %c0_i32_0 : i32, i32
  }
  func.func @transform_1(%arg0: i32) -> (i32, i32) {
    %c0_i32 = arith.constant 0 : i32
    %c0_i32_0 = arith.constant 0 : i32
    %c0_i32_1 = arith.constant 0 : i32
    return %c0_i32, %c0_i32_0 : i32, i32
  }
  func.func @transform_2(%arg0: i32) -> (i32, i32) {
    %c0_i32 = arith.constant 0 : i32
    %c0_i32_0 = arith.constant 0 : i32
    %c0_i32_1 = arith.constant 0 : i32
    return %c0_i32, %c0_i32_0 : i32, i32
  }
  func.func @transform_3(%arg0: i32) -> (i32, i32) {
    %c0_i32 = arith.constant 0 : i32
    %c0_i32_0 = arith.constant 0 : i32
    %c0_i32_1 = arith.constant 0 : i32
    return %c0_i32, %c0_i32_0 : i32, i32
  }
  func.func @transform_4(%arg0: i32) -> (i32, i32) {
    %c0_i32 = arith.constant 0 : i32
    %c0_i32_0 = arith.constant 0 : i32
    %c0_i32_1 = arith.constant 0 : i32
    return %c0_i32, %c0_i32_0 : i32, i32
  }
  func.func @transform_5(%arg0: i32) -> (i32, i32) {
    %c0_i32 = arith.constant 0 : i32
    %c0_i32_0 = arith.constant 0 : i32
    %c0_i32_1 = arith.constant 0 : i32
    return %c0_i32, %c0_i32_0 : i32, i32
  }
  func.func @transform_6(%arg0: i32) -> (i32, i32) {
    %c0_i32 = arith.constant 0 : i32
    %c0_i32_0 = arith.constant 0 : i32
    %c0_i32_1 = arith.constant 0 : i32
    return %c0_i32, %c0_i32_0 : i32, i32
  }
  func.func @transform_7(%arg0: i32) -> (i32, i32) {
    %c0_i32 = arith.constant 0 : i32
    %c0_i32_0 = arith.constant 0 : i32
    %c0_i32_1 = arith.constant 0 : i32
    return %c0_i32, %c0_i32_0 : i32, i32
  }
  func.func @transform_8(%arg0: i32) -> (i32, i32) {
    %c0_i32 = arith.constant 0 : i32
    %c0_i32_0 = arith.constant 0 : i32
    %c0_i32_1 = arith.constant 0 : i32
    return %c0_i32, %c0_i32_0 : i32, i32
  }
  func.func @transform_9(%arg0: i32) -> (i32, i32) {
    %c0_i32 = arith.constant 0 : i32
    %c0_i32_0 = arith.constant 0 : i32
    %c0_i32_1 = arith.constant 0 : i32
    return %c0_i32, %c0_i32_0 : i32, i32
  }
  func.func @transform_10(%arg0: i32) -> (i32, i32) {
    %c0_i32 = arith.constant 0 : i32
    %c0_i32_0 = arith.constant 0 : i32
    %c0_i32_1 = arith.constant 0 : i32
    return %c0_i32, %c0_i32_0 : i32, i32
  }
  func.func @transform_11(%arg0: i32) -> (i32, i32) {
    %c0_i32 = arith.constant 0 : i32
    %c0_i32_0 = arith.constant 0 : i32
    %c0_i32_1 = arith.constant 0 : i32
    return %c0_i32, %c0_i32_0 : i32, i32
  }
  func.func @transform_12(%arg0: i32) -> (i32, i32) {
    %c0_i32 = arith.constant 0 : i32
    %c0_i32_0 = arith.constant 0 : i32
    %c0_i32_1 = arith.constant 0 : i32
    return %c0_i32, %c0_i32_0 : i32, i32
  }
  func.func @transform_13(%arg0: i32) -> (i32, i32) {
    %c0_i32 = arith.constant 0 : i32
    %c0_i32_0 = arith.constant 0 : i32
    %c0_i32_1 = arith.constant 0 : i32
    return %c0_i32, %c0_i32_0 : i32, i32
  }
  func.func @transform_14(%arg0: i32) -> (i32, i32) {
    %c0_i32 = arith.constant 0 : i32
    %c0_i32_0 = arith.constant 0 : i32
    %c0_i32_1 = arith.constant 0 : i32
    return %c0_i32, %c0_i32_0 : i32, i32
  }
}

</mosaic_0001>

<bundles_post_ra>
// kernel: tpu_custom_call.1
= control target key start
LH: loop header
LB: loop body
LE: loop exit
PB: predicated region body
PF: predicated region fallthrough
CT: control target
= control target key end

     0   :  { %19 = vsyncpa [#allocation3], 0  ;;  %s13391_s0 = inlined_call_operand.vmem [shape: s32[32,1], index: 0, kind: input, shape index: {}]   ;;  %s13392_s1 = inlined_call_operand.vmem [shape: s32[4,1], index: 1, kind: input, shape index: {}]   ;;  %s13393_s2 = inlined_call_operand.vmem [shape: f32[50,16], index: 2, kind: input, shape index: {}]   ;;  %s13394_s3 = inlined_call_operand.hbm [shape: f32[16,256], index: 3, kind: input, shape index: {}]   ;;  %s13395_s4 = inlined_call_operand.vmem [shape: f32[64,256], index: 4, kind: input, shape index: {}]   ;;  %s13396_s5 = inlined_call_operand.vmem [shape: f32[1,256], index: 5, kind: input, shape index: {}]   ;;  %s13397_s6 = inlined_call_operand.vmem [shape: f32[4,102], index: 6, kind: input, shape index: {}]   ;;  %s13398_s7 = inlined_call_operand.vmem [shape: f32[64,64], index: 7, kind: input, shape index: {}]   ;;  %s13399_s8 = inlined_call_operand.vmem [shape: f32[1,64], index: 8, kind: input, shape index: {}]   ;;  %s13400_s9 = inlined_call_operand.vmem [shape: f32[102,64], index: 9, kind: input, shape index: {}]   ;;  %s13401_s10 = inlined_call_operand.vmem [shape: f32[1,64], index: 10, kind: input, shape index: {}]   ;;  %s13402_s11 = inlined_call_operand.vmem [shape: f32[64,128], index: 11, kind: input, shape index: {}]   ;;  %s13403_s12 = inlined_call_operand.hbm [shape: f32[64,128], index: 12, kind: input, shape index: {}]   ;;  %s13404_s13 = inlined_call_operand.vmem [shape: f32[1,128], index: 13, kind: input, shape index: {}]   ;;  %s13405_s14 = inlined_call_operand.hbm [shape: f32[4,128], index: 14, kind: output, shape index: {}]  }
   0x1   :  { %20 = vsyncpa [#allocation6], 0 }
   0x2   :  { %21 = vsyncpa [#allocation4], 0  ;;  %s10648_s29 = smov [#allocation2]  }
   0x3   :  { %s33_s30 = sshll.u32 %s10648_s29, 4  ;;  %s34_s30 = int_to_ptr.vmem [resolvable:$true] %s33_s30 }
   0x4   :  { %s10590_s15 = scalar_lea.vmem %s34_s30, 512  ;;  %p10595_p1 = scmp.lt.s32.totalorder %s34_s30, %s34_s30 }
   0x5   :  { %p10591_p0 = scmp.ne.s32.totalorder %s34_s30, %s10590_s15  ;;  %p10596_p2 = scmp.lt.s32.totalorder %s10590_s15, %s10590_s15 }
   0x7   :  { %p10597_p3 = por %p10596_p2, %p10595_p1 }
   0x9   :  { %p10598_p4 = pnand %p10597_p3, %p10591_p0 }
   0xb   :  { %10601 = shalt.err (!%p10598_p4)
}
   0xc   :  { %s10649_s16 = smov 256   ;;  %s10650_s17 = smov 16  }
   0xd   :  { %39 = dma.hbm_to_vmem [thread:$0]  %s13394_s3, 512, %s34_s30, [#allocation3], %s10649_s16, %s10649_s16, %s10650_s17  }
   0xe   :  { %s10651_s20 = smov [#allocation5]  }
   0xf   :  { %s61_s21 = sshll.u32 %s10651_s20, 4  ;;  %s62_s21 = int_to_ptr.vmem [resolvable:$true] %s61_s21 }
  0x10   :  { %s10610_s22 = scalar_lea.vmem %s62_s21, 1024  ;;  %p10615_p6 = scmp.lt.s32.totalorder %s62_s21, %s62_s21 }
  0x11   :  { %p10611_p5 = scmp.ne.s32.totalorder %s62_s21, %s10610_s22  ;;  %p10616_p7 = scmp.lt.s32.totalorder %s10610_s22, %s10610_s22 }
  0x13   :  { %p10617_p8 = por %p10616_p7, %p10615_p6 }
  0x15   :  { %p10618_p9 = pnand %p10617_p8, %p10611_p5 }
  0x17   :  { %10621 = shalt.err (!%p10618_p9)
}
  0x18   :  { %s10652_s23 = smov 128   ;;  %s10653_s24 = smov 8  }
  0x19   :  { %67 = dma.hbm_to_vmem [thread:$0]  %s13403_s12, 1024, %s62_s21, [#allocation6], %s10652_s23, %s10652_s23, %s10653_s24  }
  0x1a   :  { %10642 = dma.done.wait [#allocation3], 512  }
  0x1b   :  { %10643 = vsyncadd [#allocation3], 4294966784 }
  0x1c   :  { %10644 = dma.done.wait [#allocation6], 1024  }
  0x1d   :  { %10645 = vsyncadd [#allocation6], 4294966272  ;;  %v10654_v0 = vmov 0   ;;  %vm126_vm0 = vcmask 1041408   ;;  %v78_v1 = vld [vmem:[%s13391_s0] sm:$0xff]  ;;  %v80_v2 = vld [vmem:[%s13391_s0 + $0x10] sm:$0xff]  ;;  %v13406_v48 = vlaneseq }
  0x1e   :  { %10444 = vset.pattern.permute.xlu0 %v10654_v0  ;;  %10445 = vset.pattern.permute.xlu1 %v10654_v0  ;;  %v79_v3 = vld [vmem:[%s13391_s0 + $0x8] sm:$0xff]  ;;  %v81_v4 = vld [vmem:[%s13391_s0 + $0x18] sm:$0xff]  ;;  %v112_v5 = vld [vmem:[%s13393_s2 + $0x30] sm:$0x3]  ;;  %vm113_vm1 = vcmask 408576   ;;  %v13407_v52 = vmov 0.0  }
  0x1f   :  { %83 = vperm.xlu0 %10444, %v78_v1   ;;  %89 = vperm.xlu1 %10445, %v80_v2   ;;  %v111_v6 = vld [vmem:[%s13393_s2 + $0x28] sm:$0xff]  ;;  %v128_v7 = vsel %vm126_vm0, %v112_v5, 0  ;;  %v110_v9 = vld [vmem:[%s13393_s2 + $0x20] sm:$0xff]  ;;  %v109_v10 = vld [vmem:[%s13393_s2 + $0x18] sm:$0xff]  ;;  %v10860_v49 = vand.u32 127, %v13406_v48  ;;  %vm799_vm6 = vcmask 130048  }
  0x20   :  { %v10758_v8 = vand.u32 4294901760, %v111_v6  ;;  %v108_v11 = vld [vmem:[%s13393_s2 + $0x10] sm:$0xff]  ;;  %v10769_v12 = vand.u32 4294901760, %v128_v7  ;;  %v10771_v13 = vand.u32 4294901760, %v110_v9  ;;  %v10773_v14 = vand.u32 4294901760, %v109_v10  ;;  %v107_v16 = vld [vmem:[%s13393_s2 + $0x8] sm:$0xff] }
  0x21   :  { %v10775_v15 = vand.u32 4294901760, %v108_v11  ;;  %v106_v17 = vld [vmem:[%s13393_s2] sm:$0xff]  ;;  %v10786_v19 = vand.u32 4294901760, %v107_v16  ;;  %13506 = vst [vmem:[#allocation11_spill] sm:$0xff] %v10860_v49  ;;  %vm1483_vm9 = vcmask 523264   ;;  %s10658_s18 = smov [#allocation7]  }
  0x22   :  { %v10784_v18 = vsub.f32 %v111_v6, %v10758_v8  ;;  %v10789_v20 = vsub.f32 %v128_v7, %v10769_v12  ;;  %v10792_v21 = vsub.f32 %v110_v9, %v10771_v13  ;;  %v10795_v22 = vsub.f32 %v109_v10, %v10773_v14  ;;  %9797 = vmatprep.subr.mxu0 %v10769_v12  ;;  %s9423_s19 = sshll.u32 %s10658_s18, 4  ;;  %s9424_s19 = int_to_ptr.vmem [resolvable:$true] %s9423_s19 }
  0x23   :  { %86 = vperm.xlu0 %10444, %v79_v3   ;;  %92 = vperm.xlu1 %10445, %v81_v4   ;;  %v10797_v23 = vand.u32 4294901760, %v106_v17  ;;  %v10803_v25 = vsub.f32 %v108_v11, %v10775_v15  ;;  %v10817_v29 = vsub.f32 %v107_v16, %v10786_v19  ;;  %s10622_s20 = scalar_lea.vmem %s9424_s19, 64  ;;  %p10627_p11 = scmp.lt.s32.totalorder %s9424_s19, %s9424_s19 }
  0x24   :  { %v10800_v24 = vand.u32 4294901760, %v10784_v18  ;;  %v10807_v26 = vand.u32 4294901760, %v10789_v20  ;;  %v10810_v27 = vand.u32 4294901760, %v10792_v21  ;;  %v10813_v28 = vand.u32 4294901760, %v10795_v22  ;;  %9798 = vmatpush3.msra.mxu0 %v10769_v12  ;;  %p10623_p10 = scmp.ne.s32.totalorder %s9424_s19, %s10622_s20  ;;  %p10628_p12 = scmp.lt.s32.totalorder %s10622_s20, %s10622_s20 }
  0x25   :  { %9799 = vmatprep.subr.mxu0 %v10758_v8  ;;  %v10827_v33 = vand.u32 4294901760, %v10803_v25  ;;  %v10831_v34 = vsub.f32 %v106_v17, %v10797_v23  ;;  %v10837_v38 = vand.u32 4294901760, %v10817_v29 }
  0x26   :  { %v271_v30 = vsub.f32 %v10784_v18, %v10800_v24  ;;  %v264_v31 = vsub.f32 %v10789_v20, %v10807_v26  ;;  %v278_v32 = vsub.f32 %v10792_v21, %v10810_v27  ;;  %9800 = vmatpush3.msra.mxu0 %v10758_v8  ;;  %v285_v37 = vsub.f32 %v10795_v22, %v10813_v28  ;;  %p10629_p13 = por %p10628_p12, %p10627_p11 }
  0x27   :  { %9801 = vmatprep.subr.mxu0 %v10771_v13  ;;  %v292_v40 = vsub.f32 %v10803_v25, %v10827_v33  ;;  %v10844_v41 = vand.u32 4294901760, %v10831_v34  ;;  %v299_v43 = vsub.f32 %v10817_v29, %v10837_v38 }
  0x28   :  { %v265_v35 = vand.u32 4294901760, %v264_v31  ;;  %v272_v36 = vand.u32 4294901760, %v271_v30  ;;  %9802 = vmatpush3.msra.mxu0 %v10771_v13  ;;  %v279_v39 = vand.u32 4294901760, %v278_v32  ;;  %v286_v42 = vand.u32 4294901760, %v285_v37  ;;  %p10630_p0 = pnand %p10629_p13, %p10623_p10 }
  0x29   :  { %9803 = vmatprep.subr.mxu0 %v10773_v14  ;;  %v293_v44 = vand.u32 4294901760, %v292_v40  ;;  %v306_v45 = vsub.f32 %v10831_v34, %v10844_v41  ;;  %v300_v46 = vand.u32 4294901760, %v299_v43 }
  0x2a   :  { %9817 = vmatprep.subr.mxu1 %v265_v35  ;;  %9804 = vmatpush3.msra.mxu0 %v10773_v14 }
  0x2b   :  { %9818 = vmatpush3.msra.mxu1 %v265_v35  ;;  %9805 = vmatprep.subr.mxu0 %v10775_v15  ;;  %v307_v47 = vand.u32 4294901760, %v306_v45 }
  0x2c   :  { %9819 = vmatprep.subr.mxu1 %v272_v36  ;;  %9806 = vmatpush3.msra.mxu0 %v10775_v15 }
  0x2d   :  { %9820 = vmatpush3.msra.mxu1 %v272_v36  ;;  %9807 = vmatprep.subr.mxu0 %v10786_v19 }
  0x2e   :  { %9821 = vmatprep.subr.mxu1 %v279_v39  ;;  %9808 = vmatpush3.msra.mxu0 %v10786_v19 }
  0x2f   :  { %9822 = vmatpush3.msra.mxu1 %v279_v39  ;;  %9809 = vmatprep.subr.mxu0 %v10797_v23 }
  0x30   :  { %9823 = vmatprep.subr.mxu1 %v286_v42  ;;  %9810 = vmatpush3.msra.mxu0 %v10797_v23 }
  0x31   :  { %9824 = vmatpush3.msra.mxu1 %v286_v42  ;;  %9837 = vmatprep.subr.mxu0 %v10789_v20 }
  0x32   :  { %9825 = vmatprep.subr.mxu1 %v293_v44 }
  0x33   :  { %9826 = vmatpush3.msra.mxu1 %v293_v44 }
  0x34   :  { %9827 = vmatprep.subr.mxu1 %v300_v46 }
  0x35   :  { %9828 = vmatpush3.msra.mxu1 %v300_v46 }
  0x36   :  { %9829 = vmatprep.subr.mxu1 %v307_v47 }
  0x37   :  { %9830 = vmatpush3.msra.mxu1 %v307_v47 }
  0x38   :  { %9857 = vmatprep.subr.mxu1 %v10769_v12 }
  0x9a   :  { %v84_v50 = vpop.permute.xlu0 %83  ;;  %v90_v51 = vpop.permute.xlu1 %89 }
  0x9b   :  { %vm94_vm2 = vcmp.eq.s32.totalorder %v10860_v49, %v84_v50  ;;  %vm96_vm3 = vcmp.eq.s32.totalorder %v10860_v49, %v90_v51 }
  0x9c   :  { %v10865_v53 = vsel %vm94_vm2, 1.0, %v13407_v52  ;;  %v10868_v54 = vsel %vm96_vm3, 1.0, %v13407_v52 }
  0x9d   :  { %9831 = vmatprep.mubr.msk.f32.mxu1 %vm113_vm1, %v10865_v53  ;;  %v121_v55 = vsel %vm113_vm1, %v10868_v54, 0  ;;  %v115_v56 = vsel %vm113_vm1, %v10865_v53, 0 }
  0x9e   :  { %v10876_v57 = vsub.f32 %v121_v55, %v121_v55  ;;  %v87_v58 = vpop.permute.xlu0 %86  ;;  %v93_v59 = vpop.permute.xlu1 %92  ;;  %v203_v60 = vsub.f32 %v115_v56, %v115_v56 }
  0x9f   :  { %vm95_vm4 = vcmp.eq.s32.totalorder %v10860_v49, %v87_v58  ;;  %vm97_vm5 = vcmp.eq.s32.totalorder %v10860_v49, %v93_v59 }
  0xa0   :  { %v10881_v61 = vsel %vm95_vm4, 1.0, %v13407_v52  ;;  %v10884_v62 = vsel %vm97_vm5, 1.0, %v13407_v52  ;;  %v204_v63 = vand.u32 4294901760, %v203_v60  ;;  %v224_v5 = vand.u32 4294901760, %v10876_v57 }
  0xa1   :  { %v118_v0 = vsel %vm113_vm1, %v10881_v61, 0  ;;  %9832 = vmatmul.mubr.msk.f32.vlgmr.msra.gmra.mxu1 %vm113_vm1, %v10881_v61  ;;  %v124_v1 = vsel %vm113_vm1, %v10884_v62, 0 }
  0xa2   :  { %v213_v2 = vsub.f32 %v118_v0, %v118_v0  ;;  %9858 = vmatpush3.msra.mxu1 %v10769_v12  ;;  %v10893_v3 = vsub.f32 %v124_v1, %v124_v1  ;;  %9834 = vmatprep.mubr.msk.f32.mxu1 %vm113_vm1, %v10868_v54  ;;  %v205_v4 = vsub.f32 %v203_v60, %v204_v63 }
  0xa3   :  { %9859 = vmatprep.subr.mxu1 %v10758_v8  ;;  %v225_v11 = vsub.f32 %v10876_v57, %v224_v5 }
  0xa4   :  { %9860 = vmatpush3.msra.mxu1 %v10758_v8  ;;  %v206_v6 = vand.u32 4294901760, %v205_v4  ;;  %v214_v7 = vand.u32 4294901760, %v213_v2  ;;  %v234_v9 = vand.u32 4294901760, %v10893_v3 }
  0xa5   :  { %9861 = vmatprep.subr.mxu1 %v10771_v13  ;;  %9835 = vmatmul.mubr.msk.f32.gmra.mxu1 %vm113_vm1, %v10884_v62  ;;  %v226_v30 = vand.u32 4294901760, %v225_v11 }
  0xa6   :  { %9862 = vmatpush3.msra.mxu1 %v10771_v13  ;;  %9811 = vmatprep.mubr.f32.mxu0 %v206_v6  ;;  %v215_v10 = vsub.f32 %v213_v2, %v214_v7  ;;  %v235_v16 = vsub.f32 %v10893_v3, %v234_v9 }
  0xa7   :  { %9863 = vmatprep.subr.mxu1 %v10773_v14  ;;  %9871 = vmatprep.mubr.f32.mxu1 %v204_v63 }
  0xa8   :  { %9864 = vmatpush3.msra.mxu1 %v10773_v14  ;;  %v216_v17 = vand.u32 4294901760, %v215_v10  ;;  %v236_v31 = vand.u32 4294901760, %v235_v16 }
  0xa9   :  { %9865 = vmatprep.subr.mxu1 %v10775_v15 }
  0xaa   :  { %9866 = vmatpush3.msra.mxu1 %v10775_v15  ;;  %9812 = vmatmul.mubr.f32.vlgmr.msra.gmra.mxu0 %v216_v17 }
  0xab   :  { %9838 = vmatpush3.msra.mxu0 %v10789_v20  ;;  %9867 = vmatprep.subr.mxu1 %v10786_v19  ;;  %v783_v20 = vld [vmem:[#allocation2] sm:$0xff] }
  0xac   :  { %9839 = vmatprep.subr.mxu0 %v10784_v18  ;;  %9868 = vmatpush3.msra.mxu1 %v10786_v19 }
  0xad   :  { %9840 = vmatpush3.msra.mxu0 %v10784_v18  ;;  %9869 = vmatprep.subr.mxu1 %v10797_v23 }
  0xae   :  { %9814 = vmatprep.mubr.f32.mxu0 %v226_v30  ;;  %9841 = vmatprep.subr.mxu0 %v10792_v21 }
  0xaf   :  { %9870 = vmatpush3.msra.mxu1 %v10797_v23  ;;  %9815 = vmatmul.mubr.f32.gmra.mxu0 %v236_v31 }
  0xb0   :  { %9842 = vmatpush3.msra.mxu0 %v10792_v21  ;;  %9872 = vmatmul.mubr.f32.vlgmr.msra.gmra.mxu1 %v214_v7 }
  0xb1   :  { %9897 = vmatprep.subr.mxu1 %v10769_v12  ;;  %9843 = vmatprep.subr.mxu0 %v10795_v22 }
  0xb2   :  { %9851 = vmatprep.mubr.f32.mxu0 %v203_v60  ;;  %9874 = vmatprep.mubr.f32.mxu1 %v224_v5 }
  0xb3   :  { %9898 = vmatpush3.msra.mxu1 %v10769_v12  ;;  %9844 = vmatpush3.msra.mxu0 %v10795_v22  ;;  %v10989_v22 = vand.u32 4294901760, %v783_v20 }
  0xb4   :  { %9899 = vmatprep.subr.mxu1 %v10758_v8  ;;  %9845 = vmatprep.subr.mxu0 %v10803_v25 }
  0xb5   :  { %9900 = vmatpush3.msra.mxu1 %v10758_v8  ;;  %9846 = vmatpush3.msra.mxu0 %v10803_v25  ;;  %v786_v8 = vld [vmem:[#allocation2 + $0x18] sm:$0xff] }
  0xb6   :  { %9875 = vmatmul.mubr.f32.gmra.mxu1 %v234_v9  ;;  %9901 = vmatprep.subr.mxu1 %v10771_v13  ;;  %v10976_v12 = vand.u32 4294901760, %v786_v8 }
  0xb7   :  { %9847 = vmatprep.subr.mxu0 %v10817_v29  ;;  %9902 = vmatpush3.msra.mxu1 %v10771_v13  ;;  %v785_v13 = vld [vmem:[#allocation2 + $0x10] sm:$0xff] }
  0xb8   :  { %9911 = vmatprep.mubr.msk.f32.mxu1 %vm113_vm1, %v10865_v53  ;;  %9848 = vmatpush3.msra.mxu0 %v10817_v29  ;;  %v10981_v18 = vsub.f32 %v786_v8, %v10976_v12 }
  0xb9   :  { %9903 = vmatprep.subr.mxu1 %v10773_v14  ;;  %9849 = vmatprep.subr.mxu0 %v10831_v34 }
  0xba   :  { %9904 = vmatpush3.msra.mxu1 %v10773_v14  ;;  %9850 = vmatpush3.msra.mxu0 %v10831_v34  ;;  %v10978_v14 = vand.u32 4294901760, %v785_v13 }
  0xbb   :  { %9905 = vmatprep.subr.mxu1 %v10775_v15  ;;  %9852 = vmatmul.mubr.f32.vlgmr.msra.gmra.mxu0 %v213_v2 }
  0xbc   :  { %9877 = vmatprep.subr.mxu0 %v10807_v26  ;;  %9906 = vmatpush3.msra.mxu1 %v10775_v15  ;;  %v784_v15 = vld [vmem:[#allocation2 + $0x8] sm:$0xff]  ;;  %v10987_v21 = vsub.f32 %v785_v13, %v10978_v14 }
  0xbd   :  { %9854 = vmatprep.mubr.f32.mxu0 %v10876_v57  ;;  %9878 = vmatpush3.msra.mxu0 %v10807_v26  ;;  %v10999_v26 = vsub.f32 %v783_v20, %v10989_v22 }
  0xbe   :  { %9907 = vmatprep.subr.mxu1 %v10786_v19  ;;  %9879 = vmatprep.subr.mxu0 %v10800_v24  ;;  %v961_v25 = vand.u32 4294901760, %v10987_v21 }
  0xbf   :  { %9908 = vmatpush3.msra.mxu1 %v10786_v19  ;;  %9880 = vmatpush3.msra.mxu0 %v10800_v24  ;;  %v10983_v19 = vand.u32 4294901760, %v784_v15  ;;  %v973_v32 = vand.u32 4294901760, %v10999_v26 }
  0xc0   :  { %9909 = vmatprep.subr.mxu1 %v10797_v23  ;;  %9855 = vmatmul.mubr.f32.gmra.mxu0 %v10893_v3  ;;  %v962_v29 = vsub.f32 %v10987_v21, %v961_v25 }
  0xc1   :  { %9881 = vmatprep.subr.mxu0 %v10810_v27  ;;  %9910 = vmatpush3.msra.mxu1 %v10797_v23  ;;  %v955_v23 = vand.u32 4294901760, %v10981_v18  ;;  %v10994_v24 = vsub.f32 %v784_v15, %v10983_v19  ;;  %v974_v36 = vsub.f32 %v10999_v26, %v973_v32 }
  0xc2   :  { %9882 = vmatpush3.msra.mxu0 %v10810_v27  ;;  %9891 = vmatprep.mubr.msk.f32.mxu0 %vm113_vm1, %v10865_v53  ;;  %v963_v35 = vand.u32 4294901760, %v962_v29 }
  0xc3   :  { %9912 = vmatmul.mubr.msk.f32.vlgmr.msra.gmra.mxu1 %vm113_vm1, %v10881_v61  ;;  %9883 = vmatprep.subr.mxu0 %v10813_v28  ;;  %v956_v27 = vsub.f32 %v10981_v18, %v955_v23 }
  0xc4   :  { %9914 = vmatprep.mubr.msk.f32.mxu1 %vm113_vm1, %v10868_v54  ;;  %9884 = vmatpush3.msra.mxu0 %v10813_v28  ;;  %v967_v28 = vand.u32 4294901760, %v10994_v24 }
  0xc5   :  { %9885 = vmatprep.subr.mxu0 %v10827_v33 }
  0xc6   :  { %9886 = vmatpush3.msra.mxu0 %v10827_v33  ;;  %v957_v33 = vand.u32 4294901760, %v956_v27  ;;  %v968_v34 = vsub.f32 %v10994_v24, %v967_v28 }
  0xc7   :  { %9915 = vmatmul.mubr.msk.f32.gmra.mxu1 %vm113_vm1, %v10884_v62  ;;  %9887 = vmatprep.subr.mxu0 %v10837_v38 }
  0xc8   :  { %9888 = vmatpush3.msra.mxu0 %v10837_v38  ;;  %1009 = vmatprep.mubr.f32.mxu1 %v13407_v52  ;;  %v969_v37 = vand.u32 4294901760, %v968_v34  ;;  %v975_v38 = vand.u32 4294901760, %v974_v36 }
  0xc9   :  { %9889 = vmatprep.subr.mxu0 %v10844_v41  ;;  %958 = vmatprep.subr.mxu1 %v957_v33 }
  0xca   :  { %9890 = vmatpush3.msra.mxu0 %v10844_v41  ;;  %964 = vmatpush1.msra.mxu1 %v963_v35 }
  0xcb   :  { %9892 = vmatmul.mubr.msk.f32.vlgmr.msra.gmra.mxu0 %vm113_vm1, %v10881_v61  ;;  %841 = vmatprep.subr.mxu0 %v10976_v12 }
  0xcc   :  { %9894 = vmatprep.mubr.msk.f32.mxu0 %vm113_vm1, %v10868_v54  ;;  %843 = vmatpush1.msra.mxu0 %v10978_v14 }
  0xcd   :  { %845 = vmatprep.subr.mxu0 %v10983_v19  ;;  %970 = vmatprep.subr.mxu1 %v969_v37 }
  0xce   :  { %847 = vmatpush1.msra.mxu0 %v10989_v22  ;;  %976 = vmatpush1.msra.mxu1 %v975_v38 }
  0xcf   :  { %9895 = vmatmul.mubr.msk.f32.gmra.mxu0 %vm113_vm1, %v10884_v62  ;;  %1068 = vmatprep.subr.mxu0 %v10981_v18 }
  0xd0   :  { %880 = vmatprep.mubr.f32.mxu0 %v13407_v52  ;;  %1172 = vmatprep.subr.mxu1 %v10976_v12 }
 0x161   :  { %v9833_v39 = vpop.f32.mrf.mxu1 }
 0x163   :  { %v344_v40 = vpop.f32.mrf.mxu1 }
 0x165   :  { %v9836_v42 = vpop.f32.mrf.mxu1 }
 0x167   :  { %v356_v44 = vpop.f32.mrf.mxu1 }
 0x16a   :  { %v9813_v41 = vpop.f32.mrf.mxu0 }
 0x16b   :  { %v351_v55 = vadd.f32 %v9833_v39, %v9813_v41  ;;  %v1474_v41 = vld [vmem:[%s13395_s4 + $0x78] sm:$0xff] }
 0x16c   :  { %v208_v43 = vpop.f32.mrf.mxu0 }
 0x16d   :  { %v345_v58 = vadd.f32 %v344_v40, %v208_v43 }
 0x16f   :  { %v9816_v45 = vpop.f32.mrf.mxu0 }
 0x170   :  { %v9873_v46 = vpop.f32.mrf.mxu1  ;;  %v363_v61 = vadd.f32 %v9836_v42, %v9816_v45 }
 0x171   :  { %v228_v47 = vpop.f32.mrf.mxu0 }
 0x172   :  { %v549_v50 = vpop.f32.mrf.mxu1  ;;  %v357_v0 = vadd.f32 %v356_v44, %v228_v47  ;;  %v11046_v47 = vand.u32 4294901760, %v1474_v41 }
 0x174   :  { %13507 = vst [vmem:[#allocation12_spill] sm:$0xff] %v11046_v47 }
 0x176   :  { %v9876_v53 = vpop.f32.mrf.mxu1 }
 0x178   :  { %v565_v56 = vpop.f32.mrf.mxu1 }
 0x17b   :  { %v9853_v51 = vpop.f32.mrf.mxu0 }
 0x17c   :  { %v456_v59 = vadd.f32 %v9853_v51, %v351_v55 }
 0x17d   :  { %v448_v54 = vpop.f32.mrf.mxu0 }
 0x17e   :  { %v449_v62 = vadd.f32 %v448_v54, %v345_v58  ;;  %v558_v2 = vadd.f32 %v9873_v46, %v456_v59 }
 0x180   :  { %v9856_v57 = vpop.f32.mrf.mxu0  ;;  %v550_v7 = vadd.f32 %v549_v50, %v449_v62  ;;  %v1472_v62 = vld [vmem:[%s13395_s4 + $0x68] sm:$0xff] }
 0x181   :  { %v470_v1 = vadd.f32 %v9856_v57, %v363_v61  ;;  %v11061_v57 = vsub.f32 %v1474_v41, %v11046_v47  ;;  %v1473_v61 = vld [vmem:[%s13395_s4 + $0x70] sm:$0xff] }
 0x182   :  { %v462_v63 = vpop.f32.mrf.mxu0 }
 0x183   :  { %v9913_v60 = vpop.f32.mrf.mxu1  ;;  %v463_v5 = vadd.f32 %v462_v63, %v357_v0  ;;  %v574_v16 = vadd.f32 %v9876_v53, %v470_v1  ;;  %13508 = vst [vmem:[#allocation13_spill] sm:$0xff] %v11061_v57  ;;  %v11086_v1 = vand.u32 4294901760, %v1473_v61 }
 0x185   :  { %v761_v3 = vpop.f32.mrf.mxu1  ;;  %v566_v15 = vadd.f32 %v565_v56, %v463_v5  ;;  %v1470_v5 = vld [vmem:[%s13395_s4 + $0x58] sm:$0xff] }
 0x187   :  { %v9916_v17 = vpop.f32.mrf.mxu1 }
 0x189   :  { %v773_v35 = vpop.f32.mrf.mxu1 }
 0x18b   :  { %v9893_v4 = vpop.f32.mrf.mxu0 }
 0x18c   :  { %v672_v6 = vadd.f32 %v9893_v4, %v558_v2  ;;  %v1471_v4 = vld [vmem:[%s13395_s4 + $0x60] sm:$0xff] }
 0x18d   :  { %v665_v9 = vpop.f32.mrf.mxu0 }
 0x18e   :  { %v768_v10 = vadd.f32 %v9913_v60, %v672_v6  ;;  %v666_v11 = vadd.f32 %v665_v9, %v550_v7  ;;  %v11072_v60 = vand.u32 4294901760, %v11061_v57  ;;  %v11104_v6 = vand.u32 4294901760, %v1471_v4 }
 0x18f   :  { %v9896_v30 = vpop.f32.mrf.mxu0 }
 0x190   :  { %v804_v31 = vsel %vm799_vm6, %v768_v10, 0  ;;  %v762_v8 = vadd.f32 %v761_v3, %v666_v11  ;;  %v684_v13 = vadd.f32 %v9896_v30, %v574_v16  ;;  %13509 = vst [vmem:[#allocation14_spill] sm:$0xff] %v11072_v60  ;;  %v1598_v2 = vsub.f32 %v11061_v57, %v11072_v60  ;;  %v1469_v11 = vld [vmem:[%s13395_s4 + $0x50] sm:$0xff] }
 0x191   :  { %v11019_v20 = vand.u32 4294901760, %v804_v31  ;;  %v677_v27 = vpop.f32.mrf.mxu0  ;;  %v11090_v3 = vand.u32 4294901760, %v1472_v62  ;;  %v11112_v10 = vand.u32 4294901760, %v1470_v5  ;;  %v11126_v16 = vand.u32 4294901760, %v1469_v11 }
 0x192   :  { %v801_v29 = vsel %vm799_vm6, %v762_v8, 0  ;;  %v780_v33 = vadd.f32 %v9916_v17, %v684_v13  ;;  %v678_v34 = vadd.f32 %v677_v27, %v566_v15  ;;  %v11107_v7 = vand.u32 4294901760, %v1598_v2  ;;  %v1468_v17 = vld [vmem:[%s13395_s4 + $0x48] sm:$0xff] }
 0x193   :  { %v11023_v36 = vsub.f32 %v804_v31, %v11019_v20  ;;  %v11025_v37 = vand.u32 4294901760, %v801_v29  ;;  %v11110_v9 = vsub.f32 %v1472_v62, %v11090_v3  ;;  %v11136_v31 = vsub.f32 %v1470_v5, %v11112_v10  ;;  %v1459_v62 = vld [vmem:[%s13395_s4] sm:$0xff] }
 0x194   :  { %v810_v38 = vsel %vm799_vm6, %v780_v33, 0  ;;  %v774_v39 = vadd.f32 %v773_v35, %v678_v34  ;;  %13510 = vst [vmem:[#allocation15_spill] sm:$0xff] %v11107_v7  ;;  %v11145_v8 = vand.u32 4294901760, %v1468_v17  ;;  %v11156_v27 = vsub.f32 %v1469_v11, %v11126_v16  ;;  %v1463_v34 = vld [vmem:[%s13395_s4 + $0x20] sm:$0xff] }
 0x195   :  { %v11029_v40 = vsub.f32 %v801_v29, %v11025_v37  ;;  %1011 = vmatmul.mubr.f32.vlgmr.msra.gmra.mxu1 %v11025_v37  ;;  %v11039_v44 = vand.u32 4294901760, %v810_v38  ;;  %v894_v46 = vand.u32 4294901760, %v11023_v36  ;;  %v11133_v30 = vand.u32 4294901760, %v11110_v9  ;;  %v1465_v29 = vld [vmem:[%s13395_s4 + $0x30] sm:$0xff] }
 0x196   :  { %v807_v42 = vsel %vm799_vm6, %v774_v39, 0  ;;  %1016 = vmatprep.mubr.f32.mxu1 %v13407_v52  ;;  %1174 = vmatpush1.msra.mxu1 %v10978_v14  ;;  %v11195_v39 = vand.u32 4294901760, %v1465_v29 }
 0x197   :  { %v883_v43 = vand.u32 4294901760, %v11029_v40  ;;  %v11041_v45 = vand.u32 4294901760, %v807_v42  ;;  %1176 = vmatprep.subr.mxu1 %v10983_v19  ;;  %v11056_v54 = vsub.f32 %v810_v38, %v11039_v44  ;;  %v895_v55 = vsub.f32 %v11023_v36, %v894_v46  ;;  %13512 = vst [vmem:[#allocation17_spill] sm:$0xff] %v11133_v30 }
 0x198   :  { %1178 = vmatpush1.msra.mxu1 %v10989_v22  ;;  %v11193_v38 = vand.u32 4294901760, %v11156_v27 }
 0x199   :  { %v884_v50 = vsub.f32 %v11029_v40, %v883_v43  ;;  %v11050_v51 = vsub.f32 %v807_v42, %v11041_v45  ;;  %1018 = vmatmul.mubr.f32.gmra.mxu1 %v11019_v20  ;;  %1382 = vmatprep.subr.mxu1 %v10976_v12  ;;  %v896_v12 = vand.u32 4294901760, %v895_v55  ;;  %v916_v59 = vand.u32 4294901760, %v11056_v54 }
 0x19a   :  { %1023 = vmatprep.mubr.f32.mxu1 %v13407_v52  ;;  %13516 = vst [vmem:[#allocation21_spill] sm:$0xff] %v11193_v38 }
 0x19b   :  { %v885_v53 = vand.u32 4294901760, %v884_v50  ;;  %v905_v56 = vand.u32 4294901760, %v11050_v51  ;;  %v917_v0 = vsub.f32 %v11056_v54, %v916_v59  ;;  %v11211_v50 = vand.u32 4294901760, %v1463_v34 }
 0x19d   :  { %886 = vmatmul.mubr.f32.vlgmr.msra.gmra.mxu0 %v885_v53  ;;  %1025 = vmatmul.mubr.f32.gmra.mxu1 %v11041_v45  ;;  %v906_v58 = vsub.f32 %v11050_v51, %v905_v56  ;;  %v918_v18 = vand.u32 4294901760, %v917_v0  ;;  %v1461_v53 = vld [vmem:[%s13395_s4 + $0x10] sm:$0xff]  ;;  %v11254_v5 = vsub.f32 %v1463_v34, %v11211_v50 }
 0x19e   :  { %1071 = vmatpush1.msra.mxu0 %v10987_v21  ;;  %891 = vmatprep.mubr.f32.mxu0 %v13407_v52  ;;  %v1466_v21 = vld [vmem:[%s13395_s4 + $0x38] sm:$0xff] }
 0x19f   :  { %1030 = vmatprep.mubr.f32.mxu1 %v13407_v52  ;;  %1074 = vmatprep.subr.mxu0 %v10994_v24  ;;  %v907_v63 = vand.u32 4294901760, %v906_v58  ;;  %v1610_v24 = vsub.f32 %v11110_v9, %v11133_v30  ;;  %v11182_v33 = vand.u32 4294901760, %v1466_v21  ;;  %v1628_v58 = vsub.f32 %v11156_v27, %v11193_v38  ;;  %13524 = vst [vmem:[#allocation29_spill] sm:$0xff] %v11254_v5 }
 0x1a0   :  { %1077 = vmatpush1.msra.mxu0 %v10999_v26  ;;  %v1464_v26 = vld [vmem:[%s13395_s4 + $0x28] sm:$0xff]  ;;  %v11288_v34 = vand.u32 4294901760, %v11254_v5 }
 0x1a1   :  { %897 = vmatmul.mubr.f32.gmra.mxu0 %v896_v12  ;;  %1032 = vmatmul.mubr.f32.gmra.mxu1 %v11039_v44 }
 0x1a2   :  { %902 = vmatprep.mubr.f32.mxu0 %v13407_v52  ;;  %1211 = vmatprep.mubr.f32.mxu1 %v13407_v52  ;;  %13531 = vst [vmem:[#allocation36_spill] sm:$0xff] %v11288_v34 }
 0x1a3   :  { %1279 = vmatprep.subr.mxu0 %v955_v23  ;;  %v11102_v23 = vsub.f32 %v1473_v61, %v11086_v1 }
 0x1a5   :  { %908 = vmatmul.mubr.f32.gmra.mxu0 %v907_v63  ;;  %1215 = vmatmul.mubr.f32.vlgmr.msra.gmra.mxu1 %v883_v43  ;;  %v11204_v43 = vand.u32 4294901760, %v1464_v26 }
 0x1a6   :  { %913 = vmatprep.mubr.f32.mxu0 %v13407_v52  ;;  %1220 = vmatprep.mubr.f32.mxu1 %v13407_v52 }
 0x1a7   :  { %1384 = vmatpush1.msra.mxu1 %v10978_v14  ;;  %v11121_v14 = vand.u32 4294901760, %v11102_v23  ;;  %v11247_v2 = vsub.f32 %v1464_v26, %v11204_v43 }
 0x1a8   :  { %1386 = vmatprep.subr.mxu1 %v10983_v19  ;;  %v11124_v19 = vsub.f32 %v1471_v4, %v11104_v6  ;;  %v11249_v4 = vand.u32 4294901760, %v1461_v53 }
 0x1a9   :  { %919 = vmatmul.mubr.f32.gmra.mxu0 %v918_v18  ;;  %1224 = vmatmul.mubr.f32.gmra.mxu1 %v894_v46  ;;  %13511 = vst [vmem:[#allocation16_spill] sm:$0xff] %v11121_v14  ;;  %v1604_v13 = vsub.f32 %v11102_v23, %v11121_v14  ;;  %v1462_v46 = vld [vmem:[%s13395_s4 + $0x18] sm:$0xff]  ;;  %13523 = vst [vmem:[#allocation28_spill] sm:$0xff] %v11247_v2 }
 0x1aa   :  { %1110 = vmatprep.mubr.f32.mxu0 %v13407_v52  ;;  %1229 = vmatprep.mubr.f32.mxu1 %v13407_v52  ;;  %v11153_v15 = vand.u32 4294901760, %v11124_v19  ;;  %v11235_v61 = vand.u32 4294901760, %v1462_v46  ;;  %v11283_v26 = vsub.f32 %v1461_v53, %v11249_v4 }
 0x1ab   :  { %1388 = vmatpush1.msra.mxu1 %v10989_v22  ;;  %v1467_v22 = vld [vmem:[%s13395_s4 + $0x40] sm:$0xff]  ;;  %v11188_v35 = vand.u32 4294901760, %v1604_v13 }
 0x1ac   :  { %1600 = vmatprep.subr.mxu1 %v11107_v7  ;;  %13513 = vst [vmem:[#allocation18_spill] sm:$0xff] %v11153_v15  ;;  %v11272_v13 = vsub.f32 %v1462_v46, %v11235_v61  ;;  %13530 = vst [vmem:[#allocation35_spill] sm:$0xff] %v11283_v26  ;;  %v11316_v48 = vand.u32 4294901760, %v11283_v26 }
 0x1ad   :  { %1113 = vmatmul.mubr.f32.vlgmr.msra.gmra.mxu0 %v11029_v40  ;;  %1233 = vmatmul.mubr.f32.gmra.mxu1 %v905_v56  ;;  %13515 = vst [vmem:[#allocation20_spill] sm:$0xff] %v11188_v35  ;;  %v11197_v40 = vand.u32 4294901760, %v1610_v24  ;;  %v11222_v56 = vsub.f32 %v1466_v21, %v11182_v33  ;;  %v11275_v21 = vand.u32 4294901760, %v1628_v58 }
 0x1ae   :  { %1283 = vmatpush1.msra.mxu0 %v961_v25  ;;  %1118 = vmatprep.mubr.f32.mxu0 %v13407_v52  ;;  %v11166_v25 = vand.u32 4294901760, %v11136_v31  ;;  %13527 = vst [vmem:[#allocation32_spill] sm:$0xff] %v11272_v13  ;;  %13537 = vst [vmem:[#allocation42_spill] sm:$0xff] %v11316_v48 }
 0x1af   :  { %1238 = vmatprep.mubr.f32.mxu1 %v13407_v52  ;;  %1287 = vmatprep.subr.mxu0 %v967_v28  ;;  %v11168_v28 = vand.u32 4294901760, %v1467_v22  ;;  %13517 = vst [vmem:[#allocation22_spill] sm:$0xff] %v11197_v40  ;;  %v11261_v11 = vand.u32 4294901760, %v11222_v56  ;;  %13528 = vst [vmem:[#allocation33_spill] sm:$0xff] %v11275_v21 }
 0x1b0   :  { %1291 = vmatpush1.msra.mxu0 %v973_v32  ;;  %13514 = vst [vmem:[#allocation19_spill] sm:$0xff] %v11166_v25  ;;  %v11180_v32 = vsub.f32 %v1468_v17, %v11145_v8  ;;  %v1622_v41 = vsub.f32 %v11136_v31, %v11166_v25  ;;  %v11263_v17 = vand.u32 4294901760, %v1459_v62 }
 0x1b1   :  { %1121 = vmatmul.mubr.f32.gmra.mxu0 %v11023_v36  ;;  %1242 = vmatmul.mubr.f32.gmra.mxu1 %v916_v59  ;;  %v1616_v36 = vsub.f32 %v11124_v19, %v11153_v15  ;;  %v11202_v42 = vsub.f32 %v1467_v22, %v11168_v28  ;;  %v11233_v59 = vsub.f32 %v1465_v29, %v11195_v39  ;;  %v11280_v29 = vand.u32 4294901760, %v11247_v2 }
 0x1b2   :  { %1126 = vmatprep.mubr.f32.mxu0 %v13407_v52  ;;  %1421 = vmatprep.mubr.f32.mxu1 %v13407_v52  ;;  %v11219_v55 = vand.u32 4294901760, %v11180_v32  ;;  %v11241_v63 = vand.u32 4294901760, %v1622_v41  ;;  %13525 = vst [vmem:[#allocation30_spill] sm:$0xff] %v11261_v11  ;;  %v1646_v41 = vsub.f32 %v11222_v56, %v11261_v11  ;;  %v11298_v46 = vsub.f32 %v1459_v62, %v11263_v17 }
 0x1b3   :  { %1504 = vmatprep.subr.mxu0 %v11046_v47  ;;  %v11228_v12 = vand.u32 4294901760, %v1616_v36  ;;  %13520 = vst [vmem:[#allocation25_spill] sm:$0xff] %v11233_v59  ;;  %v11244_v0 = vand.u32 4294901760, %v11202_v42  ;;  %v11269_v22 = vand.u32 4294901760, %v11233_v59  ;;  %13529 = vst [vmem:[#allocation34_spill] sm:$0xff] %v11280_v29  ;;  %v1658_v62 = vsub.f32 %v11247_v2, %v11280_v29 }
 0x1b4   :  { %13518 = vst [vmem:[#allocation23_spill] sm:$0xff] %v11219_v55  ;;  %13521 = vst [vmem:[#allocation26_spill] sm:$0xff] %v11241_v63  ;;  %v11330_v49 = vand.u32 4294901760, %v11298_v46 }
 0x1b5   :  { %1129 = vmatmul.mubr.f32.gmra.mxu0 %v11050_v51  ;;  %1423 = vmatmul.mubr.f32.vlgmr.msra.gmra.mxu1 %v11025_v37  ;;  %v1460_v51 = vld [vmem:[%s13395_s4 + $0x8] sm:$0xff]  ;;  %13519 = vst [vmem:[#allocation24_spill] sm:$0xff] %v11228_v12  ;;  %13522 = vst [vmem:[#allocation27_spill] sm:$0xff] %v11244_v0  ;;  %v1640_v24 = vsub.f32 %v11202_v42, %v11244_v0  ;;  %v1652_v53 = vsub.f32 %v11233_v59, %v11269_v22 }
 0x1b6   :  { %1134 = vmatprep.mubr.f32.mxu0 %v13407_v52  ;;  %1428 = vmatprep.mubr.f32.mxu1 %v13407_v52  ;;  %v11256_v18 = vand.u32 4294901760, %v1460_v51  ;;  %13526 = vst [vmem:[#allocation31_spill] sm:$0xff] %v11269_v22  ;;  %13533 = vst [vmem:[#allocation38_spill] sm:$0xff] %v11298_v46 }
 0x1b7   :  { %1606 = vmatpush1.msra.mxu1 %v11188_v35  ;;  %v11311_v58 = vand.u32 4294901760, %v1640_v24  ;;  %v11327_v24 = vand.u32 4294901760, %v1646_v41  ;;  %13540 = vst [vmem:[#allocation45_spill] sm:$0xff] %v11330_v49  ;;  %v1676_v41 = vsub.f32 %v11283_v26, %v11316_v48 }
 0x1b8   :  { %1612 = vmatprep.subr.mxu1 %v11197_v40  ;;  %v11291_v36 = vsub.f32 %v1460_v51, %v11256_v18  ;;  %v11307_v51 = vand.u32 4294901760, %v11272_v13 }
 0x1b9   :  { %1137 = vmatmul.mubr.f32.gmra.mxu0 %v11056_v54  ;;  %1430 = vmatmul.mubr.f32.gmra.mxu1 %v11019_v20  ;;  %v1634_v54 = vsub.f32 %v11180_v32, %v11219_v55  ;;  %13536 = vst [vmem:[#allocation41_spill] sm:$0xff] %v11311_v58  ;;  %13539 = vst [vmem:[#allocation44_spill] sm:$0xff] %v11327_v24 }
 0x1ba   :  { %1324 = vmatprep.mubr.f32.mxu0 %v13407_v52  ;;  %1435 = vmatprep.mubr.f32.mxu1 %v13407_v52  ;;  %13532 = vst [vmem:[#allocation37_spill] sm:$0xff] %v11291_v36  ;;  %13535 = vst [vmem:[#allocation40_spill] sm:$0xff] %v11307_v51 }
 0x1bb   :  { %1618 = vmatpush1.msra.mxu1 %v11228_v12  ;;  %v13543_v12 = vmov 0.0  }
 0x1bc   :  { %1624 = vmatprep.subr.mxu1 %v11241_v63  ;;  %v11340_v63 = vand.u32 4294901760, %v1658_v62  ;;  %v1688_v62 = vsub.f32 %v11298_v46, %v11330_v49 }
 0x1bd   :  { %1326 = vmatmul.mubr.f32.vlgmr.msra.gmra.mxu0 %v11025_v37  ;;  %1437 = vmatmul.mubr.f32.gmra.mxu1 %v11041_v45  ;;  %v11302_v37 = vand.u32 4294901760, %v1634_v54  ;;  %v1664_v54 = vsub.f32 %v11254_v5, %v11288_v34 }
 0x1be   :  { %1506 = vmatpush1.msra.mxu0 %v11086_v1  ;;  %1331 = vmatprep.mubr.f32.mxu0 %v13407_v52  ;;  %13542 = vst [vmem:[#allocation47_spill] sm:$0xff] %v11340_v63 }
 0x1bf   :  { %1508 = vmatprep.subr.mxu0 %v11090_v3  ;;  %1442 = vmatprep.mubr.f32.mxu1 %v13407_v52  ;;  %13534 = vst [vmem:[#allocation39_spill] sm:$0xff] %v11302_v37  ;;  %v11323_v52 = vand.u32 4294901760, %v11291_v36  ;;  %v11346_v40 = vand.u32 4294901760, %v1664_v54  ;;  %v11360_v54 = vand.u32 4294901760, %v1676_v41  ;;  %v11412_v41 = vld [vmem:[%s13396_s5] sm:$0x3] }
 0x1c0   :  { %1510 = vmatpush1.msra.mxu0 %v11104_v6  ;;  %1630 = vmatpush1.msra.mxu1 %v11275_v21  ;;  %v1670_v21 = vsub.f32 %v11272_v13, %v11307_v51  ;;  %s10656_s5 = smov 64  }
 0x1c1   :  { %1512 = vmatprep.subr.mxu0 %v11112_v10  ;;  %1333 = vmatmul.mubr.f32.gmra.mxu0 %v11019_v20  ;;  %13538 = vst [vmem:[#allocation43_spill] sm:$0xff] %v11323_v52  ;;  %v11334_v20 = vand.u32 4294901760, %v1652_v53  ;;  %13544 = vst [vmem:[#allocation48_spill] sm:$0xff] %v11346_v40  ;;  %v1682_v53 = vsub.f32 %v11291_v36, %v11323_v52 }
 0x1c2   :  { %1444 = vmatmul.mubr.f32.gmra.mxu1 %v11039_v44  ;;  %1514 = vmatpush1.msra.mxu0 %v11126_v16  ;;  %13546 = vst [vmem:[#allocation50_spill] sm:$0xff] %v11360_v54 }
 0x1c3   :  { %1516 = vmatprep.subr.mxu0 %v11145_v8  ;;  %1636 = vmatprep.subr.mxu1 %v11302_v37  ;;  %13541 = vst [vmem:[#allocation46_spill] sm:$0xff] %v11334_v20 }
 0x1c4   :  { %1518 = vmatpush1.msra.mxu0 %v11168_v28  ;;  %1642 = vmatpush1.msra.mxu1 %v11311_v58  ;;  %v11356_v58 = vand.u32 4294901760, %v1670_v21 }
 0x1c5   :  { %1338 = vmatprep.mubr.f32.mxu0 %v13543_v12  ;;  %1520 = vmatprep.subr.mxu0 %v11182_v33 }
 0x1c6   :  { %1648 = vmatprep.subr.mxu1 %v11327_v24  ;;  %1340 = vmatmul.mubr.f32.gmra.mxu0 %v11041_v45  ;;  %13545 = vst [vmem:[#allocation49_spill] sm:$0xff] %v11356_v58  ;;  %v11364_v45 = vand.u32 4294901760, %v1682_v53  ;;  %v11368_v24 = vand.u32 4294901760, %v1688_v62 }
 0x1c7   :  { %1522 = vmatpush1.msra.mxu0 %v11195_v39  ;;  %1654 = vmatpush1.msra.mxu1 %v11334_v20 }
 0x1c8   :  { %1524 = vmatprep.subr.mxu0 %v11204_v43  ;;  %1660 = vmatprep.subr.mxu1 %v11340_v63  ;;  %13547 = vst [vmem:[#allocation51_spill] sm:$0xff] %v11364_v45  ;;  %13548 = vst [vmem:[#allocation52_spill] sm:$0xff] %v11368_v24 }
 0x1c9   :  { %1526 = vmatpush1.msra.mxu0 %v11211_v50  ;;  %1666 = vmatpush1.msra.mxu1 %v11346_v40 }
 0x1ca   :  { %1345 = vmatprep.mubr.f32.mxu0 %v13543_v12  ;;  %1528 = vmatprep.subr.mxu0 %v11235_v61 }
 0x1cb   :  { %1672 = vmatprep.subr.mxu1 %v11356_v58  ;;  %1347 = vmatmul.mubr.f32.gmra.mxu0 %v11039_v44  ;;  %v13549_v44 = vlaneseq }
 0x1cc   :  { %1530 = vmatpush1.msra.mxu0 %v11249_v4  ;;  %1678 = vmatpush1.msra.mxu1 %v11360_v54 }
 0x1cd   :  { %1532 = vmatprep.subr.mxu0 %v11256_v18  ;;  %1684 = vmatprep.subr.mxu1 %v11364_v45  ;;  %v11405_v21 = vshrl.u32 %v13549_v44, 7  ;;  %v13550_v44 = vld [vmem:[#allocation22_spill] sm:$0xff] }
 0x1ce   :  { %1534 = vmatpush1.msra.mxu0 %v11263_v17  ;;  %1690 = vmatpush1.msra.mxu1 %v11368_v24 }
 0x1cf   :  { %1567 = vmatprep.mubr.f32.mxu0 %v13543_v12  ;;  %1723 = vmatprep.mubr.f32.mxu1 %v13543_v12  ;;  %v791_v53 = vsub.s32 0, %v11405_v21 }
 0x1d0   :  { %1749 = vmatprep.subr.mxu0 %v11061_v57  ;;  %1853 = vmatprep.subr.mxu1 %v11046_v47 }
 0x1d1   :  { %1573 = vmatmul.mubr.f32.vlgmr.msra.gmra.mxu0 %v13543_v12  ;;  %1725 = vmatmul.mubr.f32.vlgmr.msra.gmra.mxu1 %v13543_v12  ;;  %v11422_v62 = vrot.slane %v11412_v41, %v791_v53  ;;  %v13551_v53 = vld [vmem:[#allocation24_spill] sm:$0xff] }
 0x1d2   :  { %1752 = vmatpush1.msra.mxu0 %v11102_v23  ;;  %1855 = vmatpush1.msra.mxu1 %v11086_v1 }
 0x1d3   :  { %1755 = vmatprep.subr.mxu0 %v11110_v9  ;;  %1857 = vmatprep.subr.mxu1 %v11090_v3 }
 0x1d4   :  { %1758 = vmatpush1.msra.mxu0 %v11124_v19  ;;  %1859 = vmatpush1.msra.mxu1 %v11104_v6 }
 0x1d5   :  { %1761 = vmatprep.subr.mxu0 %v11136_v31  ;;  %1861 = vmatprep.subr.mxu1 %v11112_v10 }
 0x1d6   :  { %1764 = vmatpush1.msra.mxu0 %v11156_v27  ;;  %1863 = vmatpush1.msra.mxu1 %v11126_v16 }
 0x1d7   :  { %1767 = vmatprep.subr.mxu0 %v11180_v32  ;;  %1865 = vmatprep.subr.mxu1 %v11145_v8 }
 0x1d8   :  { %1770 = vmatpush1.msra.mxu0 %v11202_v42  ;;  %1867 = vmatpush1.msra.mxu1 %v11168_v28 }
 0x1d9   :  { %1773 = vmatprep.subr.mxu0 %v11222_v56  ;;  %1869 = vmatprep.subr.mxu1 %v11182_v33 }
 0x1da   :  { %1776 = vmatpush1.msra.mxu0 %v11233_v59  ;;  %1871 = vmatpush1.msra.mxu1 %v11195_v39 }
 0x1db   :  { %1779 = vmatprep.subr.mxu0 %v11247_v2  ;;  %1873 = vmatprep.subr.mxu1 %v11204_v43 }
 0x1dc   :  { %1782 = vmatpush1.msra.mxu0 %v11254_v5  ;;  %1875 = vmatpush1.msra.mxu1 %v11211_v50 }
 0x1dd   :  { %1785 = vmatprep.subr.mxu0 %v11272_v13  ;;  %1877 = vmatprep.subr.mxu1 %v11235_v61 }
 0x1de   :  { %1788 = vmatpush1.msra.mxu0 %v11283_v26  ;;  %1879 = vmatpush1.msra.mxu1 %v11249_v4 }
 0x1df   :  { %1791 = vmatprep.subr.mxu0 %v11291_v36  ;;  %1881 = vmatprep.subr.mxu1 %v11256_v18 }
 0x1e0   :  { %1794 = vmatpush1.msra.mxu0 %v11298_v46  ;;  %1827 = vmatprep.mubr.f32.mxu0 %v13543_v12 }
 0x1e1   :  { %1883 = vmatpush1.msra.mxu1 %v11263_v17  ;;  %1830 = vmatmul.mubr.f32.vlgmr.msra.gmra.mxu0 %v13543_v12 }
 0x1e2   :  { %1916 = vmatprep.mubr.f32.mxu1 %v13543_v12  ;;  %1945 = vmatprep.subr.mxu0 %v11072_v60 }
 0x1e3   :  { %2063 = vmatprep.subr.mxu1 %v11046_v47  ;;  %1920 = vmatmul.mubr.f32.vlgmr.msra.gmra.mxu1 %v13543_v12 }
 0x1e4   :  { %1949 = vmatpush1.msra.mxu0 %v11121_v14  ;;  %2065 = vmatpush1.msra.mxu1 %v11086_v1 }
 0x1e5   :  { %1953 = vmatprep.subr.mxu0 %v11133_v30  ;;  %2067 = vmatprep.subr.mxu1 %v11090_v3 }
 0x1e6   :  { %1957 = vmatpush1.msra.mxu0 %v11153_v15  ;;  %2069 = vmatpush1.msra.mxu1 %v11104_v6 }
 0x1e7   :  { %1961 = vmatprep.subr.mxu0 %v11166_v25  ;;  %2071 = vmatprep.subr.mxu1 %v11112_v10 }
 0x1e8   :  { %1965 = vmatpush1.msra.mxu0 %v11193_v38  ;;  %2073 = vmatpush1.msra.mxu1 %v11126_v16 }
 0x1e9   :  { %1969 = vmatprep.subr.mxu0 %v11219_v55  ;;  %2075 = vmatprep.subr.mxu1 %v11145_v8 }
 0x1ea   :  { %1973 = vmatpush1.msra.mxu0 %v11244_v0  ;;  %2077 = vmatpush1.msra.mxu1 %v11168_v28 }
 0x1eb   :  { %1977 = vmatprep.subr.mxu0 %v11261_v11  ;;  %2079 = vmatprep.subr.mxu1 %v11182_v33 }
 0x1ec   :  { %1981 = vmatpush1.msra.mxu0 %v11269_v22  ;;  %2081 = vmatpush1.msra.mxu1 %v11195_v39 }
 0x1ed   :  { %1985 = vmatprep.subr.mxu0 %v11280_v29  ;;  %2083 = vmatprep.subr.mxu1 %v11204_v43 }
 0x1ee   :  { %1989 = vmatpush1.msra.mxu0 %v11288_v34  ;;  %2085 = vmatpush1.msra.mxu1 %v11211_v50 }
 0x1ef   :  { %1993 = vmatprep.subr.mxu0 %v11307_v51  ;;  %2087 = vmatprep.subr.mxu1 %v11235_v61 }
 0x1f0   :  { %1997 = vmatpush1.msra.mxu0 %v11316_v48  ;;  %2089 = vmatpush1.msra.mxu1 %v11249_v4  ;;  %v13554_v48 = vld [vmem:[#allocation41_spill] sm:$0xff] }
 0x1f1   :  { %2001 = vmatprep.subr.mxu0 %v11323_v52  ;;  %2091 = vmatprep.subr.mxu1 %v11256_v18  ;;  %v13553_v52 = vld [vmem:[#allocation33_spill] sm:$0xff] }
 0x1f2   :  { %2005 = vmatpush1.msra.mxu0 %v11330_v49  ;;  %2038 = vmatprep.mubr.f32.mxu0 %v13543_v12  ;;  %v13552_v49 = vld [vmem:[#allocation26_spill] sm:$0xff] }
 0x1f3   :  { %2093 = vmatpush1.msra.mxu1 %v11263_v17  ;;  %2126 = vmatprep.mubr.f32.mxu1 %v13543_v12 }
 0x1f4   :  { %2040 = vmatmul.mubr.f32.vlgmr.msra.gmra.mxu0 %v13543_v12  ;;  %2128 = vmatmul.mubr.f32.vlgmr.msra.gmra.mxu1 %v13543_v12 }
 0x1f5   :  { %2305 = vmatprep.subr.mxu1 %v11107_v7  ;;  %2209 = vmatprep.subr.mxu0 %v11046_v47 }
 0x1f6   :  { %2311 = vmatpush1.msra.mxu1 %v11188_v35  ;;  %2211 = vmatpush1.msra.mxu0 %v11086_v1 }
 0x1f7   :  { %2317 = vmatprep.subr.mxu1 %v13550_v44  ;;  %2213 = vmatprep.subr.mxu0 %v11090_v3  ;;  %v13555_v44 = vld [vmem:[#allocation44_spill] sm:$0xff] }
 0x1f8   :  { %2323 = vmatpush1.msra.mxu1 %v13551_v53  ;;  %2215 = vmatpush1.msra.mxu0 %v11104_v6 }
 0x1f9   :  { %2329 = vmatprep.subr.mxu1 %v13552_v49  ;;  %2217 = vmatprep.subr.mxu0 %v11112_v10 }
 0x1fa   :  { %2335 = vmatpush1.msra.mxu1 %v13553_v52  ;;  %2219 = vmatpush1.msra.mxu0 %v11126_v16 }
 0x1fb   :  { %2341 = vmatprep.subr.mxu1 %v11302_v37  ;;  %2221 = vmatprep.subr.mxu0 %v11145_v8 }
 0x1fc   :  { %2347 = vmatpush1.msra.mxu1 %v13554_v48  ;;  %2223 = vmatpush1.msra.mxu0 %v11168_v28 }
 0x1fd   :  { %2353 = vmatprep.subr.mxu1 %v13555_v44  ;;  %2225 = vmatprep.subr.mxu0 %v11182_v33 }
 0x1fe   :  { %2359 = vmatpush1.msra.mxu1 %v11334_v20  ;;  %2428 = vmatprep.mubr.f32.mxu1 %v13543_v12 }
 0x1ff   :  { %2365 = vmatprep.subr.mxu1 %v11340_v63  ;;  %2227 = vmatpush1.msra.mxu0 %v11195_v39 }
 0x200   :  { %2371 = vmatpush1.msra.mxu1 %v11346_v40  ;;  %2229 = vmatprep.subr.mxu0 %v11204_v43 }
 0x201   :  { %2377 = vmatprep.subr.mxu1 %v11356_v58  ;;  %2231 = vmatpush1.msra.mxu0 %v11211_v50 }
 0x202   :  { %2383 = vmatpush1.msra.mxu1 %v11360_v54  ;;  %2233 = vmatprep.subr.mxu0 %v11235_v61 }
 0x203   :  { %2389 = vmatprep.subr.mxu1 %v11364_v45  ;;  %2235 = vmatpush1.msra.mxu0 %v11249_v4 }
 0x204   :  { %2395 = vmatpush1.msra.mxu1 %v11368_v24  ;;  %2237 = vmatprep.subr.mxu0 %v11256_v18  ;;  %v795_v24 = vsub.s32 1, %v11405_v21 }
 0x205   :  { %2558 = vmatprep.subr.mxu1 %v11046_v47  ;;  %2239 = vmatpush1.msra.mxu0 %v11263_v17 }
 0x206   :  { %2272 = vmatprep.mubr.f32.mxu0 %v13543_v12  ;;  %2454 = vmatprep.subr.mxu0 %v11061_v57  ;;  %v796_v51 = vrot.slane %v11412_v41, %v795_v24 }
 0x255   :  { %v1012_v58 = vpop.f32.mrf.mxu1 }
 0x257   :  { %v11502_v54 = vpop.f32.mrf.mxu1 }
 0x259   :  { %v1019_v40 = vpop.f32.mrf.mxu1 }
 0x25b   :  { %v1021_v63 = vpop.f32.mrf.mxu1 }
 0x25d   :  { %v887_v45 = vpop.f32.mrf.mxu0  ;;  %v1026_v20 = vpop.f32.mrf.mxu1 }
 0x25e   :  { %v888_v44 = vadd.f32 %v887_v45, %v11422_v62 }
 0x25f   :  { %v889_v48 = vpop.f32.mrf.mxu0  ;;  %v1028_v37 = vpop.f32.mrf.mxu1 }
 0x260   :  { %v1013_v52 = vadd.f32 %v1012_v58, %v888_v44 }
 0x261   :  { %v898_v49 = vpop.f32.mrf.mxu0  ;;  %v1033_v53 = vpop.f32.mrf.mxu1 }
 0x262   :  { %v899_v57 = vadd.f32 %v898_v49, %v11422_v62 }
 0x263   :  { %v900_v35 = vpop.f32.mrf.mxu0  ;;  %v1035_v34 = vpop.f32.mrf.mxu1 }
 0x264   :  { %v901_v7 = vadd.f32 %v900_v35, %v796_v51  ;;  %v1020_v29 = vadd.f32 %v1019_v40, %v899_v57 }
 0x265   :  { %v909_v22 = vpop.f32.mrf.mxu0  ;;  %v1216_v11 = vpop.f32.mrf.mxu1 }
 0x266   :  { %v910_v0 = vadd.f32 %v909_v22, %v11422_v62  ;;  %v1022_v45 = vadd.f32 %v1021_v63, %v901_v7 }
 0x267   :  { %v911_v55 = vpop.f32.mrf.mxu0  ;;  %v1218_v21 = vpop.f32.mrf.mxu1 }
 0x268   :  { %v912_v38 = vadd.f32 %v911_v55, %v796_v51  ;;  %v1027_v25 = vadd.f32 %v1026_v20, %v910_v0 }
 0x269   :  { %v920_v58 = vpop.f32.mrf.mxu0  ;;  %v1225_v44 = vpop.f32.mrf.mxu1 }
 0x26a   :  { %v921_v15 = vadd.f32 %v920_v58, %v11422_v62  ;;  %v1029_v24 = vadd.f32 %v1028_v37, %v912_v38 }
 0x26b   :  { %v922_v41 = vpop.f32.mrf.mxu0  ;;  %v1227_v49 = vpop.f32.mrf.mxu1 }
 0x26c   :  { %v1034_v30 = vadd.f32 %v1033_v53, %v921_v15 }
 0x26d   :  { %v1114_v14 = vpop.f32.mrf.mxu0  ;;  %v1234_v35 = vpop.f32.mrf.mxu1 }
 0x26e   :  { %v1115_v57 = vadd.f32 %v1114_v14, %v1013_v52 }
 0x26f   :  { %v1116_v40 = vpop.f32.mrf.mxu0  ;;  %v1236_v60 = vpop.f32.mrf.mxu1 }
 0x270   :  { %v1217_v46 = vadd.f32 %v1216_v11, %v1115_v57  ;;  %v890_v57 = vadd.f32 %v889_v48, %v796_v51 }
 0x271   :  { %v1122_v22 = vpop.f32.mrf.mxu0  ;;  %v1243_v7 = vpop.f32.mrf.mxu1 }
 0x272   :  { %v1123_v63 = vadd.f32 %v1122_v22, %v1020_v29 }
 0x273   :  { %v1124_v36 = vpop.f32.mrf.mxu0  ;;  %v1245_v55 = vpop.f32.mrf.mxu1 }
 0x274   :  { %v1125_v0 = vadd.f32 %v1124_v36, %v1022_v45  ;;  %v1226_v20 = vadd.f32 %v1225_v44, %v1123_v63  ;;  %v1015_v45 = vadd.f32 %v11502_v54, %v890_v57 }
 0x275   :  { %v1130_v26 = vpop.f32.mrf.mxu0  ;;  %v1424_v13 = vpop.f32.mrf.mxu1 }
 0x276   :  { %v1131_v62 = vadd.f32 %v1130_v26, %v1027_v25  ;;  %v1228_v38 = vadd.f32 %v1227_v49, %v1125_v0  ;;  %v923_v26 = vadd.f32 %v922_v41, %v796_v51  ;;  %v1117_v49 = vadd.f32 %v1116_v40, %v1015_v45 }
 0x277   :  { %v1132_v37 = vpop.f32.mrf.mxu0  ;;  %v1426_v58 = vpop.f32.mrf.mxu1 }
 0x278   :  { %v1133_v15 = vadd.f32 %v1132_v37, %v1029_v24  ;;  %v1235_v53 = vadd.f32 %v1234_v35, %v1131_v62  ;;  %v13556_v24 = vld [vmem:[#allocation11_spill] sm:$0xff]  ;;  %v1219_v62 = vadd.f32 %v1218_v21, %v1117_v49 }
 0x279   :  { %v1138_v5 = vpop.f32.mrf.mxu0  ;;  %v1431_v2 = vpop.f32.mrf.mxu1  ;;  %v1450_v35 = vadd.s32 128, %v13556_v24  ;;  %v1451_v48 = vand.u32 32, %v13556_v24  ;;  %v13597_v24 = vld [vmem:[#allocation33_spill] sm:$0xff] }
 0x27a   :  { %v1139_v52 = vadd.f32 %v1138_v5, %v1034_v30  ;;  %v1237_v14 = vadd.f32 %v1236_v60, %v1133_v15 }
 0x27b   :  { %v1140_v11 = vpop.f32.mrf.mxu0  ;;  %v1433_v47 = vpop.f32.mrf.mxu1  ;;  %v1452_v15 = vand.u32 32, %v1450_v35  ;;  %vm11513_vm7 = vcmp.eq.s32.totalorder %v1451_v48, 0 }
 0x27c   :  { %v1244_v59 = vadd.f32 %v1243_v7, %v1139_v52  ;;  %v1036_v7 = vadd.f32 %v1035_v34, %v923_v26 }
 0x27d   :  { %v1327_v29 = vpop.f32.mrf.mxu0  ;;  %v1438_v0 = vpop.f32.mrf.mxu1  ;;  %vm11517_vm8 = vcmp.eq.s32.totalorder %v1452_v15, 0 }
 0x27e   :  { %v1328_v22 = vadd.f32 %v1327_v29, %v1217_v46 }
 0x27f   :  { %v1329_v36 = vpop.f32.mrf.mxu0  ;;  %v1440_v52 = vpop.f32.mrf.mxu1 }
 0x280   :  { %v1425_v44 = vadd.f32 %v1424_v13, %v1328_v22  ;;  %v1141_v13 = vadd.f32 %v1140_v11, %v1036_v7  ;;  %v1330_v57 = vadd.f32 %v1329_v36, %v1219_v62 }
 0x281   :  { %v1334_v25 = vpop.f32.mrf.mxu0 }
 0x282   :  { %v1335_v63 = vadd.f32 %v1334_v25, %v1226_v20  ;;  %v1445_v34 = vpop.f32.mrf.mxu1  ;;  %v1427_v11 = vadd.f32 %v1426_v58, %v1330_v57  ;;  %v1246_v45 = vadd.f32 %v1245_v55, %v1141_v13 }
 0x283   :  { %v1336_v30 = vpop.f32.mrf.mxu0 }
 0x284   :  { %v1432_v60 = vadd.f32 %v1431_v2, %v1335_v63  ;;  %v1337_v5 = vadd.f32 %v1336_v30, %v1228_v38  ;;  %v5714_v63 = vrot.slane %v1425_v44, 4  ;;  %v1447_v30 = vpop.f32.mrf.mxu1 }
 0x286   :  { %v1434_v46 = vadd.f32 %v1433_v47, %v1337_v5  ;;  %v1341_v37 = vpop.f32.mrf.mxu0  ;;  %v4302_v40 = vrot.slane %v1432_v60, 4 }
 0x287   :  { %v1342_v54 = vadd.f32 %v1341_v37, %v1235_v53 }
 0x288   :  { %v1343_v51 = vpop.f32.mrf.mxu0  ;;  %v4303_v47 = vrot.slane %v1434_v46, 4 }
 0x289   :  { %v1439_v20 = vadd.f32 %v1438_v0, %v1342_v54  ;;  %v1344_v2 = vadd.f32 %v1343_v51, %v1237_v14 }
 0x28b   :  { %v2890_v21 = vrot.slane %v1439_v20, 4  ;;  %v1441_v29 = vadd.f32 %v1440_v52, %v1344_v2  ;;  %v1348_v22 = vpop.f32.mrf.mxu0  ;;  %v11523_v53 = vsel %vm11513_vm7, %v1439_v20, %v4302_v40 }
 0x28c   :  { %13561 = vst [vmem:[#allocation53_spill] sm:$0xff] %v11523_v53  ;;  %v1349_v36 = vadd.f32 %v1348_v22, %v1244_v59  ;;  %v5715_v59 = vrot.slane %v1427_v11, 4  ;;  %v13601_v53 = vld [vmem:[#allocation46_spill] sm:$0xff] }
 0x28d   :  { %v2891_v25 = vrot.slane %v1441_v29, 4  ;;  %v1350_v26 = vpop.f32.mrf.mxu0  ;;  %v11527_v14 = vsel %vm11513_vm7, %v1432_v60, %v2890_v21  ;;  %v11531_v49 = vsel %vm11517_vm8, %v1441_v29, %v4303_v47 }
 0x28e   :  { %13562 = vst [vmem:[#allocation54_spill] sm:$0xff] %v11527_v14  ;;  %13563 = vst [vmem:[#allocation55_spill] sm:$0xff] %v11531_v49  ;;  %v1446_v35 = vadd.f32 %v1445_v34, %v1349_v36  ;;  %v1351_v0 = vadd.f32 %v1350_v26, %v1246_v45  ;;  %v13600_v49 = vld [vmem:[#allocation44_spill] sm:$0xff] }
 0x28f   :  { %v11535_v5 = vsel %vm11517_vm8, %v1434_v46, %v2891_v25  ;;  %v13603_v14 = vld [vmem:[#allocation48_spill] sm:$0xff] }
 0x290   :  { %13564 = vst [vmem:[#allocation56_spill] sm:$0xff] %v11535_v5  ;;  %v1477_v55 = vrot.slane %v1446_v35, 4  ;;  %v1448_v58 = vadd.f32 %v1447_v30, %v1351_v0  ;;  %v11539_v48 = vsel %vm11513_vm7, %v1446_v35, %v5714_v63  ;;  %v13602_v5 = vld [vmem:[#allocation47_spill] sm:$0xff] }
 0x291   :  { %13565 = vst [vmem:[#allocation57_spill] sm:$0xff] %v11539_v48  ;;  %v1574_v7 = vpop.f32.mrf.mxu0  ;;  %v1726_v46 = vpop.f32.mrf.mxu1  ;;  %v13599_v48 = vld [vmem:[#allocation41_spill] sm:$0xff] }
 0x292   :  { %v11543_v60 = vsel %vm11513_vm7, %v1425_v44, %v1477_v55  ;;  %v11547_v62 = vsel %vm11517_vm8, %v1448_v58, %v5715_v59  ;;  %v1478_v40 = vrot.slane %v1448_v58, 4 }
 0x293   :  { %13566 = vst [vmem:[#allocation58_spill] sm:$0xff] %v11547_v62  ;;  %v1575_v37 = vadd.f32 %v1574_v7, %v11543_v60  ;;  %v1576_v52 = vpop.f32.mrf.mxu0  ;;  %v1728_v54 = vpop.f32.mrf.mxu1  ;;  %v13598_v62 = vld [vmem:[#allocation39_spill] sm:$0xff] }
 0x294   :  { %v11552_v44 = vsel %vm11517_vm8, %v1427_v11, %v1478_v40 }
 0x295   :  { %v1727_v15 = vadd.f32 %v1726_v46, %v1575_v37  ;;  %v1577_v41 = vadd.f32 %v1576_v52, %v11552_v44 }
 0x297   :  { %v1729_v34 = vadd.f32 %v1728_v54, %v1577_v41 }
 0x2a1   :  { %v1831_v13 = vpop.f32.mrf.mxu0 }
 0x2a2   :  { %v1832_v57 = vadd.f32 %v1831_v13, %v1727_v15 }
 0x2a3   :  { %v1921_v51 = vpop.f32.mrf.mxu1  ;;  %v1833_v2 = vpop.f32.mrf.mxu0 }
 0x2a4   :  { %v1922_v20 = vadd.f32 %v1921_v51, %v1832_v57  ;;  %v1834_v47 = vadd.f32 %v1833_v2, %v1729_v34 }
 0x2a5   :  { %v1923_v21 = vpop.f32.mrf.mxu1 }
 0x2a6   :  { %v1924_v36 = vadd.f32 %v1923_v21, %v1834_v47 }
 0x2b4   :  { %v2041_v29 = vpop.f32.mrf.mxu0  ;;  %v2129_v22 = vpop.f32.mrf.mxu1 }
 0x2b5   :  { %v2042_v45 = vadd.f32 %v2041_v29, %v1922_v20 }
 0x2b6   :  { %v2043_v25 = vpop.f32.mrf.mxu0  ;;  %v2131_v35 = vpop.f32.mrf.mxu1 }
 0x2b7   :  { %v2130_v26 = vadd.f32 %v2129_v22, %v2042_v45  ;;  %v2044_v63 = vadd.f32 %v2043_v25, %v1924_v36  ;;  %v13568_v22 = vld [vmem:[#allocation12_spill] sm:$0xff]  ;;  %v13569_v36 = vld [vmem:[#allocation25_spill] sm:$0xff] }
 0x2b8   :  { %v13570_v45 = vld [vmem:[#allocation28_spill] sm:$0xff]  ;;  %v13571_v25 = vld [vmem:[#allocation29_spill] sm:$0xff] }
 0x2b9   :  { %v2132_v0 = vadd.f32 %v2131_v35, %v2044_v63  ;;  %v9450_v38 = vmul.f32 -1.442695, %v2130_v26  ;;  %v13572_v26 = vld [vmem:[#allocation32_spill] sm:$0xff]  ;;  %v13573_v63 = vld [vmem:[#allocation35_spill] sm:$0xff]  ;;  %v13574_v35 = vld [vmem:[#allocation37_spill] sm:$0xff] }
 0x2bb   :  { %10486 = vtanh.f32 %v2132_v0  ;;  %v9451_v54 = vmul.f32 -1.442695, %v2132_v0  ;;  %v13575_v0 = vld [vmem:[#allocation38_spill] sm:$0xff] }
 0x2bc   :  { %10488 = vpow2.f32 %v9450_v38  ;;  %v13577_v38 = vld [vmem:[#allocation16_spill] sm:$0xff] }
 0x2c8   :  { %v10487_v30 = vpop.eup %10486 }
 0x2c9   :  { %2149 = vrot.lane.b32.xlu0 %v10487_v30, %s10656_s5  ;;  %v10489_v11 = vpop.eup %10488  ;;  %v13576_v30 = vld [vmem:[#allocation14_spill] sm:$0xff] }
 0x2ca   :  { %v2137_v59 = vadd.f32 1.0, %v10489_v11  ;;  %v13578_v11 = vld [vmem:[#allocation17_spill] sm:$0xff] }
 0x2cc   :  { %10490 = vrcp.f32 %v2137_v59  ;;  %v13579_v59 = vld [vmem:[#allocation18_spill] sm:$0xff] }
 0x2d9   :  { %v10491_v55 = vpop.eup %10490 }
 0x2da   :  { %v2147_v37 = vmul.f32 0.0, %v10491_v55 }
 0x33b   :  { %v2150_v58 = vpop.permute.xlu0 %2149 }
 0x33c   :  { %v2152_v7 = vmul.f32 %v10491_v55, %v2150_v58  ;;  %v13580_v55 = vld [vmem:[#allocation19_spill] sm:$0xff]  ;;  %v13581_v58 = vld [vmem:[#allocation21_spill] sm:$0xff] }
 0x33e   :  { %2154 = vrot.lane.b32.xlu1 %v2152_v7, %s10656_s5  ;;  %v13582_v7 = vld [vmem:[#allocation23_spill] sm:$0xff] }
 0x3b0   :  { %v2155_v46 = vpop.permute.xlu1 %2154 }
 0x3b1   :  { %v11557_v15 = vadd.f32 %v2155_v46, %v2147_v37  ;;  %v13583_v37 = vld [vmem:[#allocation27_spill] sm:$0xff]  ;;  %v13584_v46 = vld [vmem:[#allocation30_spill] sm:$0xff] }
 0x3b3   :  { %10492 = vtanh.f32 %v11557_v15 }
 0x3b4   :  { %10494 = vpow2.f32 %v9451_v54  ;;  %v13586_v54 = vld [vmem:[#allocation34_spill] sm:$0xff] }
 0x3c0   :  { %v10493_v52 = vpop.eup %10492 }
 0x3c1   :  { %2160 = vrot.lane.b32.xlu0 %v10493_v52, %s10656_s5  ;;  %v10495_v13 = vpop.eup %10494  ;;  %v13585_v52 = vld [vmem:[#allocation31_spill] sm:$0xff] }
 0x3c2   :  { %v2143_v57 = vadd.f32 1.0, %v10495_v13  ;;  %v13587_v13 = vld [vmem:[#allocation15_spill] sm:$0xff] }
 0x3c4   :  { %10496 = vrcp.f32 %v2143_v57  ;;  %v13588_v57 = vld [vmem:[#allocation36_spill] sm:$0xff] }
 0x3d1   :  { %v10497_v51 = vpop.eup %10496 }
 0x433   :  { %v2161_v40 = vpop.permute.xlu0 %2160 }
 0x434   :  { %v11561_v20 = vmul.f32 %v10497_v51, %v2161_v40  ;;  %v13589_v51 = vld [vmem:[#allocation20_spill] sm:$0xff] }
 0x435   :  { %v13590_v40 = vld [vmem:[#allocation40_spill] sm:$0xff] }
 0x436   :  { %13567 = vst [vmem:[#allocation59_spill] sm:$0xff] %v11561_v20  ;;  %v2190_v41 = vsel %vm1483_vm9, %v11561_v20, 0  ;;  %v13596_v20 = vld [vmem:[#allocation45_spill] sm:$0xff] }
 0x437   :  { %v11565_v2 = vand.u32 4294901760, %v2190_v41 }
 0x439   :  { %v2274_v34 = vsub.f32 %v2190_v41, %v11565_v2  ;;  %2430 = vmatmul.mubr.f32.vlgmr.msra.gmra.mxu1 %v11565_v2  ;;  %v13591_v41 = vld [vmem:[#allocation22_spill] sm:$0xff] }
 0x43a   :  { %2560 = vmatpush1.msra.mxu1 %v11086_v1  ;;  %2621 = vmatprep.mubr.f32.mxu1 %v13543_v12 }
 0x43b   :  { %v2275_v47 = vand.u32 4294901760, %v2274_v34  ;;  %2562 = vmatprep.subr.mxu1 %v11090_v3 }
 0x43c   :  { %2564 = vmatpush1.msra.mxu1 %v11104_v6 }
 0x43d   :  { %2566 = vmatprep.subr.mxu1 %v11112_v10  ;;  %v2276_v21 = vsub.f32 %v2274_v34, %v2275_v47 }
 0x43e   :  { %2568 = vmatpush1.msra.mxu1 %v11126_v16 }
 0x43f   :  { %2570 = vmatprep.subr.mxu1 %v11145_v8  ;;  %v2277_v29 = vand.u32 4294901760, %v2276_v21  ;;  %v13594_v21 = vld [vmem:[#allocation43_spill] sm:$0xff] }
 0x440   :  { %2572 = vmatpush1.msra.mxu1 %v11168_v28 }
 0x441   :  { %2574 = vmatprep.subr.mxu1 %v11182_v33  ;;  %2278 = vmatmul.mubr.f32.vlgmr.msra.gmra.mxu0 %v2277_v29  ;;  %v13595_v29 = vld [vmem:[#allocation26_spill] sm:$0xff] }
 0x442   :  { %2457 = vmatpush1.msra.mxu0 %v11102_v23  ;;  %2576 = vmatpush1.msra.mxu1 %v11195_v39 }
 0x443   :  { %2460 = vmatprep.subr.mxu0 %v11110_v9  ;;  %2578 = vmatprep.subr.mxu1 %v11204_v43 }
 0x444   :  { %2463 = vmatpush1.msra.mxu0 %v11124_v19  ;;  %2580 = vmatpush1.msra.mxu1 %v11211_v50 }
 0x445   :  { %2466 = vmatprep.subr.mxu0 %v11136_v31  ;;  %2582 = vmatprep.subr.mxu1 %v11235_v61 }
 0x446   :  { %2469 = vmatpush1.msra.mxu0 %v11156_v27  ;;  %2584 = vmatpush1.msra.mxu1 %v11249_v4 }
 0x447   :  { %2472 = vmatprep.subr.mxu0 %v11180_v32  ;;  %2586 = vmatprep.subr.mxu1 %v11256_v18 }
 0x448   :  { %2475 = vmatpush1.msra.mxu0 %v11202_v42  ;;  %2588 = vmatpush1.msra.mxu1 %v11263_v17 }
 0x449   :  { %2478 = vmatprep.subr.mxu0 %v11222_v56  ;;  %2625 = vmatmul.mubr.f32.vlgmr.msra.gmra.mxu1 %v2275_v47  ;;  %v13593_v47 = vld [vmem:[#allocation24_spill] sm:$0xff] }
 0x44a   :  { %2768 = vmatprep.subr.mxu1 %v13568_v22  ;;  %2481 = vmatpush1.msra.mxu0 %v13569_v36 }
 0x44b   :  { %2770 = vmatpush1.msra.mxu1 %v11086_v1  ;;  %2484 = vmatprep.subr.mxu0 %v13570_v45 }
 0x44c   :  { %2772 = vmatprep.subr.mxu1 %v11090_v3  ;;  %2487 = vmatpush1.msra.mxu0 %v13571_v25 }
 0x44d   :  { %2774 = vmatpush1.msra.mxu1 %v11104_v6  ;;  %2490 = vmatprep.subr.mxu0 %v13572_v26 }
 0x44e   :  { %2776 = vmatprep.subr.mxu1 %v11112_v10  ;;  %2493 = vmatpush1.msra.mxu0 %v13573_v63 }
 0x44f   :  { %2778 = vmatpush1.msra.mxu1 %v11126_v16  ;;  %2496 = vmatprep.subr.mxu0 %v13574_v35 }
 0x450   :  { %2780 = vmatprep.subr.mxu1 %v11145_v8  ;;  %2499 = vmatpush1.msra.mxu0 %v13575_v0 }
 0x451   :  { %2532 = vmatprep.mubr.f32.mxu0 %v13543_v12  ;;  %2782 = vmatpush1.msra.mxu1 %v11168_v28 }
 0x452   :  { %2535 = vmatmul.mubr.f32.vlgmr.msra.gmra.mxu0 %v2274_v34  ;;  %2650 = vmatprep.subr.mxu0 %v13576_v30  ;;  %v13592_v34 = vld [vmem:[#allocation42_spill] sm:$0xff] }
 0x453   :  { %2784 = vmatprep.subr.mxu1 %v11182_v33  ;;  %2654 = vmatpush1.msra.mxu0 %v13577_v38 }
 0x454   :  { %2786 = vmatpush1.msra.mxu1 %v11195_v39  ;;  %2658 = vmatprep.subr.mxu0 %v13578_v11 }
 0x455   :  { %2788 = vmatprep.subr.mxu1 %v11204_v43  ;;  %2662 = vmatpush1.msra.mxu0 %v13579_v59 }
 0x456   :  { %2790 = vmatpush1.msra.mxu1 %v11211_v50  ;;  %2666 = vmatprep.subr.mxu0 %v13580_v55 }
 0x457   :  { %2792 = vmatprep.subr.mxu1 %v11235_v61  ;;  %2670 = vmatpush1.msra.mxu0 %v13581_v58 }
 0x458   :  { %2794 = vmatpush1.msra.mxu1 %v11249_v4  ;;  %2674 = vmatprep.subr.mxu0 %v13582_v7 }
 0x459   :  { %2796 = vmatprep.subr.mxu1 %v11256_v18  ;;  %2678 = vmatpush1.msra.mxu0 %v13583_v37 }
 0x45a   :  { %2798 = vmatpush1.msra.mxu1 %v11263_v17  ;;  %2831 = vmatprep.mubr.f32.mxu1 %v13543_v12 }
 0x45b   :  { %2682 = vmatprep.subr.mxu0 %v13584_v46  ;;  %2833 = vmatmul.mubr.f32.vlgmr.msra.gmra.mxu1 %v11565_v2 }
 0x45c   :  { %2686 = vmatpush1.msra.mxu0 %v13585_v52  ;;  %2743 = vmatprep.mubr.f32.mxu0 %v13543_v12 }
 0x45d   :  { %2690 = vmatprep.subr.mxu0 %v13586_v54  ;;  %3012 = vmatprep.subr.mxu1 %v13587_v13 }
 0x45e   :  { %2694 = vmatpush1.msra.mxu0 %v13588_v57  ;;  %3018 = vmatpush1.msra.mxu1 %v13589_v51 }
 0x45f   :  { %2698 = vmatprep.subr.mxu0 %v13590_v40  ;;  %3024 = vmatprep.subr.mxu1 %v13591_v41 }
 0x460   :  { %2702 = vmatpush1.msra.mxu0 %v13592_v34  ;;  %3030 = vmatpush1.msra.mxu1 %v13593_v47  ;;  %v2186_v34 = vrot.slane %v11552_v44, 4 }
 0x461   :  { %2706 = vmatprep.subr.mxu0 %v13594_v21  ;;  %3036 = vmatprep.subr.mxu1 %v13595_v29 }
 0x462   :  { %2710 = vmatpush1.msra.mxu0 %v13596_v20  ;;  %3042 = vmatpush1.msra.mxu1 %v13597_v24 }
 0x463   :  { %2745 = vmatmul.mubr.f32.vlgmr.msra.gmra.mxu0 %v11565_v2  ;;  %3048 = vmatprep.subr.mxu1 %v13598_v62  ;;  %v13604_v2 = vld [vmem:[#allocation49_spill] sm:$0xff] }
 0x464   :  { %3054 = vmatpush1.msra.mxu1 %v13599_v48  ;;  %2916 = vmatprep.subr.mxu0 %v13568_v22  ;;  %v13605_v48 = vld [vmem:[#allocation50_spill] sm:$0xff] }
 0x465   :  { %3060 = vmatprep.subr.mxu1 %v13600_v49  ;;  %2918 = vmatpush1.msra.mxu0 %v11086_v1  ;;  %v13606_v49 = vld [vmem:[#allocation51_spill] sm:$0xff] }
 0x466   :  { %3066 = vmatpush1.msra.mxu1 %v13601_v53  ;;  %2920 = vmatprep.subr.mxu0 %v11090_v3  ;;  %v13607_v53 = vld [vmem:[#allocation52_spill] sm:$0xff] }
 0x467   :  { %3072 = vmatprep.subr.mxu1 %v13602_v5  ;;  %2922 = vmatpush1.msra.mxu0 %v11104_v6 }
 0x468   :  { %3078 = vmatpush1.msra.mxu1 %v13603_v14  ;;  %2924 = vmatprep.subr.mxu0 %v11112_v10 }
 0x469   :  { %3084 = vmatprep.subr.mxu1 %v13604_v2  ;;  %2926 = vmatpush1.msra.mxu0 %v11126_v16 }
 0x46a   :  { %3090 = vmatpush1.msra.mxu1 %v13605_v48  ;;  %2928 = vmatprep.subr.mxu0 %v11145_v8 }
 0x46b   :  { %3096 = vmatprep.subr.mxu1 %v13606_v49  ;;  %2930 = vmatpush1.msra.mxu0 %v11168_v28  ;;  %v2185_v49 = vrot.slane %v11543_v60, 4 }
 0x46c   :  { %3102 = vmatpush1.msra.mxu1 %v13607_v53  ;;  %2932 = vmatprep.subr.mxu0 %v11182_v33  ;;  %v13608_v53 = vld [vmem:[#allocation13_spill] sm:$0xff] }
 0x46d   :  { %3135 = vmatprep.mubr.f32.mxu1 %v13543_v12  ;;  %3265 = vmatprep.subr.mxu1 %v13568_v22 }
 0x46e   :  { %2934 = vmatpush1.msra.mxu0 %v11195_v39  ;;  %2979 = vmatprep.mubr.f32.mxu0 %v13543_v12 }
 0x46f   :  { %2936 = vmatprep.subr.mxu0 %v11204_v43 }
 0x470   :  { %2938 = vmatpush1.msra.mxu0 %v11211_v50 }
 0x471   :  { %2940 = vmatprep.subr.mxu0 %v11235_v61 }
 0x472   :  { %2942 = vmatpush1.msra.mxu0 %v11249_v4 }
 0x473   :  { %2944 = vmatprep.subr.mxu0 %v11256_v18 }
 0x474   :  { %2946 = vmatpush1.msra.mxu0 %v11263_v17 }
 0x475   :  { %3161 = vmatprep.subr.mxu0 %v13608_v53 }
 0x4f9   :  { %v2431_v14 = vpop.f32.mrf.mxu1 }
 0x4fb   :  { %v2433_v24 = vpop.f32.mrf.mxu1 }
 0x501   :  { %v2279_v48 = vpop.f32.mrf.mxu0 }
 0x502   :  { %v2280_v2 = vadd.f32 %v2279_v48, %v2185_v49 }
 0x503   :  { %v2281_v62 = vpop.f32.mrf.mxu0 }
 0x504   :  { %v2432_v5 = vadd.f32 %v2431_v14, %v2280_v2  ;;  %v2282_v41 = vadd.f32 %v2281_v62, %v2186_v34 }
 0x506   :  { %v2434_v51 = vadd.f32 %v2433_v24, %v2282_v41 }
 0x509   :  { %v2626_v21 = vpop.f32.mrf.mxu1 }
 0x50b   :  { %v2628_v13 = vpop.f32.mrf.mxu1 }
 0x512   :  { %v2536_v20 = vpop.f32.mrf.mxu0 }
 0x513   :  { %v2537_v29 = vadd.f32 %v2536_v20, %v2432_v5 }
 0x514   :  { %v2538_v40 = vpop.f32.mrf.mxu0 }
 0x515   :  { %v2627_v47 = vadd.f32 %v2626_v21, %v2537_v29  ;;  %v2539_v57 = vadd.f32 %v2538_v40, %v2434_v51 }
 0x517   :  { %v2629_v52 = vadd.f32 %v2628_v13, %v2539_v57 }
 0x51b   :  { %v2834_v53 = vpop.f32.mrf.mxu1 }
 0x51d   :  { %v2836_v2 = vpop.f32.mrf.mxu1 }
 0x523   :  { %v2746_v54 = vpop.f32.mrf.mxu0 }
 0x524   :  { %v2747_v60 = vadd.f32 %v2746_v54, %v2627_v47 }
 0x525   :  { %v2748_v49 = vpop.f32.mrf.mxu0 }
 0x526   :  { %v2835_v48 = vadd.f32 %v2834_v53, %v2747_v60  ;;  %v2749_v14 = vadd.f32 %v2748_v49, %v2629_v52 }
 0x528   :  { %v2837_v46 = vadd.f32 %v2836_v2, %v2749_v14  ;;  %v9454_v20 = vmul.f32 -1.442695, %v2835_v48  ;;  %v13610_v2 = vld [vmem:[#allocation30_spill] sm:$0xff] }
 0x52a   :  { %10498 = vtanh.f32 %v2837_v46  ;;  %v9455_v57 = vmul.f32 -1.442695, %v2837_v46 }
 0x52b   :  { %10500 = vpow2.f32 %v9454_v20  ;;  %v13612_v20 = vld [vmem:[#allocation34_spill] sm:$0xff] }
 0x537   :  { %v10499_v5 = vpop.eup %10498 }
 0x538   :  { %2854 = vrot.lane.b32.xlu1 %v10499_v5, %s10656_s5  ;;  %v10501_v62 = vpop.eup %10500  ;;  %v13611_v5 = vld [vmem:[#allocation31_spill] sm:$0xff] }
 0x539   :  { %v2842_v44 = vadd.f32 1.0, %v10501_v62  ;;  %v13613_v62 = vld [vmem:[#allocation15_spill] sm:$0xff] }
 0x53b   :  { %10502 = vrcp.f32 %v2842_v44  ;;  %v13614_v44 = vld [vmem:[#allocation36_spill] sm:$0xff] }
 0x548   :  { %v10503_v24 = vpop.eup %10502 }
 0x549   :  { %v2852_v54 = vmul.f32 %v10503_v24, %v11557_v15 }
 0x5aa   :  { %v2855_v51 = vpop.permute.xlu1 %2854 }
 0x5ab   :  { %v2857_v40 = vmul.f32 %v10503_v24, %v2855_v51  ;;  %v13615_v24 = vld [vmem:[#allocation20_spill] sm:$0xff] }
 0x5ac   :  { %v13616_v51 = vld [vmem:[#allocation40_spill] sm:$0xff] }
 0x5ad   :  { %2859 = vrot.lane.b32.xlu0 %v2857_v40, %s10656_s5  ;;  %v13617_v40 = vld [vmem:[#allocation22_spill] sm:$0xff] }
 0x61f   :  { %v2860_v53 = vpop.permute.xlu0 %2859 }
 0x620   :  { %v11678_v52 = vadd.f32 %v2860_v53, %v2852_v54  ;;  %v13618_v54 = vld [vmem:[#allocation42_spill] sm:$0xff]  ;;  %v13619_v53 = vld [vmem:[#allocation24_spill] sm:$0xff] }
 0x622   :  { %10504 = vtanh.f32 %v11678_v52 }
 0x623   :  { %10506 = vpow2.f32 %v9455_v57  ;;  %v13621_v57 = vld [vmem:[#allocation26_spill] sm:$0xff] }
 0x62f   :  { %v10505_v13 = vpop.eup %10504 }
 0x630   :  { %2865 = vrot.lane.b32.xlu1 %v10505_v13, %s10656_s5  ;;  %v10507_v41 = vpop.eup %10506  ;;  %v13620_v13 = vld [vmem:[#allocation43_spill] sm:$0xff] }
 0x631   :  { %v2848_v34 = vadd.f32 1.0, %v10507_v41  ;;  %v13622_v41 = vld [vmem:[#allocation45_spill] sm:$0xff] }
 0x633   :  { %10508 = vrcp.f32 %v2848_v34  ;;  %v13623_v34 = vld [vmem:[#allocation33_spill] sm:$0xff] }
 0x640   :  { %v10509_v47 = vpop.eup %10508 }
 0x6a2   :  { %v2866_v21 = vpop.permute.xlu1 %2865 }
 0x6a3   :  { %v11682_v29 = vmul.f32 %v10509_v47, %v2866_v21  ;;  %v13624_v47 = vld [vmem:[#allocation39_spill] sm:$0xff]  ;;  %v13625_v21 = vld [vmem:[#allocation41_spill] sm:$0xff] }
 0x6a5   :  { %13609 = vst [vmem:[#allocation12_spill] sm:$0xff] %v11682_v29  ;;  %v2897_v15 = vsel %vm1483_vm9, %v11682_v29, 0  ;;  %v13632_v29 = vld [vmem:[#allocation51_spill] sm:$0xff] }
 0x6a6   :  { %v11686_v60 = vand.u32 4294901760, %v2897_v15 }
 0x6a8   :  { %v2981_v49 = vsub.f32 %v2897_v15, %v11686_v60  ;;  %3137 = vmatmul.mubr.f32.vlgmr.msra.gmra.mxu1 %v11686_v60  ;;  %v13626_v15 = vld [vmem:[#allocation44_spill] sm:$0xff] }
 0x6a9   :  { %3267 = vmatpush1.msra.mxu1 %v11086_v1  ;;  %3328 = vmatprep.mubr.f32.mxu1 %v13543_v12 }
 0x6aa   :  { %v2982_v46 = vand.u32 4294901760, %v2981_v49  ;;  %3269 = vmatprep.subr.mxu1 %v11090_v3 }
 0x6ab   :  { %3271 = vmatpush1.msra.mxu1 %v11104_v6 }
 0x6ac   :  { %3273 = vmatprep.subr.mxu1 %v11112_v10  ;;  %v2983_v48 = vsub.f32 %v2981_v49, %v2982_v46 }
 0x6ad   :  { %3275 = vmatpush1.msra.mxu1 %v11126_v16 }
 0x6ae   :  { %3277 = vmatprep.subr.mxu1 %v11145_v8  ;;  %v2984_v14 = vand.u32 4294901760, %v2983_v48  ;;  %v13629_v48 = vld [vmem:[#allocation48_spill] sm:$0xff] }
 0x6af   :  { %3279 = vmatpush1.msra.mxu1 %v11168_v28 }
 0x6b0   :  { %3281 = vmatprep.subr.mxu1 %v11182_v33  ;;  %2985 = vmatmul.mubr.f32.vlgmr.msra.gmra.mxu0 %v2984_v14  ;;  %v13631_v14 = vld [vmem:[#allocation50_spill] sm:$0xff] }
 0x6b1   :  { %3164 = vmatpush1.msra.mxu0 %v11102_v23  ;;  %3283 = vmatpush1.msra.mxu1 %v11195_v39 }
 0x6b2   :  { %3167 = vmatprep.subr.mxu0 %v11110_v9  ;;  %3285 = vmatprep.subr.mxu1 %v11204_v43 }
 0x6b3   :  { %3170 = vmatpush1.msra.mxu0 %v11124_v19  ;;  %3287 = vmatpush1.msra.mxu1 %v11211_v50 }
 0x6b4   :  { %3173 = vmatprep.subr.mxu0 %v11136_v31  ;;  %3289 = vmatprep.subr.mxu1 %v11235_v61 }
 0x6b5   :  { %3176 = vmatpush1.msra.mxu0 %v11156_v27  ;;  %3291 = vmatpush1.msra.mxu1 %v11249_v4 }
 0x6b6   :  { %3179 = vmatprep.subr.mxu0 %v11180_v32  ;;  %3293 = vmatprep.subr.mxu1 %v11256_v18 }
 0x6b7   :  { %3182 = vmatpush1.msra.mxu0 %v11202_v42  ;;  %3295 = vmatpush1.msra.mxu1 %v11263_v17 }
 0x6b8   :  { %3185 = vmatprep.subr.mxu0 %v11222_v56  ;;  %3332 = vmatmul.mubr.f32.vlgmr.msra.gmra.mxu1 %v2982_v46  ;;  %v13628_v46 = vld [vmem:[#allocation47_spill] sm:$0xff] }
 0x6b9   :  { %3475 = vmatprep.subr.mxu1 %v13568_v22  ;;  %3188 = vmatpush1.msra.mxu0 %v13569_v36 }
 0x6ba   :  { %3477 = vmatpush1.msra.mxu1 %v11086_v1  ;;  %3191 = vmatprep.subr.mxu0 %v13570_v45 }
 0x6bb   :  { %3479 = vmatprep.subr.mxu1 %v11090_v3  ;;  %3194 = vmatpush1.msra.mxu0 %v13571_v25 }
 0x6bc   :  { %3481 = vmatpush1.msra.mxu1 %v11104_v6  ;;  %3197 = vmatprep.subr.mxu0 %v13572_v26 }
 0x6bd   :  { %3483 = vmatprep.subr.mxu1 %v11112_v10  ;;  %3200 = vmatpush1.msra.mxu0 %v13573_v63 }
 0x6be   :  { %3485 = vmatpush1.msra.mxu1 %v11126_v16  ;;  %3203 = vmatprep.subr.mxu0 %v13574_v35 }
 0x6bf   :  { %3487 = vmatprep.subr.mxu1 %v11145_v8  ;;  %3206 = vmatpush1.msra.mxu0 %v13575_v0 }
 0x6c0   :  { %3239 = vmatprep.mubr.f32.mxu0 %v13543_v12  ;;  %3489 = vmatpush1.msra.mxu1 %v11168_v28 }
 0x6c1   :  { %3242 = vmatmul.mubr.f32.vlgmr.msra.gmra.mxu0 %v2981_v49  ;;  %3357 = vmatprep.subr.mxu0 %v13576_v30  ;;  %v13627_v49 = vld [vmem:[#allocation46_spill] sm:$0xff] }
 0x6c2   :  { %3491 = vmatprep.subr.mxu1 %v11182_v33  ;;  %3361 = vmatpush1.msra.mxu0 %v13577_v38 }
 0x6c3   :  { %3493 = vmatpush1.msra.mxu1 %v11195_v39  ;;  %3365 = vmatprep.subr.mxu0 %v13578_v11 }
 0x6c4   :  { %3495 = vmatprep.subr.mxu1 %v11204_v43  ;;  %3369 = vmatpush1.msra.mxu0 %v13579_v59 }
 0x6c5   :  { %3497 = vmatpush1.msra.mxu1 %v11211_v50  ;;  %3373 = vmatprep.subr.mxu0 %v13580_v55 }
 0x6c6   :  { %3499 = vmatprep.subr.mxu1 %v11235_v61  ;;  %3377 = vmatpush1.msra.mxu0 %v13581_v58 }
 0x6c7   :  { %3501 = vmatpush1.msra.mxu1 %v11249_v4  ;;  %3381 = vmatprep.subr.mxu0 %v13582_v7 }
 0x6c8   :  { %3503 = vmatprep.subr.mxu1 %v11256_v18  ;;  %3385 = vmatpush1.msra.mxu0 %v13583_v37 }
 0x6c9   :  { %3505 = vmatpush1.msra.mxu1 %v11263_v17  ;;  %3538 = vmatprep.mubr.f32.mxu1 %v13543_v12 }
 0x6ca   :  { %3389 = vmatprep.subr.mxu0 %v13610_v2  ;;  %3540 = vmatmul.mubr.f32.vlgmr.msra.gmra.mxu1 %v11686_v60 }
 0x6cb   :  { %3393 = vmatpush1.msra.mxu0 %v13611_v5  ;;  %3450 = vmatprep.mubr.f32.mxu0 %v13543_v12 }
 0x6cc   :  { %3397 = vmatprep.subr.mxu0 %v13612_v20  ;;  %3717 = vmatprep.subr.mxu1 %v13613_v62 }
 0x6cd   :  { %3401 = vmatpush1.msra.mxu0 %v13614_v44  ;;  %3723 = vmatpush1.msra.mxu1 %v13615_v24 }
 0x6ce   :  { %3405 = vmatprep.subr.mxu0 %v13616_v51  ;;  %3729 = vmatprep.subr.mxu1 %v13617_v40 }
 0x6cf   :  { %3409 = vmatpush1.msra.mxu0 %v13618_v54  ;;  %3735 = vmatpush1.msra.mxu1 %v13619_v53 }
 0x6d0   :  { %3413 = vmatprep.subr.mxu0 %v13620_v13  ;;  %3741 = vmatprep.subr.mxu1 %v13621_v57  ;;  %v13636_v13 = vld [vmem:[#allocation56_spill] sm:$0xff] }
 0x6d1   :  { %3417 = vmatpush1.msra.mxu0 %v13622_v41  ;;  %3747 = vmatpush1.msra.mxu1 %v13623_v34 }
 0x6d2   :  { %3452 = vmatmul.mubr.f32.vlgmr.msra.gmra.mxu0 %v11686_v60  ;;  %3753 = vmatprep.subr.mxu1 %v13624_v47  ;;  %v13630_v60 = vld [vmem:[#allocation49_spill] sm:$0xff] }
 0x6d3   :  { %3759 = vmatpush1.msra.mxu1 %v13625_v21  ;;  %3621 = vmatprep.subr.mxu0 %v13568_v22 }
 0x6d4   :  { %3765 = vmatprep.subr.mxu1 %v13626_v15  ;;  %3623 = vmatpush1.msra.mxu0 %v11086_v1 }
 0x6d5   :  { %3771 = vmatpush1.msra.mxu1 %v13627_v49  ;;  %3625 = vmatprep.subr.mxu0 %v11090_v3  ;;  %v13633_v49 = vld [vmem:[#allocation52_spill] sm:$0xff] }
 0x6d6   :  { %3777 = vmatprep.subr.mxu1 %v13628_v46  ;;  %3627 = vmatpush1.msra.mxu0 %v11104_v6 }
 0x6d7   :  { %3783 = vmatpush1.msra.mxu1 %v13629_v48  ;;  %3629 = vmatprep.subr.mxu0 %v11112_v10 }
 0x6d8   :  { %3789 = vmatprep.subr.mxu1 %v13630_v60  ;;  %3631 = vmatpush1.msra.mxu0 %v11126_v16 }
 0x6d9   :  { %3795 = vmatpush1.msra.mxu1 %v13631_v14  ;;  %3633 = vmatprep.subr.mxu0 %v11145_v8  ;;  %v13635_v14 = vld [vmem:[#allocation54_spill] sm:$0xff] }
 0x6da   :  { %3801 = vmatprep.subr.mxu1 %v13632_v29  ;;  %3635 = vmatpush1.msra.mxu0 %v11168_v28 }
 0x6db   :  { %3807 = vmatpush1.msra.mxu1 %v13633_v49  ;;  %3637 = vmatprep.subr.mxu0 %v11182_v33  ;;  %v13634_v49 = vld [vmem:[#allocation13_spill] sm:$0xff] }
 0x6dc   :  { %3840 = vmatprep.mubr.f32.mxu1 %v13543_v12  ;;  %3970 = vmatprep.subr.mxu1 %v13568_v22 }
 0x6dd   :  { %3639 = vmatpush1.msra.mxu0 %v11195_v39  ;;  %3684 = vmatprep.mubr.f32.mxu0 %v13543_v12 }
 0x6de   :  { %3641 = vmatprep.subr.mxu0 %v11204_v43 }
 0x6df   :  { %3643 = vmatpush1.msra.mxu0 %v11211_v50 }
 0x6e0   :  { %3645 = vmatprep.subr.mxu0 %v11235_v61 }
 0x6e1   :  { %3647 = vmatpush1.msra.mxu0 %v11249_v4 }
 0x6e2   :  { %3649 = vmatprep.subr.mxu0 %v11256_v18 }
 0x6e3   :  { %3651 = vmatpush1.msra.mxu0 %v11263_v17 }
 0x6e4   :  { %3866 = vmatprep.subr.mxu0 %v13634_v49 }
 0x768   :  { %v3138_v48 = vpop.f32.mrf.mxu1 }
 0x76a   :  { %v3140_v21 = vpop.f32.mrf.mxu1 }
 0x770   :  { %v2986_v29 = vpop.f32.mrf.mxu0 }
 0x771   :  { %v2987_v60 = vadd.f32 %v2986_v29, %v13635_v14 }
 0x772   :  { %v2988_v15 = vpop.f32.mrf.mxu0 }
 0x773   :  { %v3139_v46 = vadd.f32 %v3138_v48, %v2987_v60  ;;  %v2989_v53 = vadd.f32 %v2988_v15, %v13636_v13 }
 0x775   :  { %v3141_v40 = vadd.f32 %v3140_v21, %v2989_v53 }
 0x778   :  { %v3333_v41 = vpop.f32.mrf.mxu1 }
 0x77a   :  { %v3335_v24 = vpop.f32.mrf.mxu1 }
 0x781   :  { %v3243_v47 = vpop.f32.mrf.mxu0 }
 0x782   :  { %v3244_v34 = vadd.f32 %v3243_v47, %v3139_v46 }
 0x783   :  { %v3245_v54 = vpop.f32.mrf.mxu0 }
 0x784   :  { %v3334_v57 = vadd.f32 %v3333_v41, %v3244_v34  ;;  %v3246_v51 = vadd.f32 %v3245_v54, %v3141_v40 }
 0x786   :  { %v3336_v20 = vadd.f32 %v3335_v24, %v3246_v51 }
 0x78a   :  { %v3541_v44 = vpop.f32.mrf.mxu1 }
 0x78c   :  { %v3543_v48 = vpop.f32.mrf.mxu1 }
 0x792   :  { %v3453_v62 = vpop.f32.mrf.mxu0 }
 0x793   :  { %v3454_v49 = vadd.f32 %v3453_v62, %v3334_v57 }
 0x794   :  { %v3455_v5 = vpop.f32.mrf.mxu0 }
 0x795   :  { %v3542_v29 = vadd.f32 %v3541_v44, %v3454_v49  ;;  %v3456_v14 = vadd.f32 %v3455_v5, %v3336_v20 }
 0x797   :  { %v3544_v60 = vadd.f32 %v3543_v48, %v3456_v14  ;;  %v9458_v41 = vmul.f32 -1.442695, %v3542_v29 }
 0x799   :  { %10510 = vtanh.f32 %v3544_v60 }
 0x79a   :  { %10512 = vpow2.f32 %v9458_v41  ;;  %v13639_v41 = vld [vmem:[#allocation31_spill] sm:$0xff] }
 0x7a6   :  { %v10511_v2 = vpop.eup %10510 }
 0x7a7   :  { %3561 = vrot.lane.b32.xlu0 %v10511_v2, %s10656_s5  ;;  %v10513_v34 = vpop.eup %10512  ;;  %v9459_v2 = vmul.f32 -1.442695, %v3544_v60  ;;  %v13638_v60 = vld [vmem:[#allocation30_spill] sm:$0xff] }
 0x7a8   :  { %v3549_v47 = vadd.f32 1.0, %v10513_v34  ;;  %v13640_v34 = vld [vmem:[#allocation34_spill] sm:$0xff] }
 0x7aa   :  { %10514 = vrcp.f32 %v3549_v47  ;;  %v13641_v47 = vld [vmem:[#allocation15_spill] sm:$0xff] }
 0x7b7   :  { %v10515_v40 = vpop.eup %10514 }
 0x7b8   :  { %v3559_v62 = vmul.f32 %v10515_v40, %v11678_v52 }
 0x819   :  { %v3562_v54 = vpop.permute.xlu0 %3561 }
 0x81a   :  { %v3564_v53 = vmul.f32 %v10515_v40, %v3562_v54  ;;  %v13642_v40 = vld [vmem:[#allocation36_spill] sm:$0xff] }
 0x81b   :  { %v13643_v54 = vld [vmem:[#allocation20_spill] sm:$0xff] }
 0x81c   :  { %3566 = vrot.lane.b32.xlu1 %v3564_v53, %s10656_s5  ;;  %v13644_v53 = vld [vmem:[#allocation40_spill] sm:$0xff] }
 0x88e   :  { %v3567_v44 = vpop.permute.xlu1 %3566 }
 0x88f   :  { %v11799_v5 = vadd.f32 %v3567_v44, %v3559_v62  ;;  %v13645_v62 = vld [vmem:[#allocation22_spill] sm:$0xff] }
 0x890   :  { %v13646_v44 = vld [vmem:[#allocation42_spill] sm:$0xff] }
 0x891   :  { %10516 = vtanh.f32 %v11799_v5 }
 0x892   :  { %10518 = vpow2.f32 %v9459_v2  ;;  %v13648_v2 = vld [vmem:[#allocation43_spill] sm:$0xff] }
 0x89e   :  { %v10517_v20 = vpop.eup %10516 }
 0x89f   :  { %3572 = vrot.lane.b32.xlu0 %v10517_v20, %s10656_s5  ;;  %v10519_v24 = vpop.eup %10518  ;;  %v13647_v20 = vld [vmem:[#allocation24_spill] sm:$0xff] }
 0x8a0   :  { %v3555_v51 = vadd.f32 1.0, %v10519_v24  ;;  %v13649_v24 = vld [vmem:[#allocation26_spill] sm:$0xff] }
 0x8a2   :  { %10520 = vrcp.f32 %v3555_v51  ;;  %v13650_v51 = vld [vmem:[#allocation45_spill] sm:$0xff] }
 0x8af   :  { %v10521_v57 = vpop.eup %10520 }
 0x911   :  { %v3573_v21 = vpop.permute.xlu0 %3572 }
 0x912   :  { %v11803_v15 = vmul.f32 %v10521_v57, %v3573_v21  ;;  %v13651_v57 = vld [vmem:[#allocation33_spill] sm:$0xff]  ;;  %v13652_v21 = vld [vmem:[#allocation39_spill] sm:$0xff] }
 0x914   :  { %13637 = vst [vmem:[#allocation25_spill] sm:$0xff] %v11803_v15  ;;  %v3602_v52 = vsel %vm1483_vm9, %v11803_v15, 0  ;;  %v13659_v15 = vld [vmem:[#allocation50_spill] sm:$0xff] }
 0x915   :  { %v11807_v49 = vand.u32 4294901760, %v3602_v52 }
 0x917   :  { %v3686_v46 = vsub.f32 %v3602_v52, %v11807_v49  ;;  %3842 = vmatmul.mubr.f32.vlgmr.msra.gmra.mxu1 %v11807_v49  ;;  %v13653_v52 = vld [vmem:[#allocation41_spill] sm:$0xff] }
 0x918   :  { %3972 = vmatpush1.msra.mxu1 %v11086_v1  ;;  %4033 = vmatprep.mubr.f32.mxu1 %v13543_v12 }
 0x919   :  { %v3687_v14 = vand.u32 4294901760, %v3686_v46  ;;  %3974 = vmatprep.subr.mxu1 %v11090_v3 }
 0x91a   :  { %3976 = vmatpush1.msra.mxu1 %v11104_v6 }
 0x91b   :  { %3978 = vmatprep.subr.mxu1 %v11112_v10  ;;  %v3688_v29 = vsub.f32 %v3686_v46, %v3687_v14 }
 0x91c   :  { %3980 = vmatpush1.msra.mxu1 %v11126_v16 }
 0x91d   :  { %3982 = vmatprep.subr.mxu1 %v11145_v8  ;;  %v3689_v48 = vand.u32 4294901760, %v3688_v29  ;;  %v13656_v29 = vld [vmem:[#allocation47_spill] sm:$0xff] }
 0x91e   :  { %3984 = vmatpush1.msra.mxu1 %v11168_v28 }
 0x91f   :  { %3986 = vmatprep.subr.mxu1 %v11182_v33  ;;  %3690 = vmatmul.mubr.f32.vlgmr.msra.gmra.mxu0 %v3689_v48  ;;  %v13657_v48 = vld [vmem:[#allocation48_spill] sm:$0xff] }
 0x920   :  { %3869 = vmatpush1.msra.mxu0 %v11102_v23  ;;  %3988 = vmatpush1.msra.mxu1 %v11195_v39 }
 0x921   :  { %3872 = vmatprep.subr.mxu0 %v11110_v9  ;;  %3990 = vmatprep.subr.mxu1 %v11204_v43 }
 0x922   :  { %3875 = vmatpush1.msra.mxu0 %v11124_v19  ;;  %3992 = vmatpush1.msra.mxu1 %v11211_v50 }
 0x923   :  { %3878 = vmatprep.subr.mxu0 %v11136_v31  ;;  %3994 = vmatprep.subr.mxu1 %v11235_v61 }
 0x924   :  { %3881 = vmatpush1.msra.mxu0 %v11156_v27  ;;  %3996 = vmatpush1.msra.mxu1 %v11249_v4 }
 0x925   :  { %3884 = vmatprep.subr.mxu0 %v11180_v32  ;;  %3998 = vmatprep.subr.mxu1 %v11256_v18 }
 0x926   :  { %3887 = vmatpush1.msra.mxu0 %v11202_v42  ;;  %4000 = vmatpush1.msra.mxu1 %v11263_v17 }
 0x927   :  { %3890 = vmatprep.subr.mxu0 %v11222_v56  ;;  %4037 = vmatmul.mubr.f32.vlgmr.msra.gmra.mxu1 %v3687_v14  ;;  %v13655_v14 = vld [vmem:[#allocation46_spill] sm:$0xff] }
 0x928   :  { %4180 = vmatprep.subr.mxu1 %v13568_v22  ;;  %3893 = vmatpush1.msra.mxu0 %v13569_v36 }
 0x929   :  { %4182 = vmatpush1.msra.mxu1 %v11086_v1  ;;  %3896 = vmatprep.subr.mxu0 %v13570_v45 }
 0x92a   :  { %4184 = vmatprep.subr.mxu1 %v11090_v3  ;;  %3899 = vmatpush1.msra.mxu0 %v13571_v25 }
 0x92b   :  { %4186 = vmatpush1.msra.mxu1 %v11104_v6  ;;  %3902 = vmatprep.subr.mxu0 %v13572_v26 }
 0x92c   :  { %4188 = vmatprep.subr.mxu1 %v11112_v10  ;;  %3905 = vmatpush1.msra.mxu0 %v13573_v63 }
 0x92d   :  { %4190 = vmatpush1.msra.mxu1 %v11126_v16  ;;  %3908 = vmatprep.subr.mxu0 %v13574_v35 }
 0x92e   :  { %4192 = vmatprep.subr.mxu1 %v11145_v8  ;;  %3911 = vmatpush1.msra.mxu0 %v13575_v0 }
 0x92f   :  { %3944 = vmatprep.mubr.f32.mxu0 %v13543_v12  ;;  %4194 = vmatpush1.msra.mxu1 %v11168_v28 }
 0x930   :  { %3947 = vmatmul.mubr.f32.vlgmr.msra.gmra.mxu0 %v3686_v46  ;;  %4062 = vmatprep.subr.mxu0 %v13576_v30  ;;  %v13654_v46 = vld [vmem:[#allocation44_spill] sm:$0xff] }
 0x931   :  { %4196 = vmatprep.subr.mxu1 %v11182_v33  ;;  %4066 = vmatpush1.msra.mxu0 %v13577_v38 }
 0x932   :  { %4198 = vmatpush1.msra.mxu1 %v11195_v39  ;;  %4070 = vmatprep.subr.mxu0 %v13578_v11 }
 0x933   :  { %4200 = vmatprep.subr.mxu1 %v11204_v43  ;;  %4074 = vmatpush1.msra.mxu0 %v13579_v59 }
 0x934   :  { %4202 = vmatpush1.msra.mxu1 %v11211_v50  ;;  %4078 = vmatprep.subr.mxu0 %v13580_v55 }
 0x935   :  { %4204 = vmatprep.subr.mxu1 %v11235_v61  ;;  %4082 = vmatpush1.msra.mxu0 %v13581_v58 }
 0x936   :  { %4206 = vmatpush1.msra.mxu1 %v11249_v4  ;;  %4086 = vmatprep.subr.mxu0 %v13582_v7 }
 0x937   :  { %4208 = vmatprep.subr.mxu1 %v11256_v18  ;;  %4090 = vmatpush1.msra.mxu0 %v13583_v37 }
 0x938   :  { %4210 = vmatpush1.msra.mxu1 %v11263_v17  ;;  %4243 = vmatprep.mubr.f32.mxu1 %v13543_v12 }
 0x939   :  { %4094 = vmatprep.subr.mxu0 %v13638_v60  ;;  %4245 = vmatmul.mubr.f32.vlgmr.msra.gmra.mxu1 %v11807_v49 }
 0x93a   :  { %4098 = vmatpush1.msra.mxu0 %v13639_v41  ;;  %4155 = vmatprep.mubr.f32.mxu0 %v13543_v12 }
 0x93b   :  { %4102 = vmatprep.subr.mxu0 %v13640_v34  ;;  %4424 = vmatprep.subr.mxu1 %v13641_v47 }
 0x93c   :  { %4106 = vmatpush1.msra.mxu0 %v13642_v40  ;;  %4430 = vmatpush1.msra.mxu1 %v13643_v54 }
 0x93d   :  { %4110 = vmatprep.subr.mxu0 %v13644_v53  ;;  %4436 = vmatprep.subr.mxu1 %v13645_v62 }
 0x93e   :  { %4114 = vmatpush1.msra.mxu0 %v13646_v44  ;;  %4442 = vmatpush1.msra.mxu1 %v13647_v20  ;;  %v3598_v44 = vrot.slane %v13636_v13, 4 }
 0x93f   :  { %4118 = vmatprep.subr.mxu0 %v13648_v2  ;;  %4448 = vmatprep.subr.mxu1 %v13649_v24 }
 0x940   :  { %4122 = vmatpush1.msra.mxu0 %v13650_v51  ;;  %4454 = vmatpush1.msra.mxu1 %v13651_v57 }
 0x941   :  { %4157 = vmatmul.mubr.f32.vlgmr.msra.gmra.mxu0 %v11807_v49  ;;  %4460 = vmatprep.subr.mxu1 %v13652_v21  ;;  %v13658_v49 = vld [vmem:[#allocation49_spill] sm:$0xff] }
 0x942   :  { %4466 = vmatpush1.msra.mxu1 %v13653_v52  ;;  %4328 = vmatprep.subr.mxu0 %v13568_v22 }
 0x943   :  { %4472 = vmatprep.subr.mxu1 %v13654_v46  ;;  %4330 = vmatpush1.msra.mxu0 %v11086_v1  ;;  %v13660_v46 = vld [vmem:[#allocation51_spill] sm:$0xff] }
 0x944   :  { %4478 = vmatpush1.msra.mxu1 %v13655_v14  ;;  %4332 = vmatprep.subr.mxu0 %v11090_v3  ;;  %v13661_v14 = vld [vmem:[#allocation52_spill] sm:$0xff] }
 0x945   :  { %4484 = vmatprep.subr.mxu1 %v13656_v29  ;;  %4334 = vmatpush1.msra.mxu0 %v11104_v6 }
 0x946   :  { %4490 = vmatpush1.msra.mxu1 %v13657_v48  ;;  %4336 = vmatprep.subr.mxu0 %v11112_v10 }
 0x947   :  { %4496 = vmatprep.subr.mxu1 %v13658_v49  ;;  %4338 = vmatpush1.msra.mxu0 %v11126_v16 }
 0x948   :  { %4502 = vmatpush1.msra.mxu1 %v13659_v15  ;;  %4340 = vmatprep.subr.mxu0 %v11145_v8 }
 0x949   :  { %4508 = vmatprep.subr.mxu1 %v13660_v46  ;;  %4342 = vmatpush1.msra.mxu0 %v11168_v28  ;;  %v13663_v46 = vld [vmem:[#allocation54_spill] sm:$0xff] }
 0x94a   :  { %4514 = vmatpush1.msra.mxu1 %v13661_v14  ;;  %4344 = vmatprep.subr.mxu0 %v11182_v33  ;;  %v13662_v14 = vld [vmem:[#allocation13_spill] sm:$0xff]  ;;  %v3597_v15 = vrot.slane %v13663_v46, 4 }
 0x94b   :  { %4547 = vmatprep.mubr.f32.mxu1 %v13543_v12  ;;  %4677 = vmatprep.subr.mxu1 %v13568_v22 }
 0x94c   :  { %4346 = vmatpush1.msra.mxu0 %v11195_v39  ;;  %4391 = vmatprep.mubr.f32.mxu0 %v13543_v12 }
 0x94d   :  { %4348 = vmatprep.subr.mxu0 %v11204_v43 }
 0x94e   :  { %4350 = vmatpush1.msra.mxu0 %v11211_v50 }
 0x94f   :  { %4352 = vmatprep.subr.mxu0 %v11235_v61 }
 0x950   :  { %4354 = vmatpush1.msra.mxu0 %v11249_v4 }
 0x951   :  { %4356 = vmatprep.subr.mxu0 %v11256_v18 }
 0x952   :  { %4358 = vmatpush1.msra.mxu0 %v11263_v17 }
 0x953   :  { %4573 = vmatprep.subr.mxu0 %v13662_v14 }
 0x9d7   :  { %v3843_v29 = vpop.f32.mrf.mxu1 }
 0x9d9   :  { %v3845_v57 = vpop.f32.mrf.mxu1 }
 0x9df   :  { %v3691_v49 = vpop.f32.mrf.mxu0 }
 0x9e0   :  { %v3692_v48 = vadd.f32 %v3691_v49, %v3597_v15 }
 0x9e1   :  { %v3693_v21 = vpop.f32.mrf.mxu0 }
 0x9e2   :  { %v3844_v52 = vadd.f32 %v3843_v29, %v3692_v48  ;;  %v3694_v62 = vadd.f32 %v3693_v21, %v3598_v44 }
 0x9e4   :  { %v3846_v54 = vadd.f32 %v3845_v57, %v3694_v62 }
 0x9e7   :  { %v4038_v2 = vpop.f32.mrf.mxu1 }
 0x9e9   :  { %v4040_v47 = vpop.f32.mrf.mxu1 }
 0x9f0   :  { %v3948_v51 = vpop.f32.mrf.mxu0 }
 0x9f1   :  { %v3949_v24 = vadd.f32 %v3948_v51, %v3844_v52 }
 0x9f2   :  { %v3950_v53 = vpop.f32.mrf.mxu0 }
 0x9f3   :  { %v4039_v20 = vadd.f32 %v4038_v2, %v3949_v24  ;;  %v3951_v40 = vadd.f32 %v3950_v53, %v3846_v54 }
 0x9f5   :  { %v4041_v41 = vadd.f32 %v4040_v47, %v3951_v40 }
 0x9f9   :  { %v4246_v14 = vpop.f32.mrf.mxu1 }
 0x9fb   :  { %v4248_v48 = vpop.f32.mrf.mxu1 }
 0xa01   :  { %v4158_v34 = vpop.f32.mrf.mxu0 }
 0xa02   :  { %v4159_v46 = vadd.f32 %v4158_v34, %v4039_v20 }
 0xa03   :  { %v4160_v15 = vpop.f32.mrf.mxu0 }
 0xa04   :  { %v4247_v49 = vadd.f32 %v4246_v14, %v4159_v46  ;;  %v4161_v29 = vadd.f32 %v4160_v15, %v4041_v41 }
 0xa06   :  { %v4249_v60 = vadd.f32 %v4248_v48, %v4161_v29  ;;  %v9462_v2 = vmul.f32 -1.442695, %v4247_v49  ;;  %v13665_v48 = vld [vmem:[#allocation30_spill] sm:$0xff] }
 0xa08   :  { %10522 = vtanh.f32 %v4249_v60  ;;  %v9463_v20 = vmul.f32 -1.442695, %v4249_v60 }
 0xa09   :  { %10524 = vpow2.f32 %v9462_v2  ;;  %v13667_v2 = vld [vmem:[#allocation34_spill] sm:$0xff] }
 0xa15   :  { %v10523_v51 = vpop.eup %10522 }
 0xa16   :  { %4266 = vrot.lane.b32.xlu1 %v10523_v51, %s10656_s5  ;;  %v10525_v13 = vpop.eup %10524  ;;  %v13666_v51 = vld [vmem:[#allocation31_spill] sm:$0xff] }
 0xa17   :  { %v4254_v44 = vadd.f32 1.0, %v10525_v13  ;;  %v13668_v13 = vld [vmem:[#allocation15_spill] sm:$0xff] }
 0xa19   :  { %10526 = vrcp.f32 %v4254_v44  ;;  %v13669_v44 = vld [vmem:[#allocation36_spill] sm:$0xff] }
 0xa26   :  { %v10527_v54 = vpop.eup %10526 }
 0xa27   :  { %v4264_v34 = vmul.f32 %v10527_v54, %v11799_v5 }
 0xa88   :  { %v4267_v53 = vpop.permute.xlu1 %4266 }
 0xa89   :  { %v4269_v62 = vmul.f32 %v10527_v54, %v4267_v53  ;;  %v13670_v54 = vld [vmem:[#allocation20_spill] sm:$0xff] }
 0xa8a   :  { %v13671_v53 = vld [vmem:[#allocation40_spill] sm:$0xff] }
 0xa8b   :  { %4271 = vrot.lane.b32.xlu0 %v4269_v62, %s10656_s5  ;;  %v13672_v62 = vld [vmem:[#allocation22_spill] sm:$0xff] }
 0xafd   :  { %v4272_v47 = vpop.permute.xlu0 %4271 }
 0xafe   :  { %v11920_v41 = vadd.f32 %v4272_v47, %v4264_v34  ;;  %v13673_v34 = vld [vmem:[#allocation42_spill] sm:$0xff]  ;;  %v13674_v47 = vld [vmem:[#allocation24_spill] sm:$0xff] }
 0xb00   :  { %10528 = vtanh.f32 %v11920_v41 }
 0xb01   :  { %10530 = vpow2.f32 %v9463_v20  ;;  %v13676_v20 = vld [vmem:[#allocation26_spill] sm:$0xff] }
 0xb0d   :  { %v10529_v40 = vpop.eup %10528 }
 0xb0e   :  { %4277 = vrot.lane.b32.xlu1 %v10529_v40, %s10656_s5  ;;  %v10531_v24 = vpop.eup %10530  ;;  %v13675_v40 = vld [vmem:[#allocation43_spill] sm:$0xff] }
 0xb0f   :  { %v4260_v57 = vadd.f32 1.0, %v10531_v24  ;;  %v13677_v24 = vld [vmem:[#allocation45_spill] sm:$0xff] }
 0xb11   :  { %10532 = vrcp.f32 %v4260_v57  ;;  %v13678_v57 = vld [vmem:[#allocation33_spill] sm:$0xff] }
 0xb1e   :  { %v10533_v21 = vpop.eup %10532 }
 0xb80   :  { %v4278_v52 = vpop.permute.xlu1 %4277 }
 0xb81   :  { %v11924_v14 = vmul.f32 %v10533_v21, %v4278_v52  ;;  %v13679_v21 = vld [vmem:[#allocation39_spill] sm:$0xff]  ;;  %v13680_v52 = vld [vmem:[#allocation41_spill] sm:$0xff] }
 0xb83   :  { %13664 = vst [vmem:[#allocation28_spill] sm:$0xff] %v11924_v14  ;;  %v4309_v5 = vsel %vm1483_vm9, %v11924_v14, 0  ;;  %v13687_v14 = vld [vmem:[#allocation51_spill] sm:$0xff] }
 0xb84   :  { %v11928_v46 = vand.u32 4294901760, %v4309_v5 }
 0xb86   :  { %v4393_v15 = vsub.f32 %v4309_v5, %v11928_v46  ;;  %4549 = vmatmul.mubr.f32.vlgmr.msra.gmra.mxu1 %v11928_v46  ;;  %v13681_v5 = vld [vmem:[#allocation44_spill] sm:$0xff] }
 0xb87   :  { %4679 = vmatpush1.msra.mxu1 %v11086_v1  ;;  %4740 = vmatprep.mubr.f32.mxu1 %v13543_v12 }
 0xb88   :  { %v4394_v60 = vand.u32 4294901760, %v4393_v15  ;;  %4681 = vmatprep.subr.mxu1 %v11090_v3 }
 0xb89   :  { %4683 = vmatpush1.msra.mxu1 %v11104_v6 }
 0xb8a   :  { %4685 = vmatprep.subr.mxu1 %v11112_v10  ;;  %v4395_v49 = vsub.f32 %v4393_v15, %v4394_v60 }
 0xb8b   :  { %4687 = vmatpush1.msra.mxu1 %v11126_v16 }
 0xb8c   :  { %4689 = vmatprep.subr.mxu1 %v11145_v8  ;;  %v4396_v29 = vand.u32 4294901760, %v4395_v49  ;;  %v13684_v49 = vld [vmem:[#allocation48_spill] sm:$0xff] }
 0xb8d   :  { %4691 = vmatpush1.msra.mxu1 %v11168_v28 }
 0xb8e   :  { %4693 = vmatprep.subr.mxu1 %v11182_v33  ;;  %4397 = vmatmul.mubr.f32.vlgmr.msra.gmra.mxu0 %v4396_v29  ;;  %v13686_v29 = vld [vmem:[#allocation50_spill] sm:$0xff] }
 0xb8f   :  { %4576 = vmatpush1.msra.mxu0 %v11102_v23  ;;  %4695 = vmatpush1.msra.mxu1 %v11195_v39 }
 0xb90   :  { %4579 = vmatprep.subr.mxu0 %v11110_v9  ;;  %4697 = vmatprep.subr.mxu1 %v11204_v43 }
 0xb91   :  { %4582 = vmatpush1.msra.mxu0 %v11124_v19  ;;  %4699 = vmatpush1.msra.mxu1 %v11211_v50 }
 0xb92   :  { %4585 = vmatprep.subr.mxu0 %v11136_v31  ;;  %4701 = vmatprep.subr.mxu1 %v11235_v61 }
 0xb93   :  { %4588 = vmatpush1.msra.mxu0 %v11156_v27  ;;  %4703 = vmatpush1.msra.mxu1 %v11249_v4 }
 0xb94   :  { %4591 = vmatprep.subr.mxu0 %v11180_v32  ;;  %4705 = vmatprep.subr.mxu1 %v11256_v18 }
 0xb95   :  { %4594 = vmatpush1.msra.mxu0 %v11202_v42  ;;  %4707 = vmatpush1.msra.mxu1 %v11263_v17 }
 0xb96   :  { %4597 = vmatprep.subr.mxu0 %v11222_v56  ;;  %4744 = vmatmul.mubr.f32.vlgmr.msra.gmra.mxu1 %v4394_v60  ;;  %v13683_v60 = vld [vmem:[#allocation47_spill] sm:$0xff] }
 0xb97   :  { %4887 = vmatprep.subr.mxu1 %v13568_v22  ;;  %4600 = vmatpush1.msra.mxu0 %v13569_v36 }
 0xb98   :  { %4889 = vmatpush1.msra.mxu1 %v11086_v1  ;;  %4603 = vmatprep.subr.mxu0 %v13570_v45 }
 0xb99   :  { %4891 = vmatprep.subr.mxu1 %v11090_v3  ;;  %4606 = vmatpush1.msra.mxu0 %v13571_v25 }
 0xb9a   :  { %4893 = vmatpush1.msra.mxu1 %v11104_v6  ;;  %4609 = vmatprep.subr.mxu0 %v13572_v26 }
 0xb9b   :  { %4895 = vmatprep.subr.mxu1 %v11112_v10  ;;  %4612 = vmatpush1.msra.mxu0 %v13573_v63 }
 0xb9c   :  { %4897 = vmatpush1.msra.mxu1 %v11126_v16  ;;  %4615 = vmatprep.subr.mxu0 %v13574_v35 }
 0xb9d   :  { %4899 = vmatprep.subr.mxu1 %v11145_v8  ;;  %4618 = vmatpush1.msra.mxu0 %v13575_v0 }
 0xb9e   :  { %4651 = vmatprep.mubr.f32.mxu0 %v13543_v12  ;;  %4901 = vmatpush1.msra.mxu1 %v11168_v28 }
 0xb9f   :  { %4654 = vmatmul.mubr.f32.vlgmr.msra.gmra.mxu0 %v4393_v15  ;;  %4769 = vmatprep.subr.mxu0 %v13576_v30  ;;  %v13682_v15 = vld [vmem:[#allocation46_spill] sm:$0xff] }
 0xba0   :  { %4903 = vmatprep.subr.mxu1 %v11182_v33  ;;  %4773 = vmatpush1.msra.mxu0 %v13577_v38 }
 0xba1   :  { %4905 = vmatpush1.msra.mxu1 %v11195_v39  ;;  %4777 = vmatprep.subr.mxu0 %v13578_v11 }
 0xba2   :  { %4907 = vmatprep.subr.mxu1 %v11204_v43  ;;  %4781 = vmatpush1.msra.mxu0 %v13579_v59 }
 0xba3   :  { %4909 = vmatpush1.msra.mxu1 %v11211_v50  ;;  %4785 = vmatprep.subr.mxu0 %v13580_v55 }
 0xba4   :  { %4911 = vmatprep.subr.mxu1 %v11235_v61  ;;  %4789 = vmatpush1.msra.mxu0 %v13581_v58 }
 0xba5   :  { %4913 = vmatpush1.msra.mxu1 %v11249_v4  ;;  %4793 = vmatprep.subr.mxu0 %v13582_v7 }
 0xba6   :  { %4915 = vmatprep.subr.mxu1 %v11256_v18  ;;  %4797 = vmatpush1.msra.mxu0 %v13583_v37 }
 0xba7   :  { %4917 = vmatpush1.msra.mxu1 %v11263_v17  ;;  %4950 = vmatprep.mubr.f32.mxu1 %v13543_v12 }
 0xba8   :  { %4801 = vmatprep.subr.mxu0 %v13665_v48  ;;  %4952 = vmatmul.mubr.f32.vlgmr.msra.gmra.mxu1 %v11928_v46 }
 0xba9   :  { %4805 = vmatpush1.msra.mxu0 %v13666_v51  ;;  %4862 = vmatprep.mubr.f32.mxu0 %v13543_v12 }
 0xbaa   :  { %4809 = vmatprep.subr.mxu0 %v13667_v2  ;;  %5129 = vmatprep.subr.mxu1 %v13668_v13 }
 0xbab   :  { %4813 = vmatpush1.msra.mxu0 %v13669_v44  ;;  %5135 = vmatpush1.msra.mxu1 %v13670_v54 }
 0xbac   :  { %4817 = vmatprep.subr.mxu0 %v13671_v53  ;;  %5141 = vmatprep.subr.mxu1 %v13672_v62 }
 0xbad   :  { %4821 = vmatpush1.msra.mxu0 %v13673_v34  ;;  %5147 = vmatpush1.msra.mxu1 %v13674_v47 }
 0xbae   :  { %4825 = vmatprep.subr.mxu0 %v13675_v40  ;;  %5153 = vmatprep.subr.mxu1 %v13676_v20  ;;  %v13691_v40 = vld [vmem:[#allocation55_spill] sm:$0xff] }
 0xbaf   :  { %4829 = vmatpush1.msra.mxu0 %v13677_v24  ;;  %5159 = vmatpush1.msra.mxu1 %v13678_v57 }
 0xbb0   :  { %4864 = vmatmul.mubr.f32.vlgmr.msra.gmra.mxu0 %v11928_v46  ;;  %5165 = vmatprep.subr.mxu1 %v13679_v21  ;;  %v13685_v46 = vld [vmem:[#allocation49_spill] sm:$0xff] }
 0xbb1   :  { %5171 = vmatpush1.msra.mxu1 %v13680_v52  ;;  %5033 = vmatprep.subr.mxu0 %v13568_v22 }
 0xbb2   :  { %5177 = vmatprep.subr.mxu1 %v13681_v5  ;;  %5035 = vmatpush1.msra.mxu0 %v11086_v1 }
 0xbb3   :  { %5183 = vmatpush1.msra.mxu1 %v13682_v15  ;;  %5037 = vmatprep.subr.mxu0 %v11090_v3  ;;  %v13688_v15 = vld [vmem:[#allocation52_spill] sm:$0xff] }
 0xbb4   :  { %5189 = vmatprep.subr.mxu1 %v13683_v60  ;;  %5039 = vmatpush1.msra.mxu0 %v11104_v6 }
 0xbb5   :  { %5195 = vmatpush1.msra.mxu1 %v13684_v49  ;;  %5041 = vmatprep.subr.mxu0 %v11112_v10 }
 0xbb6   :  { %5201 = vmatprep.subr.mxu1 %v13685_v46  ;;  %5043 = vmatpush1.msra.mxu0 %v11126_v16 }
 0xbb7   :  { %5207 = vmatpush1.msra.mxu1 %v13686_v29  ;;  %5045 = vmatprep.subr.mxu0 %v11145_v8  ;;  %v13690_v29 = vld [vmem:[#allocation53_spill] sm:$0xff] }
 0xbb8   :  { %5213 = vmatprep.subr.mxu1 %v13687_v14  ;;  %5047 = vmatpush1.msra.mxu0 %v11168_v28 }
 0xbb9   :  { %5219 = vmatpush1.msra.mxu1 %v13688_v15  ;;  %5049 = vmatprep.subr.mxu0 %v11182_v33  ;;  %v13689_v15 = vld [vmem:[#allocation13_spill] sm:$0xff] }
 0xbba   :  { %5252 = vmatprep.mubr.f32.mxu1 %v13543_v12  ;;  %5382 = vmatprep.subr.mxu1 %v13568_v22 }
 0xbbb   :  { %5051 = vmatpush1.msra.mxu0 %v11195_v39  ;;  %5096 = vmatprep.mubr.f32.mxu0 %v13543_v12 }
 0xbbc   :  { %5053 = vmatprep.subr.mxu0 %v11204_v43 }
 0xbbd   :  { %5055 = vmatpush1.msra.mxu0 %v11211_v50 }
 0xbbe   :  { %5057 = vmatprep.subr.mxu0 %v11235_v61 }
 0xbbf   :  { %5059 = vmatpush1.msra.mxu0 %v11249_v4 }
 0xbc0   :  { %5061 = vmatprep.subr.mxu0 %v11256_v18 }
 0xbc1   :  { %5063 = vmatpush1.msra.mxu0 %v11263_v17 }
 0xbc2   :  { %5278 = vmatprep.subr.mxu0 %v13689_v15 }
 0xc46   :  { %v4550_v49 = vpop.f32.mrf.mxu1 }
 0xc48   :  { %v4552_v52 = vpop.f32.mrf.mxu1 }
 0xc4e   :  { %v4398_v14 = vpop.f32.mrf.mxu0 }
 0xc4f   :  { %v4399_v46 = vadd.f32 %v4398_v14, %v13690_v29 }
 0xc50   :  { %v4400_v5 = vpop.f32.mrf.mxu0 }
 0xc51   :  { %v4551_v60 = vadd.f32 %v4550_v49, %v4399_v46  ;;  %v4401_v47 = vadd.f32 %v4400_v5, %v13691_v40 }
 0xc53   :  { %v4553_v62 = vadd.f32 %v4552_v52, %v4401_v47 }
 0xc56   :  { %v4745_v24 = vpop.f32.mrf.mxu1 }
 0xc58   :  { %v4747_v54 = vpop.f32.mrf.mxu1 }
 0xc5f   :  { %v4655_v21 = vpop.f32.mrf.mxu0 }
 0xc60   :  { %v4656_v57 = vadd.f32 %v4655_v21, %v4551_v60 }
 0xc61   :  { %v4657_v34 = vpop.f32.mrf.mxu0 }
 0xc62   :  { %v4746_v20 = vadd.f32 %v4745_v24, %v4656_v57  ;;  %v4658_v53 = vadd.f32 %v4657_v34, %v4553_v62 }
 0xc64   :  { %v4748_v2 = vadd.f32 %v4747_v54, %v4658_v53 }
 0xc68   :  { %v4953_v44 = vpop.f32.mrf.mxu1 }
 0xc6a   :  { %v4955_v49 = vpop.f32.mrf.mxu1 }
 0xc70   :  { %v4865_v13 = vpop.f32.mrf.mxu0 }
 0xc71   :  { %v4866_v15 = vadd.f32 %v4865_v13, %v4746_v20 }
 0xc72   :  { %v4867_v51 = vpop.f32.mrf.mxu0 }
 0xc73   :  { %v4954_v14 = vadd.f32 %v4953_v44, %v4866_v15  ;;  %v4868_v29 = vadd.f32 %v4867_v51, %v4748_v2 }
 0xc75   :  { %v4956_v46 = vadd.f32 %v4955_v49, %v4868_v29  ;;  %v9466_v24 = vmul.f32 -1.442695, %v4954_v14 }
 0xc77   :  { %10534 = vtanh.f32 %v4956_v46 }
 0xc78   :  { %10536 = vpow2.f32 %v9466_v24  ;;  %v13694_v24 = vld [vmem:[#allocation31_spill] sm:$0xff] }
 0xc84   :  { %v10535_v48 = vpop.eup %10534 }
 0xc85   :  { %4973 = vrot.lane.b32.xlu0 %v10535_v48, %s10656_s5  ;;  %v10537_v57 = vpop.eup %10536  ;;  %v9467_v48 = vmul.f32 -1.442695, %v4956_v46  ;;  %v13693_v46 = vld [vmem:[#allocation30_spill] sm:$0xff] }
 0xc86   :  { %v4961_v21 = vadd.f32 1.0, %v10537_v57  ;;  %v13695_v57 = vld [vmem:[#allocation34_spill] sm:$0xff] }
 0xc88   :  { %10538 = vrcp.f32 %v4961_v21  ;;  %v13696_v21 = vld [vmem:[#allocation15_spill] sm:$0xff] }
 0xc95   :  { %v10539_v62 = vpop.eup %10538 }
 0xc96   :  { %v4971_v13 = vmul.f32 %v10539_v62, %v11920_v41 }
 0xcf7   :  { %v4974_v34 = vpop.permute.xlu0 %4973 }
 0xcf8   :  { %v4976_v47 = vmul.f32 %v10539_v62, %v4974_v34  ;;  %v13697_v62 = vld [vmem:[#allocation36_spill] sm:$0xff] }
 0xcf9   :  { %v13698_v34 = vld [vmem:[#allocation20_spill] sm:$0xff] }
 0xcfa   :  { %4978 = vrot.lane.b32.xlu1 %v4976_v47, %s10656_s5  ;;  %v13699_v47 = vld [vmem:[#allocation40_spill] sm:$0xff] }
 0xd6c   :  { %v4979_v44 = vpop.permute.xlu1 %4978 }
 0xd6d   :  { %v12041_v51 = vadd.f32 %v4979_v44, %v4971_v13  ;;  %v13700_v13 = vld [vmem:[#allocation22_spill] sm:$0xff] }
 0xd6e   :  { %v13701_v44 = vld [vmem:[#allocation42_spill] sm:$0xff] }
 0xd6f   :  { %10540 = vtanh.f32 %v12041_v51 }
 0xd70   :  { %10542 = vpow2.f32 %v9467_v48  ;;  %v13703_v48 = vld [vmem:[#allocation43_spill] sm:$0xff] }
 0xd7c   :  { %v10541_v2 = vpop.eup %10540 }
 0xd7d   :  { %4984 = vrot.lane.b32.xlu0 %v10541_v2, %s10656_s5  ;;  %v10543_v54 = vpop.eup %10542  ;;  %v13702_v2 = vld [vmem:[#allocation24_spill] sm:$0xff] }
 0xd7e   :  { %v4967_v53 = vadd.f32 1.0, %v10543_v54  ;;  %v13704_v54 = vld [vmem:[#allocation26_spill] sm:$0xff] }
 0xd80   :  { %10544 = vrcp.f32 %v4967_v53  ;;  %v13705_v53 = vld [vmem:[#allocation45_spill] sm:$0xff] }
 0xd8d   :  { %v10545_v20 = vpop.eup %10544 }
 0xdef   :  { %v4985_v52 = vpop.permute.xlu0 %4984 }
 0xdf0   :  { %v12045_v5 = vmul.f32 %v10545_v20, %v4985_v52  ;;  %v13706_v20 = vld [vmem:[#allocation33_spill] sm:$0xff]  ;;  %v13707_v52 = vld [vmem:[#allocation39_spill] sm:$0xff] }
 0xdf2   :  { %13692 = vst [vmem:[#allocation29_spill] sm:$0xff] %v12045_v5  ;;  %v5014_v41 = vsel %vm1483_vm9, %v12045_v5, 0  ;;  %v13714_v5 = vld [vmem:[#allocation50_spill] sm:$0xff] }
 0xdf3   :  { %v12049_v15 = vand.u32 4294901760, %v5014_v41 }
 0xdf5   :  { %v5098_v60 = vsub.f32 %v5014_v41, %v12049_v15  ;;  %5254 = vmatmul.mubr.f32.vlgmr.msra.gmra.mxu1 %v12049_v15  ;;  %v13708_v41 = vld [vmem:[#allocation41_spill] sm:$0xff] }
 0xdf6   :  { %5384 = vmatpush1.msra.mxu1 %v11086_v1  ;;  %5445 = vmatprep.mubr.f32.mxu1 %v13543_v12 }
 0xdf7   :  { %v5099_v29 = vand.u32 4294901760, %v5098_v60  ;;  %5386 = vmatprep.subr.mxu1 %v11090_v3 }
 0xdf8   :  { %5388 = vmatpush1.msra.mxu1 %v11104_v6 }
 0xdf9   :  { %5390 = vmatprep.subr.mxu1 %v11112_v10  ;;  %v5100_v14 = vsub.f32 %v5098_v60, %v5099_v29 }
 0xdfa   :  { %5392 = vmatpush1.msra.mxu1 %v11126_v16 }
 0xdfb   :  { %5394 = vmatprep.subr.mxu1 %v11145_v8  ;;  %v5101_v49 = vand.u32 4294901760, %v5100_v14  ;;  %v13711_v14 = vld [vmem:[#allocation47_spill] sm:$0xff] }
 0xdfc   :  { %5396 = vmatpush1.msra.mxu1 %v11168_v28 }
 0xdfd   :  { %5398 = vmatprep.subr.mxu1 %v11182_v33  ;;  %5102 = vmatmul.mubr.f32.vlgmr.msra.gmra.mxu0 %v5101_v49  ;;  %v13712_v49 = vld [vmem:[#allocation48_spill] sm:$0xff] }
 0xdfe   :  { %5281 = vmatpush1.msra.mxu0 %v11102_v23  ;;  %5400 = vmatpush1.msra.mxu1 %v11195_v39 }
 0xdff   :  { %5284 = vmatprep.subr.mxu0 %v11110_v9  ;;  %5402 = vmatprep.subr.mxu1 %v11204_v43 }
 0xe00   :  { %5287 = vmatpush1.msra.mxu0 %v11124_v19  ;;  %5404 = vmatpush1.msra.mxu1 %v11211_v50 }
 0xe01   :  { %5290 = vmatprep.subr.mxu0 %v11136_v31  ;;  %5406 = vmatprep.subr.mxu1 %v11235_v61 }
 0xe02   :  { %5293 = vmatpush1.msra.mxu0 %v11156_v27  ;;  %5408 = vmatpush1.msra.mxu1 %v11249_v4 }
 0xe03   :  { %5296 = vmatprep.subr.mxu0 %v11180_v32  ;;  %5410 = vmatprep.subr.mxu1 %v11256_v18 }
 0xe04   :  { %5299 = vmatpush1.msra.mxu0 %v11202_v42  ;;  %5412 = vmatpush1.msra.mxu1 %v11263_v17 }
 0xe05   :  { %5302 = vmatprep.subr.mxu0 %v11222_v56  ;;  %5449 = vmatmul.mubr.f32.vlgmr.msra.gmra.mxu1 %v5099_v29  ;;  %v13710_v29 = vld [vmem:[#allocation46_spill] sm:$0xff] }
 0xe06   :  { %5592 = vmatprep.subr.mxu1 %v13568_v22  ;;  %5305 = vmatpush1.msra.mxu0 %v13569_v36 }
 0xe07   :  { %5594 = vmatpush1.msra.mxu1 %v11086_v1  ;;  %5308 = vmatprep.subr.mxu0 %v13570_v45 }
 0xe08   :  { %5596 = vmatprep.subr.mxu1 %v11090_v3  ;;  %5311 = vmatpush1.msra.mxu0 %v13571_v25 }
 0xe09   :  { %5598 = vmatpush1.msra.mxu1 %v11104_v6  ;;  %5314 = vmatprep.subr.mxu0 %v13572_v26 }
 0xe0a   :  { %5600 = vmatprep.subr.mxu1 %v11112_v10  ;;  %5317 = vmatpush1.msra.mxu0 %v13573_v63 }
 0xe0b   :  { %5602 = vmatpush1.msra.mxu1 %v11126_v16  ;;  %5320 = vmatprep.subr.mxu0 %v13574_v35 }
 0xe0c   :  { %5604 = vmatprep.subr.mxu1 %v11145_v8  ;;  %5323 = vmatpush1.msra.mxu0 %v13575_v0 }
 0xe0d   :  { %5356 = vmatprep.mubr.f32.mxu0 %v13543_v12  ;;  %5606 = vmatpush1.msra.mxu1 %v11168_v28 }
 0xe0e   :  { %5359 = vmatmul.mubr.f32.vlgmr.msra.gmra.mxu0 %v5098_v60  ;;  %5474 = vmatprep.subr.mxu0 %v13576_v30  ;;  %v13709_v60 = vld [vmem:[#allocation44_spill] sm:$0xff] }
 0xe0f   :  { %5608 = vmatprep.subr.mxu1 %v11182_v33  ;;  %5478 = vmatpush1.msra.mxu0 %v13577_v38 }
 0xe10   :  { %5610 = vmatpush1.msra.mxu1 %v11195_v39  ;;  %5482 = vmatprep.subr.mxu0 %v13578_v11 }
 0xe11   :  { %5612 = vmatprep.subr.mxu1 %v11204_v43  ;;  %5486 = vmatpush1.msra.mxu0 %v13579_v59 }
 0xe12   :  { %5614 = vmatpush1.msra.mxu1 %v11211_v50  ;;  %5490 = vmatprep.subr.mxu0 %v13580_v55 }
 0xe13   :  { %5616 = vmatprep.subr.mxu1 %v11235_v61  ;;  %5494 = vmatpush1.msra.mxu0 %v13581_v58 }
 0xe14   :  { %5618 = vmatpush1.msra.mxu1 %v11249_v4  ;;  %5498 = vmatprep.subr.mxu0 %v13582_v7 }
 0xe15   :  { %5620 = vmatprep.subr.mxu1 %v11256_v18  ;;  %5502 = vmatpush1.msra.mxu0 %v13583_v37 }
 0xe16   :  { %5622 = vmatpush1.msra.mxu1 %v11263_v17  ;;  %5655 = vmatprep.mubr.f32.mxu1 %v13543_v12 }
 0xe17   :  { %5506 = vmatprep.subr.mxu0 %v13693_v46  ;;  %5657 = vmatmul.mubr.f32.vlgmr.msra.gmra.mxu1 %v12049_v15 }
 0xe18   :  { %5510 = vmatpush1.msra.mxu0 %v13694_v24  ;;  %5567 = vmatprep.mubr.f32.mxu0 %v13543_v12 }
 0xe19   :  { %5514 = vmatprep.subr.mxu0 %v13695_v57  ;;  %5836 = vmatprep.subr.mxu1 %v13696_v21 }
 0xe1a   :  { %5518 = vmatpush1.msra.mxu0 %v13697_v62  ;;  %5842 = vmatpush1.msra.mxu1 %v13698_v34 }
 0xe1b   :  { %5522 = vmatprep.subr.mxu0 %v13699_v47  ;;  %5848 = vmatprep.subr.mxu1 %v13700_v13 }
 0xe1c   :  { %5526 = vmatpush1.msra.mxu0 %v13701_v44  ;;  %5854 = vmatpush1.msra.mxu1 %v13702_v2  ;;  %v5010_v44 = vrot.slane %v13691_v40, 4 }
 0xe1d   :  { %5530 = vmatprep.subr.mxu0 %v13703_v48  ;;  %5860 = vmatprep.subr.mxu1 %v13704_v54 }
 0xe1e   :  { %5534 = vmatpush1.msra.mxu0 %v13705_v53  ;;  %5866 = vmatpush1.msra.mxu1 %v13706_v20 }
 0xe1f   :  { %5569 = vmatmul.mubr.f32.vlgmr.msra.gmra.mxu0 %v12049_v15  ;;  %5872 = vmatprep.subr.mxu1 %v13707_v52  ;;  %v13713_v15 = vld [vmem:[#allocation49_spill] sm:$0xff] }
 0xe20   :  { %5878 = vmatpush1.msra.mxu1 %v13708_v41  ;;  %5740 = vmatprep.subr.mxu0 %v13568_v22 }
 0xe21   :  { %5884 = vmatprep.subr.mxu1 %v13709_v60  ;;  %5742 = vmatpush1.msra.mxu0 %v11086_v1  ;;  %v13715_v60 = vld [vmem:[#allocation51_spill] sm:$0xff] }
 0xe22   :  { %5890 = vmatpush1.msra.mxu1 %v13710_v29  ;;  %5744 = vmatprep.subr.mxu0 %v11090_v3  ;;  %v13716_v29 = vld [vmem:[#allocation52_spill] sm:$0xff] }
 0xe23   :  { %5896 = vmatprep.subr.mxu1 %v13711_v14  ;;  %5746 = vmatpush1.msra.mxu0 %v11104_v6 }
 0xe24   :  { %5902 = vmatpush1.msra.mxu1 %v13712_v49  ;;  %5748 = vmatprep.subr.mxu0 %v11112_v10 }
 0xe25   :  { %5908 = vmatprep.subr.mxu1 %v13713_v15  ;;  %5750 = vmatpush1.msra.mxu0 %v11126_v16 }
 0xe26   :  { %5914 = vmatpush1.msra.mxu1 %v13714_v5  ;;  %5752 = vmatprep.subr.mxu0 %v11145_v8 }
 0xe27   :  { %5920 = vmatprep.subr.mxu1 %v13715_v60  ;;  %5754 = vmatpush1.msra.mxu0 %v11168_v28  ;;  %v13718_v60 = vld [vmem:[#allocation53_spill] sm:$0xff] }
 0xe28   :  { %5926 = vmatpush1.msra.mxu1 %v13716_v29  ;;  %5756 = vmatprep.subr.mxu0 %v11182_v33  ;;  %v13717_v29 = vld [vmem:[#allocation13_spill] sm:$0xff]  ;;  %v5009_v5 = vrot.slane %v13718_v60, 4 }
 0xe29   :  { %5959 = vmatprep.mubr.f32.mxu1 %v13543_v12  ;;  %6089 = vmatprep.subr.mxu1 %v13568_v22 }
 0xe2a   :  { %5758 = vmatpush1.msra.mxu0 %v11195_v39  ;;  %5803 = vmatprep.mubr.f32.mxu0 %v13543_v12 }
 0xe2b   :  { %5760 = vmatprep.subr.mxu0 %v11204_v43 }
 0xe2c   :  { %5762 = vmatpush1.msra.mxu0 %v11211_v50 }
 0xe2d   :  { %5764 = vmatprep.subr.mxu0 %v11235_v61 }
 0xe2e   :  { %5766 = vmatpush1.msra.mxu0 %v11249_v4 }
 0xe2f   :  { %5768 = vmatprep.subr.mxu0 %v11256_v18 }
 0xe30   :  { %5770 = vmatpush1.msra.mxu0 %v11263_v17 }
 0xe31   :  { %5985 = vmatprep.subr.mxu0 %v13717_v29 }
 0xeb5   :  { %v5255_v14 = vpop.f32.mrf.mxu1 }
 0xeb7   :  { %v5257_v20 = vpop.f32.mrf.mxu1 }
 0xebd   :  { %v5103_v15 = vpop.f32.mrf.mxu0 }
 0xebe   :  { %v5104_v49 = vadd.f32 %v5103_v15, %v5009_v5 }
 0xebf   :  { %v5105_v52 = vpop.f32.mrf.mxu0 }
 0xec0   :  { %v5256_v41 = vadd.f32 %v5255_v14, %v5104_v49  ;;  %v5106_v13 = vadd.f32 %v5105_v52, %v5010_v44 }
 0xec2   :  { %v5258_v34 = vadd.f32 %v5257_v20, %v5106_v13 }
 0xec5   :  { %v5450_v48 = vpop.f32.mrf.mxu1 }
 0xec7   :  { %v5452_v21 = vpop.f32.mrf.mxu1 }
 0xece   :  { %v5360_v53 = vpop.f32.mrf.mxu0 }
 0xecf   :  { %v5361_v54 = vadd.f32 %v5360_v53, %v5256_v41 }
 0xed0   :  { %v5362_v47 = vpop.f32.mrf.mxu0 }
 0xed1   :  { %v5451_v2 = vadd.f32 %v5450_v48, %v5361_v54  ;;  %v5363_v62 = vadd.f32 %v5362_v47, %v5258_v34 }
 0xed3   :  { %v5453_v24 = vadd.f32 %v5452_v21, %v5363_v62 }
 0xed7   :  { %v5658_v29 = vpop.f32.mrf.mxu1 }
 0xed9   :  { %v5660_v49 = vpop.f32.mrf.mxu1 }
 0xedf   :  { %v5570_v57 = vpop.f32.mrf.mxu0 }
 0xee0   :  { %v5571_v60 = vadd.f32 %v5570_v57, %v5451_v2 }
 0xee1   :  { %v5572_v5 = vpop.f32.mrf.mxu0 }
 0xee2   :  { %v5659_v15 = vadd.f32 %v5658_v29, %v5571_v60  ;;  %v5573_v14 = vadd.f32 %v5572_v5, %v5453_v24 }
 0xee4   :  { %v5661_v46 = vadd.f32 %v5660_v49, %v5573_v14  ;;  %v9470_v48 = vmul.f32 -1.442695, %v5659_v15  ;;  %v13720_v49 = vld [vmem:[#allocation30_spill] sm:$0xff] }
 0xee6   :  { %10546 = vtanh.f32 %v5661_v46  ;;  %v9471_v2 = vmul.f32 -1.442695, %v5661_v46 }
 0xee7   :  { %10548 = vpow2.f32 %v9470_v48  ;;  %v13722_v48 = vld [vmem:[#allocation34_spill] sm:$0xff] }
 0xef3   :  { %v10547_v53 = vpop.eup %10546 }
 0xef4   :  { %5678 = vrot.lane.b32.xlu1 %v10547_v53, %s10656_s5  ;;  %v10549_v40 = vpop.eup %10548  ;;  %v13721_v53 = vld [vmem:[#allocation31_spill] sm:$0xff] }
 0xef5   :  { %v5666_v44 = vadd.f32 1.0, %v10549_v40  ;;  %v13723_v40 = vld [vmem:[#allocation15_spill] sm:$0xff] }
 0xef7   :  { %10550 = vrcp.f32 %v5666_v44  ;;  %v13724_v44 = vld [vmem:[#allocation36_spill] sm:$0xff] }
 0xf04   :  { %v10551_v34 = vpop.eup %10550 }
 0xf05   :  { %v5676_v57 = vmul.f32 %v10551_v34, %v12041_v51 }
 0xf66   :  { %v5679_v47 = vpop.permute.xlu1 %5678 }
 0xf67   :  { %v5681_v13 = vmul.f32 %v10551_v34, %v5679_v47  ;;  %v13725_v34 = vld [vmem:[#allocation20_spill] sm:$0xff] }
 0xf68   :  { %v13726_v47 = vld [vmem:[#allocation40_spill] sm:$0xff] }
 0xf69   :  { %5683 = vrot.lane.b32.xlu0 %v5681_v13, %s10656_s5  ;;  %v13727_v13 = vld [vmem:[#allocation22_spill] sm:$0xff] }
 0xfdb   :  { %v5684_v21 = vpop.permute.xlu0 %5683 }
 0xfdc   :  { %v12162_v24 = vadd.f32 %v5684_v21, %v5676_v57  ;;  %v13728_v57 = vld [vmem:[#allocation42_spill] sm:$0xff]  ;;  %v13729_v21 = vld [vmem:[#allocation24_spill] sm:$0xff] }
 0xfde   :  { %10552 = vtanh.f32 %v12162_v24 }
 0xfdf   :  { %10554 = vpow2.f32 %v9471_v2  ;;  %v13731_v2 = vld [vmem:[#allocation26_spill] sm:$0xff] }
 0xfeb   :  { %v10553_v62 = vpop.eup %10552 }
 0xfec   :  { %5689 = vrot.lane.b32.xlu1 %v10553_v62, %s10656_s5  ;;  %v10555_v54 = vpop.eup %10554  ;;  %v13730_v62 = vld [vmem:[#allocation43_spill] sm:$0xff] }
 0xfed   :  { %v5672_v20 = vadd.f32 1.0, %v10555_v54  ;;  %v13732_v54 = vld [vmem:[#allocation45_spill] sm:$0xff] }
 0xfef   :  { %10556 = vrcp.f32 %v5672_v20  ;;  %v13733_v20 = vld [vmem:[#allocation33_spill] sm:$0xff] }
 0xffc   :  { %v10557_v52 = vpop.eup %10556 }
0x105e   :  { %v5690_v41 = vpop.permute.xlu1 %5689 }
0x105f   :  { %v12166_v29 = vmul.f32 %v10557_v52, %v5690_v41  ;;  %v13734_v52 = vld [vmem:[#allocation39_spill] sm:$0xff]  ;;  %v13735_v41 = vld [vmem:[#allocation41_spill] sm:$0xff] }
0x1061   :  { %13719 = vst [vmem:[#allocation32_spill] sm:$0xff] %v12166_v29  ;;  %v5721_v51 = vsel %vm1483_vm9, %v12166_v29, 0 }
0x1062   :  { %v12170_v60 = vand.u32 4294901760, %v5721_v51 }
0x1064   :  { %v5805_v5 = vsub.f32 %v5721_v51, %v12170_v60  ;;  %5961 = vmatmul.mubr.f32.vlgmr.msra.gmra.mxu1 %v12170_v60  ;;  %v13736_v51 = vld [vmem:[#allocation44_spill] sm:$0xff] }
0x1065   :  { %6091 = vmatpush1.msra.mxu1 %v11086_v1  ;;  %6152 = vmatprep.mubr.f32.mxu1 %v13543_v12 }
0x1066   :  { %v5806_v46 = vand.u32 4294901760, %v5805_v5  ;;  %6093 = vmatprep.subr.mxu1 %v11090_v3 }
0x1067   :  { %6095 = vmatpush1.msra.mxu1 %v11104_v6 }
0x1068   :  { %6097 = vmatprep.subr.mxu1 %v11112_v10  ;;  %v5807_v15 = vsub.f32 %v5805_v5, %v5806_v46 }
0x1069   :  { %6099 = vmatpush1.msra.mxu1 %v11126_v16 }
0x106a   :  { %6101 = vmatprep.subr.mxu1 %v11145_v8  ;;  %v5808_v14 = vand.u32 4294901760, %v5807_v15  ;;  %v13739_v15 = vld [vmem:[#allocation48_spill] sm:$0xff] }
0x106b   :  { %6103 = vmatpush1.msra.mxu1 %v11168_v28 }
0x106c   :  { %6105 = vmatprep.subr.mxu1 %v11182_v33  ;;  %5809 = vmatmul.mubr.f32.vlgmr.msra.gmra.mxu0 %v5808_v14  ;;  %v13741_v14 = vld [vmem:[#allocation50_spill] sm:$0xff] }
0x106d   :  { %5988 = vmatpush1.msra.mxu0 %v11102_v23  ;;  %6107 = vmatpush1.msra.mxu1 %v11195_v39 }
0x106e   :  { %5991 = vmatprep.subr.mxu0 %v11110_v9  ;;  %6109 = vmatprep.subr.mxu1 %v11204_v43 }
0x106f   :  { %5994 = vmatpush1.msra.mxu0 %v11124_v19  ;;  %6111 = vmatpush1.msra.mxu1 %v11211_v50 }
0x1070   :  { %5997 = vmatprep.subr.mxu0 %v11136_v31  ;;  %6113 = vmatprep.subr.mxu1 %v11235_v61 }
0x1071   :  { %6000 = vmatpush1.msra.mxu0 %v11156_v27  ;;  %6115 = vmatpush1.msra.mxu1 %v11249_v4 }
0x1072   :  { %6003 = vmatprep.subr.mxu0 %v11180_v32  ;;  %6117 = vmatprep.subr.mxu1 %v11256_v18 }
0x1073   :  { %6006 = vmatpush1.msra.mxu0 %v11202_v42  ;;  %6119 = vmatpush1.msra.mxu1 %v11263_v17 }
0x1074   :  { %6009 = vmatprep.subr.mxu0 %v11222_v56  ;;  %6156 = vmatmul.mubr.f32.vlgmr.msra.gmra.mxu1 %v5806_v46  ;;  %v13738_v46 = vld [vmem:[#allocation47_spill] sm:$0xff] }
0x1075   :  { %6299 = vmatprep.subr.mxu1 %v13568_v22  ;;  %6012 = vmatpush1.msra.mxu0 %v13569_v36 }
0x1076   :  { %6301 = vmatpush1.msra.mxu1 %v11086_v1  ;;  %6015 = vmatprep.subr.mxu0 %v13570_v45 }
0x1077   :  { %6303 = vmatprep.subr.mxu1 %v11090_v3  ;;  %6018 = vmatpush1.msra.mxu0 %v13571_v25 }
0x1078   :  { %6305 = vmatpush1.msra.mxu1 %v11104_v6  ;;  %6021 = vmatprep.subr.mxu0 %v13572_v26 }
0x1079   :  { %6307 = vmatprep.subr.mxu1 %v11112_v10  ;;  %6024 = vmatpush1.msra.mxu0 %v13573_v63 }
0x107a   :  { %6309 = vmatpush1.msra.mxu1 %v11126_v16  ;;  %6027 = vmatprep.subr.mxu0 %v13574_v35 }
0x107b   :  { %6311 = vmatprep.subr.mxu1 %v11145_v8  ;;  %6030 = vmatpush1.msra.mxu0 %v13575_v0 }
0x107c   :  { %6063 = vmatprep.mubr.f32.mxu0 %v13543_v12  ;;  %6313 = vmatpush1.msra.mxu1 %v11168_v28 }
0x107d   :  { %6066 = vmatmul.mubr.f32.vlgmr.msra.gmra.mxu0 %v5805_v5  ;;  %6181 = vmatprep.subr.mxu0 %v13576_v30  ;;  %v13737_v5 = vld [vmem:[#allocation46_spill] sm:$0xff] }
0x107e   :  { %6315 = vmatprep.subr.mxu1 %v11182_v33  ;;  %6185 = vmatpush1.msra.mxu0 %v13577_v38 }
0x107f   :  { %6317 = vmatpush1.msra.mxu1 %v11195_v39  ;;  %6189 = vmatprep.subr.mxu0 %v13578_v11 }
0x1080   :  { %6319 = vmatprep.subr.mxu1 %v11204_v43  ;;  %6193 = vmatpush1.msra.mxu0 %v13579_v59 }
0x1081   :  { %6321 = vmatpush1.msra.mxu1 %v11211_v50  ;;  %6197 = vmatprep.subr.mxu0 %v13580_v55 }
0x1082   :  { %6323 = vmatprep.subr.mxu1 %v11235_v61  ;;  %6201 = vmatpush1.msra.mxu0 %v13581_v58 }
0x1083   :  { %6325 = vmatpush1.msra.mxu1 %v11249_v4  ;;  %6205 = vmatprep.subr.mxu0 %v13582_v7 }
0x1084   :  { %6327 = vmatprep.subr.mxu1 %v11256_v18  ;;  %6209 = vmatpush1.msra.mxu0 %v13583_v37 }
0x1085   :  { %6329 = vmatpush1.msra.mxu1 %v11263_v17  ;;  %6362 = vmatprep.mubr.f32.mxu1 %v13543_v12 }
0x1086   :  { %6213 = vmatprep.subr.mxu0 %v13720_v49  ;;  %6364 = vmatmul.mubr.f32.vlgmr.msra.gmra.mxu1 %v12170_v60 }
0x1087   :  { %6217 = vmatpush1.msra.mxu0 %v13721_v53  ;;  %6274 = vmatprep.mubr.f32.mxu0 %v13543_v12 }
0x1088   :  { %6221 = vmatprep.subr.mxu0 %v13722_v48  ;;  %6541 = vmatprep.subr.mxu1 %v13723_v40  ;;  %v13742_v40 = vld [vmem:[#allocation51_spill] sm:$0xff] }
0x1089   :  { %6225 = vmatpush1.msra.mxu0 %v13724_v44  ;;  %6547 = vmatpush1.msra.mxu1 %v13725_v34  ;;  %v13743_v34 = vld [vmem:[#allocation52_spill] sm:$0xff] }
0x108a   :  { %6229 = vmatprep.subr.mxu0 %v13726_v47  ;;  %6553 = vmatprep.subr.mxu1 %v13727_v13  ;;  %v13744_v13 = vld [vmem:[#allocation13_spill] sm:$0xff] }
0x108b   :  { %6233 = vmatpush1.msra.mxu0 %v13728_v57  ;;  %6559 = vmatpush1.msra.mxu1 %v13729_v21 }
0x108c   :  { %6237 = vmatprep.subr.mxu0 %v13730_v62  ;;  %6565 = vmatprep.subr.mxu1 %v13731_v2  ;;  %v13745_v2 = vld [vmem:[#allocation57_spill] sm:$0xff] }
0x108d   :  { %6241 = vmatpush1.msra.mxu0 %v13732_v54  ;;  %6571 = vmatpush1.msra.mxu1 %v13733_v20 }
0x108e   :  { %6276 = vmatmul.mubr.f32.vlgmr.msra.gmra.mxu0 %v12170_v60  ;;  %6577 = vmatprep.subr.mxu1 %v13734_v52  ;;  %v13740_v60 = vld [vmem:[#allocation49_spill] sm:$0xff] }
0x108f   :  { %6583 = vmatpush1.msra.mxu1 %v13735_v41  ;;  %6445 = vmatprep.subr.mxu0 %v13568_v22 }
0x1090   :  { %6589 = vmatprep.subr.mxu1 %v13736_v51  ;;  %6447 = vmatpush1.msra.mxu0 %v11086_v1 }
0x1091   :  { %6595 = vmatpush1.msra.mxu1 %v13737_v5  ;;  %6449 = vmatprep.subr.mxu0 %v11090_v3 }
0x1092   :  { %6601 = vmatprep.subr.mxu1 %v13738_v46  ;;  %6451 = vmatpush1.msra.mxu0 %v11104_v6 }
0x1093   :  { %6607 = vmatpush1.msra.mxu1 %v13739_v15  ;;  %6453 = vmatprep.subr.mxu0 %v11112_v10 }
0x1094   :  { %6613 = vmatprep.subr.mxu1 %v13740_v60  ;;  %6455 = vmatpush1.msra.mxu0 %v11126_v16 }
0x1095   :  { %6619 = vmatpush1.msra.mxu1 %v13741_v14  ;;  %6457 = vmatprep.subr.mxu0 %v11145_v8 }
0x1096   :  { %6625 = vmatprep.subr.mxu1 %v13742_v40  ;;  %6459 = vmatpush1.msra.mxu0 %v11168_v28  ;;  %v13746_v40 = vld [vmem:[#allocation58_spill] sm:$0xff] }
0x1097   :  { %6631 = vmatpush1.msra.mxu1 %v13743_v34  ;;  %6461 = vmatprep.subr.mxu0 %v11182_v33 }
0x1098   :  { %6664 = vmatprep.mubr.f32.mxu1 %v13543_v12  ;;  %6794 = vmatprep.subr.mxu1 %v13568_v22 }
0x1099   :  { %6463 = vmatpush1.msra.mxu0 %v11195_v39  ;;  %6508 = vmatprep.mubr.f32.mxu0 %v13543_v12 }
0x109a   :  { %6465 = vmatprep.subr.mxu0 %v11204_v43 }
0x109b   :  { %6467 = vmatpush1.msra.mxu0 %v11211_v50 }
0x109c   :  { %6469 = vmatprep.subr.mxu0 %v11235_v61 }
0x109d   :  { %6471 = vmatpush1.msra.mxu0 %v11249_v4 }
0x109e   :  { %6473 = vmatprep.subr.mxu0 %v11256_v18 }
0x109f   :  { %6475 = vmatpush1.msra.mxu0 %v11263_v17 }
0x10a0   :  { %6690 = vmatprep.subr.mxu0 %v13744_v13 }
0x1124   :  { %v5962_v52 = vpop.f32.mrf.mxu1 }
0x1126   :  { %v5964_v5 = vpop.f32.mrf.mxu1 }
0x112c   :  { %v5810_v21 = vpop.f32.mrf.mxu0 }
0x112d   :  { %v5811_v20 = vadd.f32 %v5810_v21, %v13745_v2 }
0x112e   :  { %v5812_v51 = vpop.f32.mrf.mxu0 }
0x112f   :  { %v5963_v41 = vadd.f32 %v5962_v52, %v5811_v20  ;;  %v5813_v34 = vadd.f32 %v5812_v51, %v13746_v40 }
0x1131   :  { %v5965_v54 = vadd.f32 %v5964_v5, %v5813_v34 }
0x1134   :  { %v6157_v60 = vpop.f32.mrf.mxu1 }
0x1136   :  { %v6159_v57 = vpop.f32.mrf.mxu1 }
0x113d   :  { %v6067_v46 = vpop.f32.mrf.mxu0 }
0x113e   :  { %v6068_v15 = vadd.f32 %v6067_v46, %v5963_v41 }
0x113f   :  { %v6069_v29 = vpop.f32.mrf.mxu0 }
0x1140   :  { %v6158_v14 = vadd.f32 %v6157_v60, %v6068_v15  ;;  %v6070_v62 = vadd.f32 %v6069_v29, %v5965_v54 }
0x1142   :  { %v6160_v48 = vadd.f32 %v6159_v57, %v6070_v62 }
0x1146   :  { %v6365_v47 = vpop.f32.mrf.mxu1 }
0x1148   :  { %v6367_v20 = vpop.f32.mrf.mxu1 }
0x114e   :  { %v6277_v44 = vpop.f32.mrf.mxu0 }
0x114f   :  { %v6278_v13 = vadd.f32 %v6277_v44, %v6158_v14 }
0x1150   :  { %v6279_v53 = vpop.f32.mrf.mxu0 }
0x1151   :  { %v6366_v21 = vadd.f32 %v6365_v47, %v6278_v13  ;;  %v6280_v2 = vadd.f32 %v6279_v53, %v6160_v48 }
0x1153   :  { %v6368_v52 = vadd.f32 %v6367_v20, %v6280_v2  ;;  %v9474_v41 = vmul.f32 -1.442695, %v6366_v21 }
0x1155   :  { %10558 = vtanh.f32 %v6368_v52 }
0x1156   :  { %10560 = vpow2.f32 %v9474_v41 }
0x1162   :  { %v10559_v49 = vpop.eup %10558 }
0x1163   :  { %6385 = vrot.lane.b32.xlu0 %v10559_v49, %s10656_s5  ;;  %v10561_v51 = vpop.eup %10560  ;;  %v9475_v49 = vmul.f32 -1.442695, %v6368_v52 }
0x1164   :  { %v6373_v46 = vadd.f32 1.0, %v10561_v51 }
0x1166   :  { %10562 = vrcp.f32 %v6373_v46 }
0x1173   :  { %v10563_v29 = vpop.eup %10562 }
0x1174   :  { %v6383_v44 = vmul.f32 %v10563_v29, %v12162_v24 }
0x11d5   :  { %v6386_v54 = vpop.permute.xlu0 %6385 }
0x11d6   :  { %v6388_v5 = vmul.f32 %v10563_v29, %v6386_v54 }
0x11d8   :  { %6390 = vrot.lane.b32.xlu1 %v6388_v5, %s10656_s5 }
0x124a   :  { %v6391_v47 = vpop.permute.xlu1 %6390 }
0x124b   :  { %v12283_v53 = vadd.f32 %v6391_v47, %v6383_v44 }
0x124d   :  { %10564 = vtanh.f32 %v12283_v53 }
0x124e   :  { %10566 = vpow2.f32 %v9475_v49 }
0x125a   :  { %v10565_v48 = vpop.eup %10564 }
0x125b   :  { %6396 = vrot.lane.b32.xlu0 %v10565_v48, %s10656_s5  ;;  %v10567_v57 = vpop.eup %10566 }
0x125c   :  { %v6379_v62 = vadd.f32 1.0, %v10567_v57 }
0x125e   :  { %10568 = vrcp.f32 %v6379_v62 }
0x126b   :  { %v10569_v2 = vpop.eup %10568 }
0x12cd   :  { %v6397_v15 = vpop.permute.xlu0 %6396 }
0x12ce   :  { %v12287_v60 = vmul.f32 %v10569_v2, %v6397_v15 }
0x12d0   :  { %v6426_v24 = vsel %vm1483_vm9, %v12287_v60, 0 }
0x12d1   :  { %v12291_v14 = vand.u32 4294901760, %v6426_v24 }
0x12d3   :  { %v6510_v34 = vsub.f32 %v6426_v24, %v12291_v14  ;;  %6666 = vmatmul.mubr.f32.vlgmr.msra.gmra.mxu1 %v12291_v14 }
0x12d4   :  { %6796 = vmatpush1.msra.mxu1 %v11086_v1  ;;  %6857 = vmatprep.mubr.f32.mxu1 %v13543_v12 }
0x12d5   :  { %v6511_v13 = vand.u32 4294901760, %v6510_v34  ;;  %6798 = vmatprep.subr.mxu1 %v11090_v3 }
0x12d6   :  { %6800 = vmatpush1.msra.mxu1 %v11104_v6 }
0x12d7   :  { %6802 = vmatprep.subr.mxu1 %v11112_v10  ;;  %v6512_v21 = vsub.f32 %v6510_v34, %v6511_v13 }
0x12d8   :  { %6804 = vmatpush1.msra.mxu1 %v11126_v16 }
0x12d9   :  { %6806 = vmatprep.subr.mxu1 %v11145_v8  ;;  %v6513_v20 = vand.u32 4294901760, %v6512_v21 }
0x12da   :  { %6808 = vmatpush1.msra.mxu1 %v11168_v28 }
0x12db   :  { %6810 = vmatprep.subr.mxu1 %v11182_v33  ;;  %6514 = vmatmul.mubr.f32.vlgmr.msra.gmra.mxu0 %v6513_v20 }
0x12dc   :  { %6693 = vmatpush1.msra.mxu0 %v11102_v23  ;;  %6812 = vmatpush1.msra.mxu1 %v11195_v39  ;;  %v13749_v23 = vld [vmem:[#allocation34_spill] sm:$0xff] }
0x12dd   :  { %6696 = vmatprep.subr.mxu0 %v11110_v9  ;;  %6814 = vmatprep.subr.mxu1 %v11204_v43  ;;  %v13751_v9 = vld [vmem:[#allocation40_spill] sm:$0xff] }
0x12de   :  { %6699 = vmatpush1.msra.mxu0 %v11124_v19  ;;  %6816 = vmatpush1.msra.mxu1 %v11211_v50  ;;  %v13753_v19 = vld [vmem:[#allocation43_spill] sm:$0xff] }
0x12df   :  { %6702 = vmatprep.subr.mxu0 %v11136_v31  ;;  %6818 = vmatprep.subr.mxu1 %v11235_v61  ;;  %v13755_v31 = vld [vmem:[#allocation57_spill] sm:$0xff] }
0x12e0   :  { %6705 = vmatpush1.msra.mxu0 %v11156_v27  ;;  %6820 = vmatpush1.msra.mxu1 %v11249_v4 }
0x12e1   :  { %6708 = vmatprep.subr.mxu0 %v11180_v32  ;;  %6822 = vmatprep.subr.mxu1 %v11256_v18 }
0x12e2   :  { %6711 = vmatpush1.msra.mxu0 %v11202_v42  ;;  %6824 = vmatpush1.msra.mxu1 %v11263_v17 }
0x12e3   :  { %6714 = vmatprep.subr.mxu0 %v11222_v56  ;;  %6861 = vmatmul.mubr.f32.vlgmr.msra.gmra.mxu1 %v6511_v13 }
0x12e4   :  { %7004 = vmatprep.subr.mxu1 %v13568_v22  ;;  %6717 = vmatpush1.msra.mxu0 %v13569_v36 }
0x12e5   :  { %7006 = vmatpush1.msra.mxu1 %v11086_v1  ;;  %6720 = vmatprep.subr.mxu0 %v13570_v45  ;;  %v13747_v1 = vld [vmem:[#allocation30_spill] sm:$0xff] }
0x12e6   :  { %7008 = vmatprep.subr.mxu1 %v11090_v3  ;;  %6723 = vmatpush1.msra.mxu0 %v13571_v25  ;;  %v13748_v3 = vld [vmem:[#allocation31_spill] sm:$0xff] }
0x12e7   :  { %7010 = vmatpush1.msra.mxu1 %v11104_v6  ;;  %6726 = vmatprep.subr.mxu0 %v13572_v26  ;;  %v13750_v6 = vld [vmem:[#allocation36_spill] sm:$0xff] }
0x12e8   :  { %7012 = vmatprep.subr.mxu1 %v11112_v10  ;;  %6729 = vmatpush1.msra.mxu0 %v13573_v63  ;;  %v13752_v10 = vld [vmem:[#allocation42_spill] sm:$0xff] }
0x12e9   :  { %7014 = vmatpush1.msra.mxu1 %v11126_v16  ;;  %6732 = vmatprep.subr.mxu0 %v13574_v35  ;;  %v13754_v16 = vld [vmem:[#allocation45_spill] sm:$0xff] }
0x12ea   :  { %7016 = vmatprep.subr.mxu1 %v11145_v8  ;;  %6735 = vmatpush1.msra.mxu0 %v13575_v0  ;;  %v6421_v8 = vrot.slane %v13755_v31, 4  ;;  %v7131_v31 = vld [vmem:[%s13398_s7 + $0x38] sm:$0xff] }
0x12eb   :  { %6768 = vmatprep.mubr.f32.mxu0 %v13543_v12  ;;  %7018 = vmatpush1.msra.mxu1 %v11168_v28 }
0x12ec   :  { %6771 = vmatmul.mubr.f32.vlgmr.msra.gmra.mxu0 %v6510_v34  ;;  %6886 = vmatprep.subr.mxu0 %v13576_v30 }
0x12ed   :  { %7020 = vmatprep.subr.mxu1 %v11182_v33  ;;  %6890 = vmatpush1.msra.mxu0 %v13577_v38 }
0x12ee   :  { %7022 = vmatpush1.msra.mxu1 %v11195_v39  ;;  %6894 = vmatprep.subr.mxu0 %v13578_v11 }
0x12ef   :  { %7024 = vmatprep.subr.mxu1 %v11204_v43  ;;  %6898 = vmatpush1.msra.mxu0 %v13579_v59 }
0x12f0   :  { %7026 = vmatpush1.msra.mxu1 %v11211_v50  ;;  %6902 = vmatprep.subr.mxu0 %v13580_v55  ;;  %v1456_v55 = vld [vmem:[%s13392_s1] sm:$0xf] }
0x12f1   :  { %7028 = vmatprep.subr.mxu1 %v11235_v61  ;;  %6906 = vmatpush1.msra.mxu0 %v13581_v58  ;;  %v9449_v58 = vadd.s32 4294967295, %v1456_v55 }
0x12f2   :  { %7030 = vmatpush1.msra.mxu1 %v11249_v4  ;;  %6910 = vmatprep.subr.mxu0 %v13582_v7  ;;  %v6422_v4 = vrot.slane %v13746_v40, 4  ;;  %v1458_v7 = vsub.s32 8, %v1456_v55  ;;  %v7126_v55 = vld [vmem:[%s13398_s7 + $0x10] sm:$0xff] }
0x12f3   :  { %7032 = vmatprep.subr.mxu1 %v11256_v18  ;;  %6914 = vmatpush1.msra.mxu0 %v13583_v37  ;;  %vm2164_vm10 = vcmp.eq.s32.totalorder %v9449_v58, 0  ;;  %vm3576_vm12 = vcmp.eq.s32.totalorder %v9449_v58, 2  ;;  %vm4988_vm14 = vcmp.eq.s32.totalorder %v9449_v58, 4  ;;  %vm6400_vm0 = vcmp.eq.s32.totalorder %v9449_v58, 6 }
0x12f4   :  { %7034 = vmatpush1.msra.mxu1 %v11263_v17  ;;  %7067 = vmatprep.mubr.f32.mxu1 %v13543_v12  ;;  %vm2167_vm11 = vcmp.eq.s32.totalorder %v1458_v7, 0  ;;  %v9452_v37 = vsel %vm2164_vm10, 1.0, %v13543_v12  ;;  %vm3579_vm13 = vcmp.eq.s32.totalorder %v1458_v7, 2  ;;  %v9460_v51 = vsel %vm3576_vm12, 1.0, %v13543_v12 }
0x12f5   :  { %6918 = vmatprep.subr.mxu0 %v13747_v1  ;;  %7069 = vmatmul.mubr.f32.vlgmr.msra.gmra.mxu1 %v12291_v14  ;;  %v9453_v40 = vsel %vm2167_vm11, 1.0, %v13543_v12  ;;  %v9461_v46 = vsel %vm3579_vm13, 1.0, %v13543_v12  ;;  %vm4991_vm15 = vcmp.eq.s32.totalorder %v1458_v7, 4  ;;  %v9468_v54 = vsel %vm4988_vm14, 1.0, %v13543_v12 }
0x12f6   :  { %6922 = vmatpush1.msra.mxu0 %v13748_v3  ;;  %6979 = vmatprep.mubr.f32.mxu0 %v13543_v12  ;;  %v10446_v41 = vpack.i.bf16 %v9453_v40, %v9452_v37  ;;  %v10456_v29 = vpack.i.bf16 %v9461_v46, %v9460_v51  ;;  %v9469_v5 = vsel %vm4991_vm15, 1.0, %v13543_v12  ;;  %vm6403_vm1 = vcmp.eq.s32.totalorder %v1458_v7, 6  ;;  %v7125_v37 = vld [vmem:[%s13398_s7 + $0x8] sm:$0xff] }
0x12f7   :  { %6926 = vmatprep.subr.mxu0 %v13749_v23  ;;  %9936 = vmatprep.subr.mxu1 %v13543_v12  ;;  %v10466_v44 = vpack.i.bf16 %v9469_v5, %v9468_v54  ;;  %v9476_v47 = vsel %vm6400_vm0, 1.0, %v13543_v12  ;;  %v9477_v48 = vsel %vm6403_vm1, 1.0, %v13543_v12  ;;  %vm2869_vm2 = vcmp.eq.s32.totalorder %v9449_v58, 1 }
0x12f8   :  { %6930 = vmatpush1.msra.mxu0 %v13750_v6  ;;  %v10476_v49 = vpack.i.bf16 %v9477_v48, %v9476_v47  ;;  %vm2872_vm3 = vcmp.eq.s32.totalorder %v1458_v7, 1  ;;  %vm4281_vm4 = vcmp.eq.s32.totalorder %v9449_v58, 3  ;;  %vm4284_vm5 = vcmp.eq.s32.totalorder %v1458_v7, 3 }
0x12f9   :  { %6934 = vmatprep.subr.mxu0 %v13751_v9  ;;  %v9457_v34 = vsel %vm2872_vm3, 1.0, %v13543_v12  ;;  %v9464_v20 = vsel %vm4281_vm4, 1.0, %v13543_v12  ;;  %v9465_v1 = vsel %vm4284_vm5, 1.0, %v13543_v12  ;;  %vm5693_vm6 = vcmp.eq.s32.totalorder %v9449_v58, 5 }
0x12fa   :  { %6938 = vmatpush1.msra.mxu0 %v13752_v10  ;;  %vm5696_vm7 = vcmp.eq.s32.totalorder %v1458_v7, 5  ;;  %v10461_v3 = vpack.i.bf16 %v9465_v1, %v9464_v20  ;;  %v9472_v23 = vsel %vm5693_vm6, 1.0, %v13543_v12  ;;  %vm7105_vm8 = vcmp.eq.s32.totalorder %v9449_v58, 7 }
0x12fb   :  { %6942 = vmatprep.subr.mxu0 %v13753_v19  ;;  %v9473_v6 = vsel %vm5696_vm7, 1.0, %v13543_v12  ;;  %vm7108_vm10 = vcmp.eq.s32.totalorder %v1458_v7, 7  ;;  %v9480_v10 = vsel %vm7105_vm8, 1.0, %v13543_v12  ;;  %v12465_v7 = vand.u32 4294901760, %v7126_v55 }
0x12fc   :  { %6946 = vmatpush1.msra.mxu0 %v13754_v16  ;;  %v10471_v9 = vpack.i.bf16 %v9473_v6, %v9472_v23  ;;  %v9481_v19 = vsel %vm7108_vm10, 1.0, %v13543_v12  ;;  %v12478_v51 = vand.u32 4294901760, %v7125_v37  ;;  %vm10657_vm11 = vmmov 0  }
0x12fd   :  { %6981 = vmatmul.mubr.f32.vlgmr.msra.gmra.mxu0 %v12291_v14  ;;  %9917 = vmatprep.subr.mxu0 %v13543_v12  ;;  %v9456_v14 = vsel %vm2869_vm2, 1.0, %v13543_v12  ;;  %v10481_v16 = vpack.i.bf16 %v9481_v19, %v9480_v10  ;;  %v13756_v19 = vld [vmem:[#allocation11_spill] sm:$0xff]  ;;  %vm7705_vm13 = vcmask 1045504   ;;  %vm7701_vm14 = vcmask 834560  }
0x12fe   :  { %v10451_v21 = vpack.i.bf16 %v9457_v34, %v9456_v14  ;;  %9952 = vmatprep.mubr.msk.f32.mxu1 %vm10657_vm11, %v13543_v12  ;;  %9933 = vmatprep.mubr.msk.f32.mxu0 %vm10657_vm11, %v13543_v12  ;;  %vm1455_vm12 = vcmp.lt.s32.totalorder %v13756_v19, 32 }
0x1393   :  { %v6667_v32 = vpop.f32.mrf.mxu1 }
0x1395   :  { %v6669_v42 = vpop.f32.mrf.mxu1 }
0x139b   :  { %v6515_v27 = vpop.f32.mrf.mxu0 }
0x139c   :  { %v6516_v28 = vadd.f32 %v6515_v27, %v6421_v8  ;;  %v7130_v8 = vld [vmem:[%s13398_s7 + $0x30] sm:$0xff]  ;;  %v7129_v27 = vld [vmem:[%s13398_s7 + $0x28] sm:$0xff] }
0x139d   :  { %v6517_v39 = vpop.f32.mrf.mxu0 }
0x139e   :  { %v6668_v33 = vadd.f32 %v6667_v32, %v6516_v28  ;;  %v6518_v18 = vadd.f32 %v6517_v39, %v6422_v4  ;;  %v12403_v28 = vand.u32 4294901760, %v7131_v31  ;;  %v12405_v32 = vand.u32 4294901760, %v7130_v8  ;;  %v7128_v39 = vld [vmem:[%s13398_s7 + $0x20] sm:$0xff] }
0x13a0   :  { %v6670_v22 = vadd.f32 %v6669_v42, %v6518_v18  ;;  %v12412_v42 = vand.u32 4294901760, %v7128_v39  ;;  %9918 = vmatpush3.msra.mxu0 %v12403_v28 }
0x13a1   :  { %9919 = vmatprep.subr.mxu0 %v13543_v12 }
0x13a2   :  { %9920 = vmatpush3.msra.mxu0 %v12405_v32 }
0x13a3   :  { %v6862_v56 = vpop.f32.mrf.mxu1  ;;  %9921 = vmatprep.subr.mxu0 %v13543_v12 }
0x13a5   :  { %v6864_v45 = vpop.f32.mrf.mxu1 }
0x13ac   :  { %v6772_v43 = vpop.f32.mrf.mxu0 }
0x13ad   :  { %v6773_v50 = vadd.f32 %v6772_v43, %v6668_v33  ;;  %v12407_v33 = vand.u32 4294901760, %v7129_v27  ;;  %v12415_v43 = vsub.f32 %v7131_v31, %v12403_v28 }
0x13ae   :  { %v6774_v17 = vpop.f32.mrf.mxu0 }
0x13af   :  { %v6863_v61 = vadd.f32 %v6862_v56, %v6773_v50  ;;  %v6775_v36 = vadd.f32 %v6774_v17, %v6670_v22  ;;  %v12418_v50 = vsub.f32 %v7130_v8, %v12405_v32  ;;  %v12422_v56 = vsub.f32 %v7129_v27, %v12407_v33  ;;  %9922 = vmatpush3.msra.mxu0 %v12407_v33 }
0x13b0   :  { %v7244_v4 = vand.u32 4294901760, %v12415_v43  ;;  %9923 = vmatprep.subr.mxu0 %v13543_v12 }
0x13b1   :  { %v6865_v35 = vadd.f32 %v6864_v45, %v6775_v36  ;;  %v7251_v18 = vand.u32 4294901760, %v12418_v50  ;;  %v7258_v17 = vand.u32 4294901760, %v12422_v56  ;;  %9924 = vmatpush3.msra.mxu0 %v12412_v42 }
0x13b2   :  { %v7245_v36 = vsub.f32 %v12415_v43, %v7244_v4  ;;  %9925 = vmatprep.subr.mxu0 %v13543_v12 }
0x13b3   :  { %v7252_v45 = vsub.f32 %v12418_v50, %v7251_v18 }
0x13b5   :  { %v7070_v25 = vpop.f32.mrf.mxu1 }
0x13b7   :  { %v7072_v11 = vpop.f32.mrf.mxu1 }
0x13bd   :  { %v6982_v26 = vpop.f32.mrf.mxu0 }
0x13be   :  { %v6983_v63 = vadd.f32 %v6982_v26, %v6863_v61  ;;  %v12425_v61 = vsub.f32 %v7128_v39, %v12412_v42  ;;  %v7246_v26 = vand.u32 4294901760, %v7245_v36 }
0x13bf   :  { %v6984_v0 = vpop.f32.mrf.mxu0 }
0x13c0   :  { %v7071_v30 = vadd.f32 %v7070_v25, %v6983_v63  ;;  %v6985_v38 = vadd.f32 %v6984_v0, %v6865_v35  ;;  %v7265_v22 = vand.u32 4294901760, %v12425_v61  ;;  %v7259_v25 = vsub.f32 %v12422_v56, %v7258_v17  ;;  %9937 = vmatpush3.msra.mxu1 %v7246_v26 }
0x13c1   :  { %v7253_v63 = vand.u32 4294901760, %v7252_v45  ;;  %9938 = vmatprep.subr.mxu1 %v13543_v12 }
0x13c2   :  { %v12367_v59 = vadd.f32 %v7072_v11, %v6985_v38  ;;  %v9478_v57 = vmul.f32 -1.442695, %v7071_v30  ;;  %v7266_v35 = vsub.f32 %v12425_v61, %v7265_v22  ;;  %v7260_v0 = vand.u32 4294901760, %v7259_v25  ;;  %v7127_v38 = vld [vmem:[%s13398_s7 + $0x18] sm:$0xff] }
0x13c3   :  { %9939 = vmatpush3.msra.mxu1 %v7253_v63  ;;  %v12457_v11 = vand.u32 4294901760, %v7127_v38 }
0x13c4   :  { %10570 = vtanh.f32 %v12367_v59  ;;  %v7267_v30 = vand.u32 4294901760, %v7266_v35  ;;  %9940 = vmatprep.subr.mxu1 %v13543_v12  ;;  %v9479_v20 = vmul.f32 -1.442695, %v12367_v59  ;;  %v13757_v59 = vld [vmem:[#allocation12_spill] sm:$0xff]  ;;  %v13758_v35 = vld [vmem:[#allocation59_spill] sm:$0xff] }
0x13c5   :  { %10572 = vpow2.f32 %v9478_v57  ;;  %9941 = vmatpush3.msra.mxu1 %v7260_v0  ;;  %v12463_v58 = vsub.f32 %v7127_v38, %v12457_v11  ;;  %9926 = vmatpush3.msra.mxu0 %v12457_v11 }
0x13c6   :  { %9942 = vmatprep.subr.mxu1 %v13543_v12  ;;  %9927 = vmatprep.subr.mxu0 %v13543_v12 }
0x13c7   :  { %9943 = vmatpush3.msra.mxu1 %v7267_v30  ;;  %9928 = vmatpush3.msra.mxu0 %v12465_v7 }
0x13c8   :  { %9944 = vmatprep.subr.mxu1 %v13543_v12  ;;  %9929 = vmatprep.subr.mxu0 %v13543_v12 }
0x13c9   :  { %9930 = vmatpush3.msra.mxu0 %v12478_v51 }
0x13ca   :  { %9931 = vmatprep.subr.mxu0 %v13543_v12 }
0x13d1   :  { %v10571_v52 = vpop.eup %10570 }
0x13d2   :  { %7090 = vrot.lane.b32.xlu1 %v10571_v52, %s10656_s5  ;;  %v10573_v62 = vpop.eup %10572  ;;  %v7272_v52 = vand.u32 4294901760, %v12463_v58 }
0x13d3   :  { %v7078_v2 = vadd.f32 1.0, %v10573_v62 }
0x13d5   :  { %10574 = vrcp.f32 %v7078_v2 }
0x13d6   :  { %10447 = vperm.xlu1 %10445, %v10446_v41   ;;  %v12476_v41 = vsub.f32 %v7126_v55, %v12465_v7 }
0x13d8   :  { %v7279_v5 = vand.u32 4294901760, %v12476_v41 }
0x13da   :  { %10457 = vperm.xlu1 %10445, %v10456_v29   ;;  %v7124_v29 = vld [vmem:[%s13398_s7] sm:$0xff] }
0x13db   :  { %v12493_v47 = vand.u32 4294901760, %v7124_v29 }
0x13dd   :  { %v12501_v62 = vsub.f32 %v7124_v29, %v12493_v47  ;;  %9932 = vmatpush3.msra.mxu0 %v12493_v47 }
0x13de   :  { %10467 = vperm.xlu1 %10445, %v10466_v44   ;;  %v12490_v44 = vsub.f32 %v7125_v37, %v12478_v51  ;;  %9955 = vmatprep.subr.mxu0 %v13543_v12 }
0x13e0   :  { %v7286_v57 = vand.u32 4294901760, %v12490_v44 }
0x13e2   :  { %10477 = vperm.xlu1 %10445, %v10476_v49   ;;  %v12382_v15 = vpop.eup %10574  ;;  %v7280_v49 = vsub.f32 %v12476_v41, %v7279_v5 }
0x13e3   :  { %v7088_v40 = vmul.f32 %v12382_v15, %v12283_v53  ;;  %v7273_v53 = vsub.f32 %v12463_v58, %v7272_v52 }
0x13e4   :  { %v7281_v2 = vand.u32 4294901760, %v7280_v49 }
0x13e5   :  { %v7274_v48 = vand.u32 4294901760, %v7273_v53 }
0x13e7   :  { %9945 = vmatpush3.msra.mxu1 %v7274_v48 }
0x13e8   :  { %9946 = vmatprep.subr.mxu1 %v13543_v12 }
0x13e9   :  { %9947 = vmatpush3.msra.mxu1 %v7281_v2  ;;  %v13760_v2 = vld [vmem:[#allocation28_spill] sm:$0xff] }
0x13ea   :  { %9948 = vmatprep.subr.mxu1 %v13543_v12 }
0x1444   :  { %v7091_v24 = vpop.permute.xlu1 %7090 }
0x1445   :  { %v7093_v13 = vmul.f32 %v12382_v15, %v7091_v24  ;;  %v7287_v15 = vsub.f32 %v12490_v44, %v7286_v57  ;;  %v7293_v24 = vand.u32 4294901760, %v12501_v62 }
0x1447   :  { %7095 = vrot.lane.b32.xlu0 %v7093_v13, %s10656_s5  ;;  %v7288_v14 = vand.u32 4294901760, %v7287_v15  ;;  %v7294_v34 = vsub.f32 %v12501_v62, %v7293_v24 }
0x1449   :  { %9949 = vmatpush3.msra.mxu1 %v7288_v14  ;;  %v7295_v13 = vand.u32 4294901760, %v7294_v34 }
0x144a   :  { %9950 = vmatprep.subr.mxu1 %v13543_v12 }
0x144b   :  { %10452 = vperm.xlu0 %10444, %v10451_v21   ;;  %9951 = vmatpush3.msra.mxu1 %v7295_v13 }
0x144c   :  { %9974 = vmatprep.subr.mxu1 %v13543_v12 }
0x144f   :  { %10462 = vperm.xlu0 %10444, %v10461_v3  }
0x1451   :  { %v10448_v1 = vpop.permute.xlu1 %10447 }
0x1452   :  { %v10449_v10 = vunpack.i.l.bf16 %v10448_v1 }
0x1453   :  { %10472 = vperm.xlu0 %10444, %v10471_v9   ;;  %v10450_v9 = vunpack.i.h.bf16 %v10448_v1 }
0x1455   :  { %v2180_v27 = vsel %vm1455_vm12, %v10449_v10, %v10450_v9  ;;  %v13762_v10 = vld [vmem:[#allocation32_spill] sm:$0xff] }
0x1456   :  { %v2181_v0 = vmul.f32 %v2180_v27, %v13758_v35 }
0x1457   :  { %10482 = vperm.xlu0 %10444, %v10481_v16   ;;  %v10458_v16 = vpop.permute.xlu1 %10457 }
0x1458   :  { %v10460_v39 = vunpack.i.h.bf16 %v10458_v16  ;;  %v10459_v36 = vunpack.i.l.bf16 %v10458_v16 }
0x145a   :  { %v3592_v30 = vsel %vm1455_vm12, %v10459_v36, %v10460_v39 }
0x145b   :  { %v10468_v55 = vpop.permute.xlu1 %10467 }
0x145c   :  { %v10470_v53 = vunpack.i.h.bf16 %v10468_v55  ;;  %v10469_v48 = vunpack.i.l.bf16 %v10468_v55 }
0x145e   :  { %v5004_v13 = vsel %vm1455_vm12, %v10469_v48, %v10470_v53  ;;  %v7692_v53 = vld [vmem:[%s13400_s9 + $0x58] sm:$0xff] }
0x14b9   :  { %v7096_v46 = vpop.permute.xlu0 %7095 }
0x14ba   :  { %v7098_v54 = vadd.f32 %v7096_v46, %v7088_v40  ;;  %v13759_v46 = vld [vmem:[#allocation25_spill] sm:$0xff] }
0x14bb   :  { %v3593_v29 = vmul.f32 %v3592_v30, %v13759_v46 }
0x14bc   :  { %10576 = vtanh.f32 %v7098_v54 }
0x14bd   :  { %10578 = vpow2.f32 %v9479_v20 }
0x14c6   :  { %v10453_v3 = vpop.permute.xlu0 %10452 }
0x14c7   :  { %v10455_v23 = vunpack.i.h.bf16 %v10453_v3  ;;  %v10454_v6 = vunpack.i.l.bf16 %v10453_v3  ;;  %v13761_v3 = vld [vmem:[#allocation29_spill] sm:$0xff] }
0x14c9   :  { %v10577_v21 = vpop.eup %10576  ;;  %v2885_v31 = vsel %vm1455_vm12, %v10454_v6, %v10455_v23  ;;  %v5005_v23 = vmul.f32 %v5004_v13, %v13761_v3 }
0x14ca   :  { %7101 = vrot.lane.b32.xlu1 %v10577_v21, %s10656_s5  ;;  %v10463_v8 = vpop.permute.xlu0 %10462  ;;  %v2886_v45 = vmul.f32 %v2885_v31, %v13757_v59  ;;  %v10579_v25 = vpop.eup %10578 }
0x14cb   :  { %v10465_v26 = vunpack.i.h.bf16 %v10463_v8  ;;  %v10464_v63 = vunpack.i.l.bf16 %v10463_v8  ;;  %v7084_v38 = vadd.f32 1.0, %v10579_v25  ;;  %v10478_v21 = vpop.permute.xlu1 %10477 }
0x14cc   :  { %v2887_v37 = vadd.f32 %v2886_v45, %v2181_v0  ;;  %v10480_v6 = vunpack.i.h.bf16 %v10478_v21  ;;  %v10479_v9 = vunpack.i.l.bf16 %v10478_v21 }
0x14cd   :  { %v4297_v40 = vsel %vm1455_vm12, %v10464_v63, %v10465_v26  ;;  %10580 = vrcp.f32 %v7084_v38 }
0x14ce   :  { %v10473_v54 = vpop.permute.xlu0 %10472  ;;  %v3594_v49 = vadd.f32 %v3593_v29, %v2887_v37  ;;  %v4298_v15 = vmul.f32 %v4297_v40, %v13760_v2  ;;  %v6416_v27 = vsel %vm1455_vm12, %v10479_v9, %v10480_v6  ;;  %v7693_v29 = vld [vmem:[%s13400_s9 + $0x60] sm:$0x3f]  ;;  %v12593_v2 = vand.u32 4294901760, %v7692_v53 }
0x14cf   :  { %v10475_v14 = vunpack.i.h.bf16 %v10473_v54  ;;  %v10474_v34 = vunpack.i.l.bf16 %v10473_v54  ;;  %v6417_v26 = vmul.f32 %v6416_v27, %v12287_v60  ;;  %v7707_v54 = vsel %vm7705_vm13, %v7693_v29, 0 }
0x14d0   :  { %v4299_v20 = vadd.f32 %v4298_v15, %v3594_v49  ;;  %v12584_v48 = vand.u32 4294901760, %v7707_v54  ;;  %v7691_v49 = vld [vmem:[%s13400_s9 + $0x50] sm:$0xff] }
0x14d1   :  { %v5709_v1 = vsel %vm1455_vm12, %v10474_v34, %v10475_v14  ;;  %v12605_v14 = vand.u32 4294901760, %v7691_v49  ;;  %v12615_v34 = vsub.f32 %v7692_v53, %v12593_v2 }
0x14d2   :  { %v5710_v16 = vmul.f32 %v5709_v1, %v13762_v10  ;;  %v10483_v31 = vpop.permute.xlu0 %10482  ;;  %v5006_v8 = vadd.f32 %v5005_v23, %v4299_v20  ;;  %v12603_v15 = vsub.f32 %v7707_v54, %v12584_v48  ;;  %v7688_v1 = vld [vmem:[%s13400_s9 + $0x38] sm:$0xff]  ;;  %v7687_v23 = vld [vmem:[%s13400_s9 + $0x30] sm:$0xff]  ;;  %v7685_v10 = vld [vmem:[%s13400_s9 + $0x20] sm:$0xff] }
0x14d3   :  { %v10485_v39 = vunpack.i.h.bf16 %v10483_v31  ;;  %v10484_v36 = vunpack.i.l.bf16 %v10483_v31  ;;  %v12625_v21 = vsub.f32 %v7691_v49, %v12605_v14 }
0x14d4   :  { %v5711_v59 = vadd.f32 %v5710_v16, %v5006_v8 }
0x14d5   :  { %v7121_v35 = vsel %vm1455_vm12, %v10484_v36, %v10485_v39  ;;  %v7683_v39 = vld [vmem:[%s13400_s9 + $0x10] sm:$0xff] }
0x14d6   :  { %v6418_v0 = vadd.f32 %v6417_v26, %v5711_v59 }
0x14da   :  { %v10581_v45 = vpop.eup %10580 }
0x153c   :  { %v7102_v25 = vpop.permute.xlu1 %7101 }
0x153d   :  { %v7104_v63 = vmul.f32 %v10581_v45, %v7102_v25  ;;  %v7682_v25 = vld [vmem:[%s13400_s9 + $0x8] sm:$0xff] }
0x153f   :  { %v7122_v30 = vmul.f32 %v7121_v35, %v7104_v63 }
0x1541   :  { %v7123_v38 = vadd.f32 %v7122_v30, %v6418_v0 }
0x1543   :  { %v7140_v55 = vsel %vm1483_vm9, %v7123_v38, 0  ;;  %v12745_v38 = vand.u32 4294901760, %v7682_v25 }
0x1544   :  { %v12547_v37 = vand.u32 4294901760, %v7140_v55 }
0x1545   :  { %v12774_v29 = vsub.f32 %v7682_v25, %v12745_v38 }
0x1546   :  { %v7216_v40 = vsub.f32 %v7140_v55, %v12547_v37  ;;  %9953 = vmatmul.mubr.f32.vlgmr.msra.gmra.mxu1 %v12547_v37 }
0x1547   :  { %9975 = vmatpush3.msra.mxu1 %v12403_v28  ;;  %9990 = vmatprep.mubr.msk.f32.mxu1 %vm10657_vm11, %v13543_v12 }
0x1548   :  { %9976 = vmatprep.subr.mxu1 %v13543_v12  ;;  %v7217_v60 = vand.u32 4294901760, %v7216_v40 }
0x1549   :  { %9977 = vmatpush3.msra.mxu1 %v12405_v32 }
0x154a   :  { %9978 = vmatprep.subr.mxu1 %v13543_v12  ;;  %v7218_v19 = vsub.f32 %v7216_v40, %v7217_v60 }
0x154b   :  { %9979 = vmatpush3.msra.mxu1 %v12407_v33 }
0x154c   :  { %9980 = vmatprep.subr.mxu1 %v13543_v12  ;;  %v7219_v46 = vand.u32 4294901760, %v7218_v19 }
0x154d   :  { %9981 = vmatpush3.msra.mxu1 %v12412_v42 }
0x154e   :  { %9982 = vmatprep.subr.mxu1 %v13543_v12  ;;  %9934 = vmatmul.mubr.f32.vlgmr.msra.gmra.mxu0 %v7219_v46 }
0x154f   :  { %9956 = vmatpush3.msra.mxu0 %v12415_v43  ;;  %9983 = vmatpush3.msra.mxu1 %v12457_v11  ;;  %v12647_v43 = vand.u32 4294901760, %v7688_v1 }
0x1550   :  { %9957 = vmatprep.subr.mxu0 %v13543_v12  ;;  %9984 = vmatprep.subr.mxu1 %v13543_v12 }
0x1551   :  { %9958 = vmatpush3.msra.mxu0 %v12418_v50  ;;  %9985 = vmatpush3.msra.mxu1 %v12465_v7  ;;  %v7686_v50 = vld [vmem:[%s13400_s9 + $0x28] sm:$0xff] }
0x1552   :  { %9959 = vmatprep.subr.mxu0 %v13543_v12  ;;  %9986 = vmatprep.subr.mxu1 %v13543_v12 }
0x1553   :  { %9960 = vmatpush3.msra.mxu0 %v12422_v56  ;;  %9987 = vmatpush3.msra.mxu1 %v12478_v51  ;;  %v12679_v56 = vsub.f32 %v7688_v1, %v12647_v43 }
0x1554   :  { %9961 = vmatprep.subr.mxu0 %v13543_v12  ;;  %9988 = vmatprep.subr.mxu1 %v13543_v12 }
0x1555   :  { %9962 = vmatpush3.msra.mxu0 %v12425_v61  ;;  %9989 = vmatpush3.msra.mxu1 %v12493_v47  ;;  %v7684_v61 = vld [vmem:[%s13400_s9 + $0x18] sm:$0xff]  ;;  %v7841_v36 = vand.u32 4294901760, %v12679_v56 }
0x1556   :  { %9963 = vmatprep.subr.mxu0 %v13543_v12  ;;  %9991 = vmatmul.mubr.f32.vlgmr.msra.gmra.mxu1 %v7217_v60 }
0x1557   :  { %10012 = vmatprep.subr.mxu1 %v13543_v12  ;;  %9964 = vmatpush3.msra.mxu0 %v12463_v58  ;;  %v7842_v35 = vsub.f32 %v12679_v56, %v7841_v36 }
0x1558   :  { %10013 = vmatpush3.msra.mxu1 %v12403_v28  ;;  %9965 = vmatprep.subr.mxu0 %v13543_v12  ;;  %v7690_v28 = vld [vmem:[%s13400_s9 + $0x48] sm:$0xff] }
0x1559   :  { %10014 = vmatprep.subr.mxu1 %v13543_v12  ;;  %9966 = vmatpush3.msra.mxu0 %v12476_v41  ;;  %v12617_v13 = vand.u32 4294901760, %v7690_v28  ;;  %v12732_v41 = vand.u32 4294901760, %v7683_v39 }
0x155a   :  { %10015 = vmatpush3.msra.mxu1 %v12405_v32  ;;  %9967 = vmatprep.subr.mxu0 %v13543_v12  ;;  %v7689_v32 = vld [vmem:[%s13400_s9 + $0x40] sm:$0xff] }
0x155b   :  { %10016 = vmatprep.subr.mxu1 %v13543_v12  ;;  %9968 = vmatpush3.msra.mxu0 %v12490_v44  ;;  %v12627_v20 = vand.u32 4294901760, %v7689_v32  ;;  %v12639_v3 = vsub.f32 %v7690_v28, %v12617_v13  ;;  %v7681_v44 = vld [vmem:[%s13400_s9] sm:$0xff]  ;;  %v12759_v60 = vsub.f32 %v7683_v39, %v12732_v41 }
0x155c   :  { %10017 = vmatpush3.msra.mxu1 %v12407_v33  ;;  %9969 = vmatprep.subr.mxu0 %v13543_v12  ;;  %v7806_v33 = vand.u32 4294901760, %v12603_v15 }
0x155d   :  { %10018 = vmatprep.subr.mxu1 %v13543_v12  ;;  %9970 = vmatpush3.msra.mxu0 %v12501_v62  ;;  %v12656_v6 = vsub.f32 %v7689_v32, %v12627_v20  ;;  %v7827_v9 = vand.u32 4294901760, %v12639_v3  ;;  %v7680_v62 = vld [vmem:[%s13397_s6] sm:$0xf]  ;;  %v7876_v28 = vand.u32 4294901760, %v12759_v60 }
0x155e   :  { %9971 = vmatprep.mubr.msk.f32.mxu0 %vm10657_vm11, %v13543_v12  ;;  %10019 = vmatpush3.msra.mxu1 %v12412_v42  ;;  %v7813_v42 = vand.u32 4294901760, %v12615_v34  ;;  %v7703_v54 = vsel %vm7701_vm14, %v7680_v62, 0 }
0x155f   :  { %9972 = vmatmul.mubr.f32.vlgmr.msra.gmra.mxu0 %v7216_v40  ;;  %9993 = vmatprep.subr.mxu0 %v13543_v12  ;;  %v7834_v31 = vand.u32 4294901760, %v12656_v6  ;;  %v7828_v27 = vsub.f32 %v12639_v3, %v7827_v9 }
0x1560   :  { %10020 = vmatprep.subr.mxu1 %v13543_v12  ;;  %9994 = vmatpush3.msra.mxu0 %v7244_v4  ;;  %v7807_v4 = vsub.f32 %v12603_v15, %v7806_v33 }
0x1561   :  { %10021 = vmatpush3.msra.mxu1 %v12457_v11  ;;  %9995 = vmatprep.subr.mxu0 %v13543_v12  ;;  %v7820_v11 = vand.u32 4294901760, %v12625_v21  ;;  %v7835_v45 = vsub.f32 %v12656_v6, %v7834_v31 }
0x1562   :  { %10022 = vmatprep.subr.mxu1 %v13543_v12  ;;  %9996 = vmatpush3.msra.mxu0 %v7251_v18  ;;  %v12664_v18 = vand.u32 4294901760, %v7687_v23 }
0x1563   :  { %10023 = vmatpush3.msra.mxu1 %v12465_v7  ;;  %9997 = vmatprep.subr.mxu0 %v13543_v12  ;;  %v7814_v7 = vsub.f32 %v12615_v34, %v7813_v42  ;;  %v7821_v16 = vsub.f32 %v12625_v21, %v7820_v11 }
0x1564   :  { %10024 = vmatprep.subr.mxu1 %v13543_v12  ;;  %9998 = vmatpush3.msra.mxu0 %v7258_v17  ;;  %v12681_v17 = vand.u32 4294901760, %v7686_v50 }
0x1565   :  { %10025 = vmatpush3.msra.mxu1 %v12478_v51  ;;  %9999 = vmatprep.subr.mxu0 %v13543_v12  ;;  %v7808_v51 = vand.u32 4294901760, %v7807_v4  ;;  %v7815_v8 = vand.u32 4294901760, %v7814_v7  ;;  %v7822_v59 = vand.u32 4294901760, %v7821_v16  ;;  %v7883_v4 = vand.u32 4294901760, %v12774_v29 }
0x1566   :  { %10026 = vmatprep.subr.mxu1 %v13543_v12  ;;  %10000 = vmatpush3.msra.mxu0 %v7265_v22  ;;  %v12696_v22 = vsub.f32 %v7687_v23, %v12664_v18  ;;  %v12714_v58 = vsub.f32 %v7686_v50, %v12681_v17  ;;  %v12793_v50 = vand.u32 4294901760, %v7703_v54 }
0x1567   :  { %10027 = vmatpush3.msra.mxu1 %v12493_v47  ;;  %10028 = vmatprep.mubr.msk.f32.mxu1 %vm10657_vm11, %v13543_v12  ;;  %v12698_v47 = vand.u32 4294901760, %v7685_v10 }
0x1568   :  { %10001 = vmatprep.subr.mxu0 %v13543_v12  ;;  %10029 = vmatmul.mubr.f32.vlgmr.msra.gmra.mxu1 %v12547_v37  ;;  %v7848_v26 = vand.u32 4294901760, %v12696_v22  ;;  %v7855_v0 = vand.u32 4294901760, %v12714_v58 }
0x1569   :  { %10002 = vmatpush3.msra.mxu0 %v7272_v52  ;;  %10009 = vmatprep.mubr.msk.f32.mxu0 %vm10657_vm11, %v13543_v12  ;;  %v12716_v52 = vand.u32 4294901760, %v7684_v61  ;;  %v12730_v63 = vsub.f32 %v7685_v10, %v12698_v47  ;;  %v7877_v10 = vsub.f32 %v12759_v60, %v7876_v28 }
0x156a   :  { %10003 = vmatprep.subr.mxu0 %v13543_v12  ;;  %10060 = vmatprep.subr.mxu1 %v13543_v12  ;;  %v7849_v55 = vsub.f32 %v12696_v22, %v7848_v26  ;;  %v7856_v19 = vsub.f32 %v12714_v58, %v7855_v0 }
0x156b   :  { %10004 = vmatpush3.msra.mxu0 %v7279_v5  ;;  %10061 = vmatpush3.msra.mxu1 %v7808_v51  ;;  %v7829_v5 = vand.u32 4294901760, %v7828_v27  ;;  %v12743_v30 = vsub.f32 %v7684_v61, %v12716_v52  ;;  %v7862_v40 = vand.u32 4294901760, %v12730_v63  ;;  %v7884_v61 = vsub.f32 %v12774_v29, %v7883_v4 }
0x156c   :  { %10005 = vmatprep.subr.mxu0 %v13543_v12  ;;  %10062 = vmatprep.subr.mxu1 %v13543_v12  ;;  %v7850_v53 = vand.u32 4294901760, %v7849_v55  ;;  %v7857_v1 = vand.u32 4294901760, %v7856_v19  ;;  %v7878_v27 = vand.u32 4294901760, %v7877_v10  ;;  %v8320_v55 = vld [vmem:[#allocation5] sm:$0xff] }
0x156d   :  { %10006 = vmatpush3.msra.mxu0 %v7286_v57  ;;  %10063 = vmatpush3.msra.mxu1 %v7815_v8  ;;  %v7836_v57 = vand.u32 4294901760, %v7835_v45  ;;  %v7869_v46 = vand.u32 4294901760, %v12743_v30  ;;  %v7863_v49 = vsub.f32 %v12730_v63, %v7862_v40  ;;  %v12809_v8 = vsub.f32 %v7703_v54, %v12793_v50 }
0x156e   :  { %10007 = vmatprep.subr.mxu0 %v13543_v12  ;;  %10064 = vmatprep.subr.mxu1 %v13543_v12 }
0x156f   :  { %10008 = vmatpush3.msra.mxu0 %v7293_v24  ;;  %10065 = vmatpush3.msra.mxu1 %v7822_v59  ;;  %v12766_v24 = vand.u32 4294901760, %v7681_v44  ;;  %v7870_v23 = vsub.f32 %v12743_v30, %v7869_v46  ;;  %v7864_v7 = vand.u32 4294901760, %v7863_v49  ;;  %v7885_v59 = vand.u32 4294901760, %v7884_v61 }
0x1570   :  { %10010 = vmatmul.mubr.f32.vlgmr.msra.gmra.mxu0 %v12547_v37  ;;  %10031 = vmatprep.subr.mxu0 %v13543_v12  ;;  %v7843_v37 = vand.u32 4294901760, %v7842_v35  ;;  %v7789_v45 = vand.u32 4294901760, %v12809_v8 }
0x1571   :  { %10032 = vmatpush3.msra.mxu0 %v12584_v48  ;;  %10066 = vmatprep.subr.mxu1 %v13543_v12  ;;  %v12786_v32 = vsub.f32 %v7681_v44, %v12766_v24  ;;  %v7871_v16 = vand.u32 4294901760, %v7870_v23 }
0x1572   :  { %10033 = vmatprep.subr.mxu0 %v13543_v12  ;;  %10067 = vmatpush3.msra.mxu1 %v7829_v5  ;;  %v7790_v5 = vsub.f32 %v12809_v8, %v7789_v45 }
0x1573   :  { %10034 = vmatpush3.msra.mxu0 %v12593_v2  ;;  %10068 = vmatprep.subr.mxu1 %v13543_v12  ;;  %v7890_v51 = vand.u32 4294901760, %v12786_v32 }
0x1574   :  { %10035 = vmatprep.subr.mxu0 %v13543_v12  ;;  %10069 = vmatpush3.msra.mxu1 %v7836_v57  ;;  %v7791_v35 = vand.u32 4294901760, %v7790_v5 }
0x1575   :  { %10036 = vmatpush3.msra.mxu0 %v12605_v14  ;;  %10070 = vmatprep.subr.mxu1 %v13543_v12  ;;  %v7891_v39 = vsub.f32 %v12786_v32, %v7890_v51 }
0x1576   :  { %10037 = vmatprep.subr.mxu0 %v13543_v12  ;;  %10071 = vmatpush3.msra.mxu1 %v7843_v37  ;;  %v13051_v37 = vand.u32 4294901760, %v8320_v55 }
0x1577   :  { %10038 = vmatpush3.msra.mxu0 %v12617_v13  ;;  %10072 = vmatprep.subr.mxu1 %v13543_v12  ;;  %v7892_v25 = vand.u32 4294901760, %v7891_v39 }
0x1578   :  { %10039 = vmatprep.subr.mxu0 %v13543_v12  ;;  %10073 = vmatpush3.msra.mxu1 %v7850_v53  ;;  %v13060_v54 = vsub.f32 %v8320_v55, %v13051_v37 }
0x1579   :  { %10040 = vmatpush3.msra.mxu0 %v12627_v20  ;;  %10074 = vmatprep.subr.mxu1 %v13543_v12 }
0x157a   :  { %10041 = vmatprep.subr.mxu0 %v13543_v12  ;;  %10075 = vmatpush3.msra.mxu1 %v7857_v1 }
0x157b   :  { %10042 = vmatpush3.msra.mxu0 %v12647_v43  ;;  %10076 = vmatprep.subr.mxu1 %v13543_v12 }
0x157c   :  { %10043 = vmatprep.subr.mxu0 %v13543_v12  ;;  %10077 = vmatpush3.msra.mxu1 %v7864_v7  ;;  %v9482_v7 = vld [vmem:[%s13399_s8] ss:$0 sm:$0xff] }
0x157d   :  { %10044 = vmatpush3.msra.mxu0 %v12664_v18  ;;  %10078 = vmatprep.subr.mxu1 %v13543_v12 }
0x157e   :  { %10045 = vmatprep.subr.mxu0 %v13543_v12  ;;  %10079 = vmatpush3.msra.mxu1 %v7871_v16 }
0x157f   :  { %10046 = vmatpush3.msra.mxu0 %v12681_v17  ;;  %10080 = vmatprep.subr.mxu1 %v13543_v12 }
0x1580   :  { %10047 = vmatprep.subr.mxu0 %v13543_v12  ;;  %10081 = vmatpush3.msra.mxu1 %v7878_v27 }
0x1581   :  { %10048 = vmatpush3.msra.mxu0 %v12698_v47  ;;  %10082 = vmatprep.subr.mxu1 %v13543_v12 }
0x1582   :  { %10049 = vmatprep.subr.mxu0 %v13543_v12  ;;  %10083 = vmatpush3.msra.mxu1 %v7885_v59 }
0x1583   :  { %10050 = vmatpush3.msra.mxu0 %v12716_v52  ;;  %10084 = vmatprep.subr.mxu1 %v13543_v12 }
0x1584   :  { %10051 = vmatprep.subr.mxu0 %v13543_v12  ;;  %10057 = vmatprep.mubr.msk.f32.mxu0 %vm10657_vm11, %v13543_v12 }
0x1585   :  { %10052 = vmatpush3.msra.mxu0 %v12732_v41  ;;  %10085 = vmatpush3.msra.mxu1 %v7892_v25 }
0x1586   :  { %10053 = vmatprep.subr.mxu0 %v13543_v12  ;;  %10086 = vmatprep.mubr.msk.f32.mxu1 %vm10657_vm11, %v13543_v12 }
0x1587   :  { %10054 = vmatpush3.msra.mxu0 %v12745_v38  ;;  %10118 = vmatprep.subr.mxu1 %v13543_v12 }
0x1588   :  { %10055 = vmatprep.subr.mxu0 %v13543_v12  ;;  %10087 = vmatmul.mubr.f32.vlgmr.msra.gmra.mxu1 %v12793_v50 }
0x1589   :  { %10056 = vmatpush3.msra.mxu0 %v12766_v24  ;;  %10119 = vmatpush3.msra.mxu1 %v12584_v48 }
0x158a   :  { %10058 = vmatmul.mubr.f32.vlgmr.msra.gmra.mxu0 %v7791_v35  ;;  %10089 = vmatprep.subr.mxu0 %v13543_v12 }
0x158b   :  { %10090 = vmatpush3.msra.mxu0 %v12603_v15  ;;  %10120 = vmatprep.subr.mxu1 %v13543_v12  ;;  %v8325_v15 = vld [vmem:[#allocation5 + $0x28] sm:$0xff] }
0x158c   :  { %10091 = vmatprep.subr.mxu0 %v13543_v12  ;;  %10121 = vmatpush3.msra.mxu1 %v12593_v2 }
0x158d   :  { %10092 = vmatpush3.msra.mxu0 %v12615_v34  ;;  %10122 = vmatprep.subr.mxu1 %v13543_v12 }
0x158e   :  { %10093 = vmatprep.subr.mxu0 %v13543_v12  ;;  %10123 = vmatpush3.msra.mxu1 %v12605_v14 }
0x158f   :  { %10094 = vmatpush3.msra.mxu0 %v12625_v21  ;;  %10124 = vmatprep.subr.mxu1 %v13543_v12 }
0x1590   :  { %10095 = vmatprep.subr.mxu0 %v13543_v12  ;;  %10125 = vmatpush3.msra.mxu1 %v12617_v13 }
0x1591   :  { %10096 = vmatpush3.msra.mxu0 %v12639_v3  ;;  %10126 = vmatprep.subr.mxu1 %v13543_v12 }
0x1592   :  { %10097 = vmatprep.subr.mxu0 %v13543_v12  ;;  %10127 = vmatpush3.msra.mxu1 %v12627_v20 }
0x1593   :  { %10098 = vmatpush3.msra.mxu0 %v12656_v6  ;;  %10128 = vmatprep.subr.mxu1 %v13543_v12 }
0x1594   :  { %10099 = vmatprep.subr.mxu0 %v13543_v12  ;;  %10129 = vmatpush3.msra.mxu1 %v12647_v43 }
0x1595   :  { %10100 = vmatpush3.msra.mxu0 %v12679_v56  ;;  %10130 = vmatprep.subr.mxu1 %v13543_v12 }
0x1596   :  { %10101 = vmatprep.subr.mxu0 %v13543_v12  ;;  %10131 = vmatpush3.msra.mxu1 %v12664_v18 }
0x1597   :  { %10102 = vmatpush3.msra.mxu0 %v12696_v22  ;;  %10132 = vmatprep.subr.mxu1 %v13543_v12 }
0x1598   :  { %10103 = vmatprep.subr.mxu0 %v13543_v12  ;;  %10133 = vmatpush3.msra.mxu1 %v12681_v17 }
0x1599   :  { %10104 = vmatpush3.msra.mxu0 %v12714_v58  ;;  %10134 = vmatprep.subr.mxu1 %v13543_v12 }
0x159a   :  { %10105 = vmatprep.subr.mxu0 %v13543_v12  ;;  %10135 = vmatpush3.msra.mxu1 %v12698_v47 }
0x159b   :  { %10106 = vmatpush3.msra.mxu0 %v12730_v63  ;;  %10136 = vmatprep.subr.mxu1 %v13543_v12 }
0x159c   :  { %10107 = vmatprep.subr.mxu0 %v13543_v12  ;;  %10137 = vmatpush3.msra.mxu1 %v12716_v52 }
0x159d   :  { %10108 = vmatpush3.msra.mxu0 %v12743_v30  ;;  %10138 = vmatprep.subr.mxu1 %v13543_v12 }
0x159e   :  { %10109 = vmatprep.subr.mxu0 %v13543_v12  ;;  %10139 = vmatpush3.msra.mxu1 %v12732_v41 }
0x159f   :  { %10110 = vmatpush3.msra.mxu0 %v12759_v60  ;;  %10140 = vmatprep.subr.mxu1 %v13543_v12 }
0x15a0   :  { %10111 = vmatprep.subr.mxu0 %v13543_v12  ;;  %10141 = vmatpush3.msra.mxu1 %v12745_v38 }
0x15a1   :  { %10112 = vmatpush3.msra.mxu0 %v12774_v29  ;;  %10142 = vmatprep.subr.mxu1 %v13543_v12 }
0x15a2   :  { %10113 = vmatprep.subr.mxu0 %v13543_v12  ;;  %10115 = vmatprep.mubr.msk.f32.mxu0 %vm10657_vm11, %v13543_v12 }
0x15a3   :  { %10114 = vmatpush3.msra.mxu0 %v12786_v32  ;;  %10143 = vmatpush3.msra.mxu1 %v12766_v24 }
0x15a4   :  { %10116 = vmatmul.mubr.f32.vlgmr.msra.gmra.mxu0 %v12809_v8  ;;  %10144 = vmatprep.mubr.msk.f32.mxu1 %vm10657_vm11, %v13543_v12 }
0x15a5   :  { %10147 = vmatprep.subr.mxu0 %v13543_v12  ;;  %10176 = vmatprep.subr.mxu1 %v13543_v12 }
0x15a6   :  { %10145 = vmatmul.mubr.f32.vlgmr.msra.gmra.mxu1 %v7789_v45  ;;  %10148 = vmatpush3.msra.mxu0 %v7806_v33 }
0x15a7   :  { %10177 = vmatpush3.msra.mxu1 %v12584_v48  ;;  %10149 = vmatprep.subr.mxu0 %v13543_v12  ;;  %v8327_v48 = vld [vmem:[#allocation5 + $0x38] sm:$0xff] }
0x15a8   :  { %10178 = vmatprep.subr.mxu1 %v13543_v12  ;;  %10150 = vmatpush3.msra.mxu0 %v7813_v42 }
0x15a9   :  { %10179 = vmatpush3.msra.mxu1 %v12593_v2  ;;  %10151 = vmatprep.subr.mxu0 %v13543_v12  ;;  %v8326_v2 = vld [vmem:[#allocation5 + $0x30] sm:$0xff] }
0x15aa   :  { %10180 = vmatprep.subr.mxu1 %v13543_v12  ;;  %10152 = vmatpush3.msra.mxu0 %v7820_v11  ;;  %v12981_v34 = vand.u32 4294901760, %v8326_v2 }
0x15ab   :  { %10181 = vmatpush3.msra.mxu1 %v12605_v14  ;;  %10153 = vmatprep.subr.mxu0 %v13543_v12  ;;  %v12979_v14 = vand.u32 4294901760, %v8327_v48 }
0x15ac   :  { %10182 = vmatprep.subr.mxu1 %v13543_v12  ;;  %10154 = vmatpush3.msra.mxu0 %v7827_v9  ;;  %v12989_v21 = vsub.f32 %v8326_v2, %v12981_v34 }
0x15ad   :  { %10183 = vmatpush3.msra.mxu1 %v12617_v13  ;;  %10155 = vmatprep.subr.mxu0 %v13543_v12  ;;  %v12983_v13 = vand.u32 4294901760, %v8325_v15  ;;  %v12986_v33 = vsub.f32 %v8327_v48, %v12979_v14 }
0x15ae   :  { %10184 = vmatprep.subr.mxu1 %v13543_v12  ;;  %10156 = vmatpush3.msra.mxu0 %v7834_v31  ;;  %v8440_v3 = vand.u32 4294901760, %v12989_v21  ;;  %v8324_v31 = vld [vmem:[#allocation5 + $0x20] sm:$0xff] }
0x15af   :  { %10185 = vmatpush3.msra.mxu1 %v12627_v20  ;;  %10157 = vmatprep.subr.mxu0 %v13543_v12  ;;  %v12992_v20 = vsub.f32 %v8325_v15, %v12983_v13  ;;  %v8433_v42 = vand.u32 4294901760, %v12986_v33  ;;  %v13014_v22 = vand.u32 4294901760, %v8324_v31 }
0x15b0   :  { %10186 = vmatprep.subr.mxu1 %v13543_v12  ;;  %10158 = vmatpush3.msra.mxu0 %v7841_v36  ;;  %v8441_v6 = vsub.f32 %v12989_v21, %v8440_v3 }
0x15b1   :  { %10187 = vmatpush3.msra.mxu1 %v12647_v43  ;;  %10159 = vmatprep.subr.mxu0 %v13543_v12  ;;  %v8447_v43 = vand.u32 4294901760, %v12992_v20  ;;  %v8434_v11 = vsub.f32 %v12986_v33, %v8433_v42  ;;  %v13018_v36 = vsub.f32 %v8324_v31, %v13014_v22 }
0x15b2   :  { %10188 = vmatprep.subr.mxu1 %v13543_v12  ;;  %10160 = vmatpush3.msra.mxu0 %v7848_v26  ;;  %v8442_v56 = vand.u32 4294901760, %v8441_v6 }
0x15b3   :  { %10189 = vmatpush3.msra.mxu1 %v12664_v18  ;;  %10161 = vmatprep.subr.mxu0 %v13543_v12  ;;  %v8448_v18 = vsub.f32 %v12992_v20, %v8447_v43  ;;  %v8435_v9 = vand.u32 4294901760, %v8434_v11  ;;  %v8454_v26 = vand.u32 4294901760, %v13018_v36 }
0x15b4   :  { %10190 = vmatprep.subr.mxu1 %v13543_v12  ;;  %10162 = vmatpush3.msra.mxu0 %v7855_v0  ;;  %v8321_v0 = vld [vmem:[#allocation5 + $0x8] sm:$0xff] }
0x15b5   :  { %10191 = vmatpush3.msra.mxu1 %v12681_v17  ;;  %10163 = vmatprep.subr.mxu0 %v13543_v12  ;;  %v8449_v17 = vand.u32 4294901760, %v8448_v18  ;;  %v8455_v30 = vsub.f32 %v13018_v36, %v8454_v26  ;;  %v13039_v57 = vand.u32 4294901760, %v8321_v0 }
0x15b6   :  { %10192 = vmatprep.subr.mxu1 %v13543_v12  ;;  %10164 = vmatpush3.msra.mxu0 %v7862_v40 }
0x15b7   :  { %10193 = vmatpush3.msra.mxu1 %v12698_v47  ;;  %10165 = vmatprep.subr.mxu0 %v13543_v12  ;;  %v8323_v47 = vld [vmem:[#allocation5 + $0x18] sm:$0xff]  ;;  %v8456_v40 = vand.u32 4294901760, %v8455_v30 }
0x15b8   :  { %10194 = vmatprep.subr.mxu1 %v13543_v12  ;;  %10166 = vmatpush3.msra.mxu0 %v7869_v46  ;;  %v13020_v58 = vand.u32 4294901760, %v8323_v47 }
0x15b9   :  { %10195 = vmatpush3.msra.mxu1 %v12716_v52  ;;  %10167 = vmatprep.subr.mxu0 %v13543_v12  ;;  %v8322_v52 = vld [vmem:[#allocation5 + $0x10] sm:$0xff] }
0x15ba   :  { %10196 = vmatprep.subr.mxu1 %v13543_v12  ;;  %10168 = vmatpush3.msra.mxu0 %v7876_v28  ;;  %v13026_v63 = vsub.f32 %v8323_v47, %v13020_v58  ;;  %v8482_v28 = vand.u32 4294901760, %v13060_v54 }
0x15bb   :  { %10197 = vmatpush3.msra.mxu1 %v12732_v41  ;;  %10169 = vmatprep.subr.mxu0 %v13543_v12  ;;  %v13028_v41 = vand.u32 4294901760, %v8322_v52 }
0x15bc   :  { %10198 = vmatprep.subr.mxu1 %v13543_v12  ;;  %10170 = vmatpush3.msra.mxu0 %v7883_v4  ;;  %v8483_v23 = vsub.f32 %v13060_v54, %v8482_v28 }
0x15bd   :  { %10199 = vmatpush3.msra.mxu1 %v12745_v38  ;;  %10171 = vmatprep.subr.mxu0 %v13543_v12  ;;  %v8461_v38 = vand.u32 4294901760, %v13026_v63  ;;  %v13037_v44 = vsub.f32 %v8322_v52, %v13028_v41 }
0x15be   :  { %10200 = vmatprep.subr.mxu1 %v13543_v12  ;;  %10172 = vmatpush3.msra.mxu0 %v7890_v51 }
0x15bf   :  { %10173 = vmatprep.mubr.msk.f32.mxu0 %vm10657_vm11, %v13543_v12  ;;  %10201 = vmatpush3.msra.mxu1 %v12766_v24  ;;  %v8462_v60 = vsub.f32 %v13026_v63, %v8461_v38  ;;  %v8468_v62 = vand.u32 4294901760, %v13037_v44  ;;  %v13048_v24 = vsub.f32 %v8321_v0, %v13039_v57  ;;  %v9483_v0 = vld [vmem:[%s13401_s10] ss:$0 sm:$0xff] }
0x15c0   :  { %10202 = vmatprep.mubr.msk.f32.mxu1 %vm10657_vm11, %v13543_v12  ;;  %10174 = vmatmul.mubr.f32.vlgmr.msra.gmra.mxu0 %v12793_v50 }
0x15c1   :  { %10203 = vmatmul.mubr.f32.vlgmr.msra.gmra.mxu1 %v12793_v50  ;;  %10224 = vmatprep.subr.mxu1 %v13543_v12  ;;  %v8463_v19 = vand.u32 4294901760, %v8462_v60  ;;  %v8469_v46 = vsub.f32 %v13037_v44, %v8468_v62  ;;  %v8475_v29 = vand.u32 4294901760, %v13048_v24  ;;  %v8484_v50 = vand.u32 4294901760, %v8483_v23 }
0x15c2   :  { %10205 = vmatprep.subr.mxu0 %v13543_v12  ;;  %10240 = vmatprep.mubr.msk.f32.mxu1 %vm10657_vm11, %v13543_v12 }
0x15c3   :  { %10221 = vmatprep.mubr.msk.f32.mxu0 %vm10657_vm11, %v13543_v12  ;;  %10206 = vmatpush3.msra.mxu0 %v12979_v14  ;;  %v8470_v53 = vand.u32 4294901760, %v8469_v46  ;;  %v8476_v49 = vsub.f32 %v13048_v24, %v8475_v29 }
0x15c4   :  { %10207 = vmatprep.subr.mxu0 %v13543_v12  ;;  %10225 = vmatpush3.msra.mxu1 %v8435_v9 }
0x15c5   :  { %10208 = vmatpush3.msra.mxu0 %v12981_v34  ;;  %10226 = vmatprep.subr.mxu1 %v13543_v12  ;;  %v8477_v32 = vand.u32 4294901760, %v8476_v49 }
0x15c6   :  { %10209 = vmatprep.subr.mxu0 %v13543_v12  ;;  %10227 = vmatpush3.msra.mxu1 %v8442_v56 }
0x15c7   :  { %10210 = vmatpush3.msra.mxu0 %v12983_v13  ;;  %10228 = vmatprep.subr.mxu1 %v13543_v12 }
0x15c8   :  { %10211 = vmatprep.subr.mxu0 %v13543_v12  ;;  %10229 = vmatpush3.msra.mxu1 %v8449_v17 }
0x15c9   :  { %10230 = vmatprep.subr.mxu1 %v13543_v12  ;;  %10212 = vmatpush3.msra.mxu0 %v13014_v22 }
0x15ca   :  { %10213 = vmatprep.subr.mxu0 %v13543_v12  ;;  %10231 = vmatpush3.msra.mxu1 %v8456_v40 }
0x15cb   :  { %10214 = vmatpush3.msra.mxu0 %v13020_v58  ;;  %10232 = vmatprep.subr.mxu1 %v13543_v12 }
0x15cc   :  { %10215 = vmatprep.subr.mxu0 %v13543_v12  ;;  %10233 = vmatpush3.msra.mxu1 %v8463_v19 }
0x15cd   :  { %10216 = vmatpush3.msra.mxu0 %v13028_v41  ;;  %10234 = vmatprep.subr.mxu1 %v13543_v12 }
0x15ce   :  { %10217 = vmatprep.subr.mxu0 %v13543_v12  ;;  %10235 = vmatpush3.msra.mxu1 %v8470_v53 }
0x15cf   :  { %10218 = vmatpush3.msra.mxu0 %v13039_v57  ;;  %10236 = vmatprep.subr.mxu1 %v13543_v12 }
0x15d0   :  { %10219 = vmatprep.subr.mxu0 %v13543_v12  ;;  %10237 = vmatpush3.msra.mxu1 %v8477_v32 }
0x15d1   :  { %10220 = vmatpush3.msra.mxu0 %v13051_v37  ;;  %10238 = vmatprep.subr.mxu1 %v13543_v12 }
0x15d2   :  { %10243 = vmatprep.subr.mxu0 %v13543_v12  ;;  %10239 = vmatpush3.msra.mxu1 %v8484_v50 }
0x15d3   :  { %10262 = vmatprep.subr.mxu1 %v13543_v12 }
0x1606   :  { %v7332_v1 = vpop.f32.mrf.mxu1 }
0x1608   :  { %v9954_v4 = vpop.f32.mrf.mxu1 }
0x160e   :  { %v7221_v10 = vpop.f32.mrf.mxu0 }
0x160f   :  { %v7222_v51 = vadd.f32 %v9482_v7, %v7221_v10 }
0x1610   :  { %v9935_v16 = vpop.f32.mrf.mxu0 }
0x1611   :  { %v7333_v61 = vadd.f32 %v7332_v1, %v7222_v51 }
0x1616   :  { %v7501_v8 = vpop.f32.mrf.mxu1 }
0x1618   :  { %v9992_v27 = vpop.f32.mrf.mxu1 }
0x161f   :  { %v7420_v39 = vpop.f32.mrf.mxu0 }
0x1620   :  { %v7421_v59 = vadd.f32 %v7420_v39, %v7333_v61  ;;  %v8319_v61 = vld [vmem:[%s13402_s11 + $0x38] sm:$0xff]  ;;  %v8317_v39 = vld [vmem:[%s13402_s11 + $0x28] sm:$0xff] }
0x1621   :  { %v9973_v45 = vpop.f32.mrf.mxu0  ;;  %v13119_v27 = vand.u32 4294901760, %v8319_v61 }
0x1622   :  { %v7502_v25 = vadd.f32 %v7501_v8, %v7421_v59  ;;  %v8318_v8 = vld [vmem:[%s13402_s11 + $0x30] sm:$0xff]  ;;  %v8316_v45 = vld [vmem:[%s13402_s11 + $0x20] sm:$0xff] }
0x1623   :  { %v13128_v59 = vand.u32 4294901760, %v8318_v8 }
0x1628   :  { %v7675_v5 = vpop.f32.mrf.mxu1 }
0x162a   :  { %v10030_v35 = vpop.f32.mrf.mxu1 }
0x162b   :  { %v13149_v35 = vand.u32 4294901760, %v8316_v45 }
0x1630   :  { %v7596_v48 = vpop.f32.mrf.mxu0 }
0x1631   :  { %v7597_v2 = vadd.f32 %v7596_v48, %v7502_v25  ;;  %v13138_v25 = vsub.f32 %v8319_v61, %v13119_v27 }
0x1632   :  { %v10011_v15 = vpop.f32.mrf.mxu0 }
0x1633   :  { %v13078_v11 = vadd.f32 %v7675_v5, %v7597_v2  ;;  %v13147_v5 = vsub.f32 %v8318_v8, %v13128_v59  ;;  %v8314_v2 = vld [vmem:[%s13402_s11 + $0x10] sm:$0xff] }
0x1648   :  { %v7929_v6 = vpop.f32.mrf.mxu1 }
0x164a   :  { %v7793_v18 = vpop.f32.mrf.mxu0  ;;  %v10088_v9 = vpop.f32.mrf.mxu1 }
0x164b   :  { %v7794_v30 = vadd.f32 %v9483_v0, %v7793_v18  ;;  %v8313_v18 = vld [vmem:[%s13402_s11 + $0x8] sm:$0xff]  ;;  %v13181_v9 = vand.u32 4294901760, %v8314_v2  ;;  %v7679_v0 = vmax.f32 %v13078_v11, 0.0 }
0x164c   :  { %v10059_v56 = vpop.f32.mrf.mxu0 }
0x164d   :  { %v7930_v55 = vadd.f32 %v7929_v6, %v7794_v30  ;;  %v13174_v6 = vsub.f32 %v8316_v45, %v13149_v35  ;;  %v8312_v56 = vld [vmem:[%s13402_s11] sm:$0xff]  ;;  %v8869_v11 = vsel %vm1483_vm9, %v7679_v0, 0 }
0x1664   :  { %v8027_v17 = vpop.f32.mrf.mxu0 }
0x1665   :  { %v8028_v40 = vadd.f32 %v8027_v17, %v7930_v55  ;;  %v13198_v17 = vand.u32 4294901760, %v8313_v18 }
0x1666   :  { %v8113_v31 = vpop.f32.mrf.mxu1  ;;  %v10117_v47 = vpop.f32.mrf.mxu0 }
0x1667   :  { %v8114_v60 = vadd.f32 %v8113_v31, %v8028_v40  ;;  %v13212_v31 = vand.u32 4294901760, %v8312_v56  ;;  %v13225_v47 = vsub.f32 %v8313_v18, %v13198_v17 }
0x1668   :  { %v10146_v52 = vpop.f32.mrf.mxu1 }
0x1669   :  { %v13237_v52 = vsub.f32 %v8312_v56, %v13212_v31 }
0x1680   :  { %v8223_v19 = vpop.f32.mrf.mxu0 }
0x1681   :  { %v8224_v46 = vadd.f32 %v8223_v19, %v8114_v60  ;;  %v8307_v53 = vpop.f32.mrf.mxu1 }
0x1682   :  { %v10175_v49 = vpop.f32.mrf.mxu0 }
0x1683   :  { %v8308_v32 = vadd.f32 %v8307_v53, %v8224_v46  ;;  %v10204_v1 = vpop.f32.mrf.mxu1 }
0x1685   :  { %v8311_v23 = vmax.f32 %v8308_v32, 0.0 }
0x1687   :  { %v8329_v4 = vsel %vm1483_vm9, %v8311_v23, 0 }
0x1688   :  { %v13084_v50 = vand.u32 4294901760, %v8329_v4 }
0x168a   :  { %v8405_v7 = vsub.f32 %v8329_v4, %v13084_v50  ;;  %10241 = vmatmul.mubr.f32.vlgmr.msra.gmra.mxu1 %v13084_v50 }
0x168b   :  { %10263 = vmatpush3.msra.mxu1 %v12979_v14  ;;  %10278 = vmatprep.mubr.msk.f32.mxu1 %vm10657_vm11, %v13543_v12 }
0x168c   :  { %v8406_v10 = vand.u32 4294901760, %v8405_v7  ;;  %10264 = vmatprep.subr.mxu1 %v13543_v12 }
0x168d   :  { %10265 = vmatpush3.msra.mxu1 %v12981_v34 }
0x168e   :  { %10266 = vmatprep.subr.mxu1 %v13543_v12  ;;  %v8407_v51 = vsub.f32 %v8405_v7, %v8406_v10 }
0x168f   :  { %10267 = vmatpush3.msra.mxu1 %v12983_v13 }
0x1690   :  { %10268 = vmatprep.subr.mxu1 %v13543_v12  ;;  %v8408_v16 = vand.u32 4294901760, %v8407_v51 }
0x1691   :  { %10269 = vmatpush3.msra.mxu1 %v13014_v22 }
0x1692   :  { %10270 = vmatprep.subr.mxu1 %v13543_v12  ;;  %10222 = vmatmul.mubr.f32.vlgmr.msra.gmra.mxu0 %v8408_v16 }
0x1693   :  { %10244 = vmatpush3.msra.mxu0 %v12986_v33  ;;  %10271 = vmatpush3.msra.mxu1 %v13020_v58 }
0x1694   :  { %10245 = vmatprep.subr.mxu0 %v13543_v12  ;;  %10272 = vmatprep.subr.mxu1 %v13543_v12 }
0x1695   :  { %10246 = vmatpush3.msra.mxu0 %v12989_v21  ;;  %10273 = vmatpush3.msra.mxu1 %v13028_v41 }
0x1696   :  { %10247 = vmatprep.subr.mxu0 %v13543_v12  ;;  %10274 = vmatprep.subr.mxu1 %v13543_v12 }
0x1697   :  { %10248 = vmatpush3.msra.mxu0 %v12992_v20  ;;  %10275 = vmatpush3.msra.mxu1 %v13039_v57 }
0x1698   :  { %10249 = vmatprep.subr.mxu0 %v13543_v12  ;;  %10276 = vmatprep.subr.mxu1 %v13543_v12 }
0x1699   :  { %10250 = vmatpush3.msra.mxu0 %v13018_v36  ;;  %10277 = vmatpush3.msra.mxu1 %v13051_v37 }
0x169a   :  { %10251 = vmatprep.subr.mxu0 %v13543_v12  ;;  %10279 = vmatmul.mubr.f32.vlgmr.msra.gmra.mxu1 %v8406_v10 }
0x169b   :  { %10300 = vmatprep.subr.mxu1 %v13543_v12  ;;  %10252 = vmatpush3.msra.mxu0 %v13026_v63 }
0x169c   :  { %10301 = vmatpush3.msra.mxu1 %v12979_v14  ;;  %10253 = vmatprep.subr.mxu0 %v13543_v12  ;;  %v13140_v14 = vand.u32 4294901760, %v8317_v39 }
0x169d   :  { %10302 = vmatprep.subr.mxu1 %v13543_v12  ;;  %10254 = vmatpush3.msra.mxu0 %v13037_v44 }
0x169e   :  { %10303 = vmatpush3.msra.mxu1 %v12981_v34  ;;  %10255 = vmatprep.subr.mxu0 %v13543_v12  ;;  %v8315_v34 = vld [vmem:[%s13402_s11 + $0x18] sm:$0xff]  ;;  %v13161_v48 = vsub.f32 %v8317_v39, %v13140_v14 }
0x169f   :  { %10304 = vmatprep.subr.mxu1 %v13543_v12  ;;  %10256 = vmatpush3.msra.mxu0 %v13048_v24  ;;  %v13167_v15 = vand.u32 4294901760, %v8315_v34 }
0x16a0   :  { %10305 = vmatpush3.msra.mxu1 %v12983_v13  ;;  %10257 = vmatprep.subr.mxu0 %v13543_v12  ;;  %v8973_v13 = vand.u32 4294901760, %v13138_v25 }
0x16a1   :  { %10306 = vmatprep.subr.mxu1 %v13543_v12  ;;  %10258 = vmatpush3.msra.mxu0 %v13060_v54 }
0x16a2   :  { %10259 = vmatprep.mubr.msk.f32.mxu0 %vm10657_vm11, %v13543_v12  ;;  %10307 = vmatpush3.msra.mxu1 %v13014_v22  ;;  %v8980_v22 = vand.u32 4294901760, %v13147_v5  ;;  %v8974_v33 = vsub.f32 %v13138_v25, %v8973_v13 }
0x16a3   :  { %10260 = vmatmul.mubr.f32.vlgmr.msra.gmra.mxu0 %v8405_v7  ;;  %10281 = vmatprep.subr.mxu0 %v13543_v12 }
0x16a4   :  { %10308 = vmatprep.subr.mxu1 %v13543_v12  ;;  %10282 = vmatpush3.msra.mxu0 %v8433_v42  ;;  %v8987_v42 = vand.u32 4294901760, %v13161_v48  ;;  %v8981_v21 = vsub.f32 %v13147_v5, %v8980_v22  ;;  %v8975_v20 = vand.u32 4294901760, %v8974_v33 }
0x16a5   :  { %10309 = vmatpush3.msra.mxu1 %v13020_v58  ;;  %10283 = vmatprep.subr.mxu0 %v13543_v12  ;;  %v13196_v58 = vsub.f32 %v8315_v34, %v13167_v15 }
0x16a6   :  { %10310 = vmatprep.subr.mxu1 %v13543_v12  ;;  %10284 = vmatpush3.msra.mxu0 %v8440_v3  ;;  %v8994_v3 = vand.u32 4294901760, %v13174_v6  ;;  %v8982_v36 = vand.u32 4294901760, %v8981_v21 }
0x16a7   :  { %10311 = vmatpush3.msra.mxu1 %v13028_v41  ;;  %10285 = vmatprep.subr.mxu0 %v13543_v12  ;;  %v13210_v41 = vsub.f32 %v8314_v2, %v13181_v9 }
0x16a8   :  { %10312 = vmatprep.subr.mxu1 %v13543_v12  ;;  %10286 = vmatpush3.msra.mxu0 %v8447_v43  ;;  %v8988_v43 = vsub.f32 %v13161_v48, %v8987_v42 }
0x16a9   :  { %10313 = vmatpush3.msra.mxu1 %v13039_v57  ;;  %10287 = vmatprep.subr.mxu0 %v13543_v12  ;;  %v9001_v57 = vand.u32 4294901760, %v13196_v58 }
0x16aa   :  { %10314 = vmatprep.subr.mxu1 %v13543_v12  ;;  %10288 = vmatpush3.msra.mxu0 %v8454_v26  ;;  %v8995_v26 = vsub.f32 %v13174_v6, %v8994_v3  ;;  %v8989_v30 = vand.u32 4294901760, %v8988_v43 }
0x16ab   :  { %10315 = vmatpush3.msra.mxu1 %v13051_v37  ;;  %10316 = vmatprep.mubr.msk.f32.mxu1 %vm10657_vm11, %v13543_v12  ;;  %v9008_v37 = vand.u32 4294901760, %v13210_v41  ;;  %v9002_v63 = vsub.f32 %v13196_v58, %v9001_v57 }
0x16ac   :  { %10289 = vmatprep.subr.mxu0 %v13543_v12  ;;  %10317 = vmatmul.mubr.f32.vlgmr.msra.gmra.mxu1 %v13084_v50  ;;  %v8996_v55 = vand.u32 4294901760, %v8995_v26 }
0x16ad   :  { %10338 = vmatprep.subr.mxu1 %v13543_v12  ;;  %10290 = vmatpush3.msra.mxu0 %v8461_v38  ;;  %v9015_v38 = vand.u32 4294901760, %v13225_v47  ;;  %v9009_v44 = vsub.f32 %v13210_v41, %v9008_v37  ;;  %v9003_v40 = vand.u32 4294901760, %v9002_v63 }
0x16ae   :  { %10339 = vmatpush3.msra.mxu1 %v8975_v20  ;;  %10291 = vmatprep.subr.mxu0 %v13543_v12 }
0x16af   :  { %10340 = vmatprep.subr.mxu1 %v13543_v12  ;;  %10292 = vmatpush3.msra.mxu0 %v8468_v62  ;;  %v9022_v62 = vand.u32 4294901760, %v13237_v52  ;;  %v9016_v24 = vsub.f32 %v13225_v47, %v9015_v38  ;;  %v9010_v60 = vand.u32 4294901760, %v9009_v44 }
0x16b0   :  { %10341 = vmatpush3.msra.mxu1 %v8982_v36  ;;  %10293 = vmatprep.subr.mxu0 %v13543_v12 }
0x16b1   :  { %10342 = vmatprep.subr.mxu1 %v13543_v12  ;;  %10294 = vmatpush3.msra.mxu0 %v8475_v29  ;;  %v13266_v29 = vand.u32 4294901760, %v8869_v11  ;;  %v9023_v54 = vsub.f32 %v13237_v52, %v9022_v62 }
0x16b2   :  { %10343 = vmatpush3.msra.mxu1 %v8989_v30  ;;  %10295 = vmatprep.subr.mxu0 %v13543_v12 }
0x16b3   :  { %10344 = vmatprep.subr.mxu1 %v13543_v12  ;;  %10296 = vmatpush3.msra.mxu0 %v8482_v28  ;;  %v9017_v28 = vand.u32 4294901760, %v9016_v24  ;;  %v13279_v19 = vsub.f32 %v8869_v11, %v13266_v29  ;;  %v9024_v46 = vand.u32 4294901760, %v9023_v54 }
0x16b4   :  { %10297 = vmatprep.mubr.msk.f32.mxu0 %vm10657_vm11, %v13543_v12  ;;  %10345 = vmatpush3.msra.mxu1 %v8996_v55 }
0x16b5   :  { %10298 = vmatmul.mubr.f32.vlgmr.msra.gmra.mxu0 %v13084_v50  ;;  %10319 = vmatprep.subr.mxu0 %v13543_v12  ;;  %v8946_v53 = vand.u32 4294901760, %v13279_v19 }
0x16b6   :  { %10346 = vmatprep.subr.mxu1 %v13543_v12  ;;  %10320 = vmatpush3.msra.mxu0 %v13119_v27 }
0x16b7   :  { %10347 = vmatpush3.msra.mxu1 %v9003_v40  ;;  %10321 = vmatprep.subr.mxu0 %v13543_v12  ;;  %v8947_v49 = vsub.f32 %v13279_v19, %v8946_v53 }
0x16b8   :  { %10348 = vmatprep.subr.mxu1 %v13543_v12  ;;  %10322 = vmatpush3.msra.mxu0 %v13128_v59 }
0x16b9   :  { %10349 = vmatpush3.msra.mxu1 %v9010_v60  ;;  %10323 = vmatprep.subr.mxu0 %v13543_v12  ;;  %v8948_v32 = vand.u32 4294901760, %v8947_v49 }
0x16ba   :  { %10350 = vmatprep.subr.mxu1 %v13543_v12  ;;  %10324 = vmatpush3.msra.mxu0 %v13140_v14 }
0x16bb   :  { %10351 = vmatpush3.msra.mxu1 %v9017_v28  ;;  %10325 = vmatprep.subr.mxu0 %v13543_v12 }
0x16bc   :  { %10352 = vmatprep.subr.mxu1 %v13543_v12  ;;  %10326 = vmatpush3.msra.mxu0 %v13149_v35 }
0x16bd   :  { %10353 = vmatpush3.msra.mxu1 %v9024_v46  ;;  %10354 = vmatprep.mubr.msk.f32.mxu1 %vm10657_vm11, %v13543_v12 }
0x16be   :  { %10327 = vmatprep.subr.mxu0 %v13543_v12  ;;  %10355 = vmatmul.mubr.f32.vlgmr.msra.gmra.mxu1 %v13266_v29 }
0x16bf   :  { %10376 = vmatprep.subr.mxu1 %v13543_v12  ;;  %10328 = vmatpush3.msra.mxu0 %v13167_v15 }
0x16c0   :  { %10377 = vmatpush3.msra.mxu1 %v13119_v27  ;;  %10329 = vmatprep.subr.mxu0 %v13543_v12 }
0x16c1   :  { %10378 = vmatprep.subr.mxu1 %v13543_v12  ;;  %10330 = vmatpush3.msra.mxu0 %v13181_v9 }
0x16c2   :  { %10379 = vmatpush3.msra.mxu1 %v13128_v59  ;;  %10331 = vmatprep.subr.mxu0 %v13543_v12 }
0x16c3   :  { %10380 = vmatprep.subr.mxu1 %v13543_v12  ;;  %10332 = vmatpush3.msra.mxu0 %v13198_v17 }
0x16c4   :  { %10381 = vmatpush3.msra.mxu1 %v13140_v14  ;;  %10333 = vmatprep.subr.mxu0 %v13543_v12 }
0x16c5   :  { %10382 = vmatprep.subr.mxu1 %v13543_v12  ;;  %10334 = vmatpush3.msra.mxu0 %v13212_v31 }
0x16c6   :  { %10335 = vmatprep.mubr.msk.f32.mxu0 %vm10657_vm11, %v13543_v12  ;;  %10383 = vmatpush3.msra.mxu1 %v13149_v35 }
0x16c7   :  { %10336 = vmatmul.mubr.f32.vlgmr.msra.gmra.mxu0 %v8948_v32  ;;  %10357 = vmatprep.subr.mxu0 %v13543_v12 }
0x16c8   :  { %10384 = vmatprep.subr.mxu1 %v13543_v12  ;;  %10358 = vmatpush3.msra.mxu0 %v13138_v25 }
0x16c9   :  { %10385 = vmatpush3.msra.mxu1 %v13167_v15  ;;  %10359 = vmatprep.subr.mxu0 %v13543_v12 }
0x16ca   :  { %10386 = vmatprep.subr.mxu1 %v13543_v12  ;;  %10360 = vmatpush3.msra.mxu0 %v13147_v5 }
0x16cb   :  { %10387 = vmatpush3.msra.mxu1 %v13181_v9  ;;  %10361 = vmatprep.subr.mxu0 %v13543_v12 }
0x16cc   :  { %10388 = vmatprep.subr.mxu1 %v13543_v12  ;;  %10362 = vmatpush3.msra.mxu0 %v13161_v48 }
0x16cd   :  { %10389 = vmatpush3.msra.mxu1 %v13198_v17  ;;  %10363 = vmatprep.subr.mxu0 %v13543_v12 }
0x16ce   :  { %10390 = vmatprep.subr.mxu1 %v13543_v12  ;;  %10364 = vmatpush3.msra.mxu0 %v13174_v6 }
0x16cf   :  { %10391 = vmatpush3.msra.mxu1 %v13212_v31  ;;  %10392 = vmatprep.mubr.msk.f32.mxu1 %vm10657_vm11, %v13543_v12 }
0x16d0   :  { %10365 = vmatprep.subr.mxu0 %v13543_v12  ;;  %10393 = vmatmul.mubr.f32.vlgmr.msra.gmra.mxu1 %v8946_v53 }
0x16d1   :  { %10414 = vmatprep.subr.mxu1 %v13543_v12  ;;  %10366 = vmatpush3.msra.mxu0 %v13196_v58 }
0x16d2   :  { %10415 = vmatpush3.msra.mxu1 %v13119_v27  ;;  %10367 = vmatprep.subr.mxu0 %v13543_v12 }
0x16d3   :  { %10416 = vmatprep.subr.mxu1 %v13543_v12  ;;  %10368 = vmatpush3.msra.mxu0 %v13210_v41 }
0x16d4   :  { %10417 = vmatpush3.msra.mxu1 %v13128_v59  ;;  %10369 = vmatprep.subr.mxu0 %v13543_v12 }
0x16d5   :  { %10418 = vmatprep.subr.mxu1 %v13543_v12  ;;  %10370 = vmatpush3.msra.mxu0 %v13225_v47 }
0x16d6   :  { %10419 = vmatpush3.msra.mxu1 %v13140_v14  ;;  %10371 = vmatprep.subr.mxu0 %v13543_v12 }
0x16d7   :  { %10420 = vmatprep.subr.mxu1 %v13543_v12  ;;  %10372 = vmatpush3.msra.mxu0 %v13237_v52 }
0x16d8   :  { %10373 = vmatprep.mubr.msk.f32.mxu0 %vm10657_vm11, %v13543_v12  ;;  %10421 = vmatpush3.msra.mxu1 %v13149_v35 }
0x16d9   :  { %10374 = vmatmul.mubr.f32.vlgmr.msra.gmra.mxu0 %v13279_v19  ;;  %10395 = vmatprep.subr.mxu0 %v13543_v12 }
0x16da   :  { %10422 = vmatprep.subr.mxu1 %v13543_v12  ;;  %10396 = vmatpush3.msra.mxu0 %v8973_v13 }
0x16db   :  { %10423 = vmatpush3.msra.mxu1 %v13167_v15  ;;  %10397 = vmatprep.subr.mxu0 %v13543_v12 }
0x16dc   :  { %10424 = vmatprep.subr.mxu1 %v13543_v12  ;;  %10398 = vmatpush3.msra.mxu0 %v8980_v22 }
0x16dd   :  { %10425 = vmatpush3.msra.mxu1 %v13181_v9  ;;  %10399 = vmatprep.subr.mxu0 %v13543_v12 }
0x16de   :  { %10426 = vmatprep.subr.mxu1 %v13543_v12  ;;  %10400 = vmatpush3.msra.mxu0 %v8987_v42 }
0x16df   :  { %10427 = vmatpush3.msra.mxu1 %v13198_v17  ;;  %10401 = vmatprep.subr.mxu0 %v13543_v12 }
0x16e0   :  { %10428 = vmatprep.subr.mxu1 %v13543_v12  ;;  %10402 = vmatpush3.msra.mxu0 %v8994_v3  ;;  %v9484_v3 = vld [vmem:[%s13404_s13] ss:$0 sm:$0xff] }
0x16e1   :  { %10429 = vmatpush3.msra.mxu1 %v13212_v31  ;;  %10430 = vmatprep.mubr.msk.f32.mxu1 %vm10657_vm11, %v13543_v12 }
0x16e2   :  { %10403 = vmatprep.subr.mxu0 %v13543_v12  ;;  %10431 = vmatmul.mubr.f32.vlgmr.msra.gmra.mxu1 %v13266_v29 }
0x16e3   :  { %10404 = vmatpush3.msra.mxu0 %v9001_v57  ;;  %10411 = vmatprep.mubr.msk.f32.mxu0 %vm10657_vm11, %v13543_v12 }
0x16e4   :  { %10405 = vmatprep.subr.mxu0 %v13543_v12 }
0x16e5   :  { %10406 = vmatpush3.msra.mxu0 %v9008_v37 }
0x16e6   :  { %10407 = vmatprep.subr.mxu0 %v13543_v12 }
0x16e7   :  { %10408 = vmatpush3.msra.mxu0 %v9015_v38 }
0x16e8   :  { %10409 = vmatprep.subr.mxu0 %v13543_v12 }
0x16e9   :  { %10410 = vmatpush3.msra.mxu0 %v9022_v62 }
0x16ea   :  { %10412 = vmatmul.mubr.f32.vlgmr.msra.gmra.mxu0 %v13266_v29 }
0x174a   :  { %v8521_v1 = vpop.f32.mrf.mxu1 }
0x174c   :  { %v10242_v23 = vpop.f32.mrf.mxu1 }
0x1752   :  { %v8410_v4 = vpop.f32.mrf.mxu0 }
0x1753   :  { %v8522_v50 = vadd.f32 %v8521_v1, %v8410_v4 }
0x1754   :  { %v10223_v7 = vpop.f32.mrf.mxu0 }
0x175a   :  { %v8690_v10 = vpop.f32.mrf.mxu1 }
0x175c   :  { %v10280_v51 = vpop.f32.mrf.mxu1 }
0x1763   :  { %v8609_v16 = vpop.f32.mrf.mxu0 }
0x1764   :  { %v8610_v61 = vadd.f32 %v8609_v16, %v8522_v50 }
0x1765   :  { %v10261_v8 = vpop.f32.mrf.mxu0 }
0x1766   :  { %v8691_v27 = vadd.f32 %v8690_v10, %v8610_v61 }
0x176c   :  { %v8864_v39 = vpop.f32.mrf.mxu1 }
0x176e   :  { %v10318_v59 = vpop.f32.mrf.mxu1 }
0x1775   :  { %v8785_v45 = vpop.f32.mrf.mxu0 }
0x1776   :  { %v8786_v48 = vadd.f32 %v8785_v45, %v8691_v27 }
0x1777   :  { %v10299_v12 = vpop.f32.mrf.mxu0 }
0x1778   :  { %v8865_v22 = vadd.f32 %v8864_v39, %v8786_v48 }
0x177e   :  { %v9061_v25 = vpop.f32.mrf.mxu1 }
0x1780   :  { %v10356_v14 = vpop.f32.mrf.mxu1 }
0x1787   :  { %v8950_v5 = vpop.f32.mrf.mxu0 }
0x1788   :  { %v8951_v6 = vadd.f32 %v8950_v5, %v8865_v22 }
0x1789   :  { %v10337_v35 = vpop.f32.mrf.mxu0 }
0x178a   :  { %v9062_v9 = vadd.f32 %v9061_v25, %v8951_v6 }
0x1790   :  { %v9230_v34 = vpop.f32.mrf.mxu1 }
0x1792   :  { %v10394_v13 = vpop.f32.mrf.mxu1 }
0x1799   :  { %v9149_v2 = vpop.f32.mrf.mxu0 }
0x179a   :  { %v9150_v42 = vadd.f32 %v9149_v2, %v9062_v9 }
0x179b   :  { %v10375_v15 = vpop.f32.mrf.mxu0 }
0x179c   :  { %v9231_v56 = vadd.f32 %v9230_v34, %v9150_v42 }
0x17a2   :  { %v9404_v18 = vpop.f32.mrf.mxu1 }
0x17a4   :  { %v10432_v33 = vpop.f32.mrf.mxu1 }
0x17aa   :  { %v9325_v58 = vpop.f32.mrf.mxu0 }
0x17ab   :  { %v9326_v17 = vadd.f32 %v9325_v58, %v9231_v56 }
0x17ac   :  { %v10413_v21 = vpop.f32.mrf.mxu0 }
0x17ad   :  { %v9405_v41 = vadd.f32 %v9404_v18, %v9326_v17 }
0x17af   :  { %v9415_v31 = vadd.f32 %v9484_v3, %v9405_v41 }
0x17b1   :  { %9416 = vst [vmem:[#allocation7] sm:$0xf] %v9415_v31 }
0x17b2   :  { %10633 = shalt.err (!%p10630_p0)
}
0x17b3   :  { %9426 = dma.vmem_to_hbm [thread:$0]  %s9424_s19, 64, %s13405_s14, [#allocation4]  }
0x17b4   :  { %10646 = dma.done.wait [#allocation4], 64  }
0x17b5   :  { %10647 = vsyncadd [#allocation4], 4294967232 }
0x17b6   :  { %9430 = vsyncpa [#allocation3], 1 }
0x17b7   :  { %9431 = vsyncpa [#allocation6], 1 }
0x17b8   :  { %9432 = vsyncpa [#allocation4], 1 }

</bundles_post_ra>
